<compile_context>
chip_gen: v7x
topology: tpu7x:2x2x1
jax: 0.10.0
libtpu: 0.0.40
codegen_flags: <defaults>
</compile_context>

<pallas_src>
import jax
import jax.numpy as jnp
import numpy as np
from jax import lax
from jax.experimental import pallas as pl
from jax.experimental.pallas import tpu as pltpu

VOCAB = 10
EMBED = 128
HIDDEN = 256
OUT = 10


def lstm_kernel(xproj_ref, whh_ref, hs_ref, h_scr, c_scr):
    """One grid step = one time-chunk of the LSTM recurrence.

    xproj_ref : (Tc, B_pad, 4H) bf16  precomputed x@W_ih^T + (b_ih+b_hh)
    whh_ref   : (H, 4H)         bf16  W_hh^T (same block every grid step)
    hs_ref    : (Tc, B_pad, H)  bf16  hidden states for this chunk
    h_scr     : (B_pad, H)      f32   carried hidden state (VMEM scratch)
    c_scr     : (B_pad, H)      f32   carried cell state   (VMEM scratch)
    """
    H = HIDDEN
    Tc = xproj_ref.shape[0]

    @pl.when(pl.program_id(0) == 0)
    def _():
        h_scr[...] = jnp.zeros_like(h_scr)
        c_scr[...] = jnp.zeros_like(c_scr)

    whh = whh_ref[...]  # (H, 4H) bf16, reused by every step of the chunk

    def step(t, _):
        h = h_scr[...]
        c = c_scr[...]
        # Recurrent matmul on the MXU in bf16, accumulate in f32; add the
        # bf16-streamed input projection in f32.
        gates = (jnp.dot(h.astype(jnp.bfloat16), whh,
                         preferred_element_type=jnp.float32)
                 + xproj_ref[t].astype(jnp.float32))
        i_g = jax.nn.sigmoid(gates[:, 0 * H:1 * H])
        f_g = jax.nn.sigmoid(gates[:, 1 * H:2 * H])
        g_g = jnp.tanh(gates[:, 2 * H:3 * H])
        o_g = jax.nn.sigmoid(gates[:, 3 * H:4 * H])
        c_new = f_g * c + i_g * g_g
        h_new = o_g * jnp.tanh(c_new)
        hs_ref[t] = h_new.astype(hs_ref.dtype)
        h_scr[...] = h_new
        c_scr[...] = c_new
        return 0

    # Unroll only within the chunk (Tc is small & static).
    lax.fori_loop(0, Tc, step, 0, unroll=True)


def init_params(key):
    """Deterministic synthetic parameters with PyTorch-default-style inits."""
    k0, k1, k2, k3, k4, k5, k6 = jax.random.split(key, 7)
    bound_lstm = 1.0 / np.sqrt(HIDDEN)
    bound_lin = 1.0 / np.sqrt(HIDDEN)
    return dict(
        embed=jax.random.normal(k0, (VOCAB, EMBED), jnp.float32),
        w_ih=jax.random.uniform(k1, (4 * HIDDEN, EMBED), jnp.float32,
                                -bound_lstm, bound_lstm),
        w_hh=jax.random.uniform(k2, (4 * HIDDEN, HIDDEN), jnp.float32,
                                -bound_lstm, bound_lstm),
        b_ih=jax.random.uniform(k3, (4 * HIDDEN,), jnp.float32,
                                -bound_lstm, bound_lstm),
        b_hh=jax.random.uniform(k4, (4 * HIDDEN,), jnp.float32,
                                -bound_lstm, bound_lstm),
        w_lin=jax.random.uniform(k5, (OUT, HIDDEN), jnp.float32,
                                 -bound_lin, bound_lin),
        b_lin=jax.random.uniform(k6, (OUT,), jnp.float32,
                                 -bound_lin, bound_lin),
    )


def lstm_model_forward(sentence, params, time_chunk=8):
    """sentence: int32 (B, T) token ids -> float32 (B, T, 10) logits."""
    B, T = sentence.shape
    B_pad = max(8, ((B + 7) // 8) * 8)          # sublane multiple
    Tc = min(time_chunk, T) if T > 0 else time_chunk
    T_pad = ((T + Tc - 1) // Tc) * Tc           # grid-tile multiple

    # Pad token ids first, then embed -> x already in (T_pad, B_pad, E) layout.
    ids = jnp.zeros((T_pad, B_pad), jnp.int32)
    ids = lax.dynamic_update_slice(ids, jnp.transpose(sentence), (0, 0))
    x = jnp.take(params["embed"], ids, axis=0)                 # (T_pad, B_pad, E)

    # Hoisted input projection: one big MXU-efficient GEMM, streamed as bf16.
    bias = params["b_ih"] + params["b_hh"]                     # (4H,)
    x_proj = (jnp.einsum("tbe,ge->tbg", x, params["w_ih"]) + bias
              ).astype(jnp.bfloat16)                           # (T_pad, B_pad, 4H)

    whh_t = params["w_hh"].T.astype(jnp.bfloat16)              # (H, 4H) bf16

    grid = (T_pad // Tc,)
    hs = pl.pallas_call(
        lstm_kernel,
        out_shape=jax.ShapeDtypeStruct((T_pad, B_pad, HIDDEN), jnp.bfloat16),
        grid_spec=pltpu.PrefetchScalarGridSpec(
            num_scalar_prefetch=0,
            grid=grid,
            in_specs=[
                pl.BlockSpec((Tc, B_pad, 4 * HIDDEN), lambda t: (t, 0, 0)),
                pl.BlockSpec((HIDDEN, 4 * HIDDEN), lambda t: (0, 0)),
            ],
            out_specs=pl.BlockSpec((Tc, B_pad, HIDDEN), lambda t: (t, 0, 0)),
            scratch_shapes=[
                pltpu.VMEM((B_pad, HIDDEN), jnp.float32),   # carried h
                pltpu.VMEM((B_pad, HIDDEN), jnp.float32),   # carried c
            ],
        ),
        compiler_params=pltpu.CompilerParams(
            dimension_semantics=("arbitrary",)),             # serial recurrence
    )(x_proj, whh_t)                                          # (T_pad, B_pad, H) bf16

    # Drop time/batch padding, go batch-first; lane-sparse Linear in XLA.
    # TODO(synk): for large real batches, split the batch across the two v7x
    # TensorCores (extra "parallel" grid axis) and stage W_hh^T on the MXU
    # across the time loop (matmul_push_rhs) instead of per-step jnp.dot.
    hs = jnp.transpose(hs[:T, :B, :], (1, 0, 2)).astype(jnp.float32)  # (B, T, H)
    return hs @ params["w_lin"].T + params["b_lin"]                   # (B, T, OUT)


def lstm_model_ref(sentence, params):
    """Pure-JAX f32 reference matching PyTorch LSTM semantics (state=None)."""
    B, T = sentence.shape
    x = jnp.take(params["embed"], sentence, axis=0)            # (B, T, E)

    def step(carry, x_t):
        h, c = carry
        gates = (x_t @ params["w_ih"].T + params["b_ih"]
                 + h @ params["w_hh"].T + params["b_hh"])
        i_g = jax.nn.sigmoid(gates[:, 0 * HIDDEN:1 * HIDDEN])
        f_g = jax.nn.sigmoid(gates[:, 1 * HIDDEN:2 * HIDDEN])
        g_g = jnp.tanh(gates[:, 2 * HIDDEN:3 * HIDDEN])
        o_g = jax.nn.sigmoid(gates[:, 3 * HIDDEN:4 * HIDDEN])
        c_new = f_g * c + i_g * g_g
        h_new = o_g * jnp.tanh(c_new)
        return (h_new, c_new), h_new

    h0 = jnp.zeros((B, HIDDEN), jnp.float32)
    c0 = jnp.zeros((B, HIDDEN), jnp.float32)
    _, hs = lax.scan(step, (h0, c0), jnp.transpose(x, (1, 0, 2)))  # (T, B, H)
    o = jnp.transpose(hs, (1, 0, 2))                                # (B, T, H)
    return o @ params["w_lin"].T + params["b_lin"]


if __name__ == "__main__":
    key = jax.random.PRNGKey(0)
    k_sent, k_params = jax.random.split(key)

    B, T = 2, 8
    sentence = jax.random.randint(k_sent, (B, T), 0, VOCAB, dtype=jnp.int32)
    params = init_params(k_params)

    out = jax.block_until_ready(lstm_model_forward(sentence, params))
    ref = jax.block_until_ready(lstm_model_ref(sentence, params))

    assert out.shape == (B, T, OUT)
    # bf16 streaming (x_proj, hs) + bf16 recurrent MXU vs f32 reference.
    np.testing.assert_allclose(np.asarray(out), np.asarray(ref),
                               rtol=3e-2, atol=3e-2)

    print("KERNEL_OK")
</pallas_src>

<mosaic_0001>
module attributes {stable_mosaic.version = 11 : i64} {
  func.func @lstm_kernel(%arg0: i32, %arg1: memref<8x8x1024xbf16, #tpu.memory_space<vmem>>, %arg2: memref<256x1024xbf16, #tpu.memory_space<vmem>>, %arg3: memref<8x8x256xbf16, #tpu.memory_space<vmem>>, %arg4: memref<8x256xf32, #tpu.memory_space<vmem>>, %arg5: memref<8x256xf32, #tpu.memory_space<vmem>>) attributes {dimension_semantics = [#tpu.dimension_semantics<arbitrary>], iteration_bounds = array<i64: 1>, scalar_prefetch = 0 : i64, scratch_operands = 2 : i64, tpu.core_type = #tpu.core_type<tc>, window_params = [{transform_indices = @transform_0, window_bounds = array<i64: 8, 8, 1024>}, {pipeline_mode = #tpu.pipeline_mode<synchronous>, transform_indices = @transform_1, window_bounds = array<i64: 256, 1024>}, {transform_indices = @transform_2, window_bounds = array<i64: 8, 8, 256>}]} {
    %c0_i32 = arith.constant 0 : i32
    %0 = arith.cmpi eq, %arg0, %c0_i32 : i32
    %1 = arith.extui %0 : i1 to i32
    %c0_i32_0 = arith.constant 0 : i32
    %2 = arith.cmpi ne, %1, %c0_i32_0 : i32
    scf.if %2 {
      %cst_130 = arith.constant 0.000000e+00 : f32
      %332 = vector.broadcast %cst_130 : f32 to vector<8x256xf32>
      %c0_131 = arith.constant 0 : index
      %c0_132 = arith.constant 0 : index
      %333 = vector.load %arg4[%c0_131, %c0_132] : memref<8x256xf32, #tpu.memory_space<vmem>>, vector<8x256xf32>
      tpu.vector_store %arg4[%c0_131, %c0_132], %332 {strides = array<i32>} : memref<8x256xf32, #tpu.memory_space<vmem>>, vector<8x256xf32>,
      %cst_133 = arith.constant 0.000000e+00 : f32
      %334 = vector.broadcast %cst_133 : f32 to vector<8x256xf32>
      %c0_134 = arith.constant 0 : index
      %c0_135 = arith.constant 0 : index
      %335 = vector.load %arg5[%c0_134, %c0_135] : memref<8x256xf32, #tpu.memory_space<vmem>>, vector<8x256xf32>
      tpu.vector_store %arg5[%c0_134, %c0_135], %334 {strides = array<i32>} : memref<8x256xf32, #tpu.memory_space<vmem>>, vector<8x256xf32>,
    } else {
    }
    %c0 = arith.constant 0 : index
    %c0_1 = arith.constant 0 : index
    %3 = vector.load %arg2[%c0, %c0_1] : memref<256x1024xbf16, #tpu.memory_space<vmem>>, vector<256x1024xbf16>
    %c0_i32_2 = arith.constant 0 : i32
    %c0_3 = arith.constant 0 : index
    %c0_4 = arith.constant 0 : index
    %4 = vector.load %arg4[%c0_3, %c0_4] : memref<8x256xf32, #tpu.memory_space<vmem>>, vector<8x256xf32>
    %c0_5 = arith.constant 0 : index
    %c0_6 = arith.constant 0 : index
    %5 = vector.load %arg5[%c0_5, %c0_6] : memref<8x256xf32, #tpu.memory_space<vmem>>, vector<8x256xf32>
    %6 = arith.truncf %4 : vector<8x256xf32> to vector<8x256xbf16>
    %cst = arith.constant dense<0.000000e+00> : vector<8x1024xf32>
    %7 = tpu.matmul %6, %3, %cst {dimension_numbers = #tpu.dot_dimension_numbers<[1], [0], [0], [1], [0, 0, 1, 1], [], []>} : vector<8x256xbf16>, vector<256x1024xbf16>, vector<8x1024xf32> -> vector<8x1024xf32>
    %8 = arith.index_cast %c0_i32_2 : i32 to index
    %c0_7 = arith.constant 0 : index
    %c0_8 = arith.constant 0 : index
    %9 = vector.load %arg1[%8, %c0_7, %c0_8] : memref<8x8x1024xbf16, #tpu.memory_space<vmem>>, vector<1x8x1024xbf16>
    %10 = vector.shape_cast %9 : vector<1x8x1024xbf16> to vector<8x1024xbf16>
    %11 = arith.extf %10 : vector<8x1024xbf16> to vector<8x1024xf32>
    %12 = arith.addf %7, %11 : vector<8x1024xf32>
    %13 = vector.extract_strided_slice %12 {offsets = [0, 0], sizes = [8, 256], strides = [1, 1]} : vector<8x1024xf32> to vector<8x256xf32>
    %14 = arith.negf %13 : vector<8x256xf32>
    %15 = math.exp %14 : vector<8x256xf32>
    %cst_9 = arith.constant 1.000000e+00 : f32
    %16 = vector.broadcast %cst_9 : f32 to vector<8x256xf32>
    %17 = arith.addf %16, %15 : vector<8x256xf32>
    %18 = arith.divf %16, %17 : vector<8x256xf32>
    %19 = vector.extract_strided_slice %12 {offsets = [0, 256], sizes = [8, 256], strides = [1, 1]} : vector<8x1024xf32> to vector<8x256xf32>
    %20 = arith.negf %19 : vector<8x256xf32>
    %21 = math.exp %20 : vector<8x256xf32>
    %cst_10 = arith.constant 1.000000e+00 : f32
    %22 = vector.broadcast %cst_10 : f32 to vector<8x256xf32>
    %23 = arith.addf %22, %21 : vector<8x256xf32>
    %24 = arith.divf %22, %23 : vector<8x256xf32>
    %25 = vector.extract_strided_slice %12 {offsets = [0, 512], sizes = [8, 256], strides = [1, 1]} : vector<8x1024xf32> to vector<8x256xf32>
    %26 = math.tanh %25 : vector<8x256xf32>
    %27 = vector.extract_strided_slice %12 {offsets = [0, 768], sizes = [8, 256], strides = [1, 1]} : vector<8x1024xf32> to vector<8x256xf32>
    %28 = arith.negf %27 : vector<8x256xf32>
    %29 = math.exp %28 : vector<8x256xf32>
    %cst_11 = arith.constant 1.000000e+00 : f32
    %30 = vector.broadcast %cst_11 : f32 to vector<8x256xf32>
    %31 = arith.addf %30, %29 : vector<8x256xf32>
    %32 = arith.divf %30, %31 : vector<8x256xf32>
    %33 = arith.mulf %24, %5 : vector<8x256xf32>
    %34 = arith.mulf %18, %26 : vector<8x256xf32>
    %35 = arith.addf %33, %34 : vector<8x256xf32>
    %36 = math.tanh %35 : vector<8x256xf32>
    %37 = arith.mulf %32, %36 : vector<8x256xf32>
    %38 = arith.truncf %37 : vector<8x256xf32> to vector<8x256xbf16>
    %39 = arith.index_cast %c0_i32_2 : i32 to index
    %c0_12 = arith.constant 0 : index
    %c0_13 = arith.constant 0 : index
    %40 = vector.load %arg3[%39, %c0_12, %c0_13] : memref<8x8x256xbf16, #tpu.memory_space<vmem>>, vector<1x8x256xbf16>
    %41 = vector.shape_cast %40 : vector<1x8x256xbf16> to vector<8x256xbf16>
    %42 = vector.shape_cast %38 : vector<8x256xbf16> to vector<1x8x256xbf16>
    tpu.vector_store %arg3[%39, %c0_12, %c0_13], %42 {strides = array<i32>} : memref<8x8x256xbf16, #tpu.memory_space<vmem>>, vector<1x8x256xbf16>,
    %c0_14 = arith.constant 0 : index
    %c0_15 = arith.constant 0 : index
    %43 = vector.load %arg4[%c0_14, %c0_15] : memref<8x256xf32, #tpu.memory_space<vmem>>, vector<8x256xf32>
    tpu.vector_store %arg4[%c0_14, %c0_15], %37 {strides = array<i32>} : memref<8x256xf32, #tpu.memory_space<vmem>>, vector<8x256xf32>,
    %c0_16 = arith.constant 0 : index
    %c0_17 = arith.constant 0 : index
    %44 = vector.load %arg5[%c0_16, %c0_17] : memref<8x256xf32, #tpu.memory_space<vmem>>, vector<8x256xf32>
    tpu.vector_store %arg5[%c0_16, %c0_17], %35 {strides = array<i32>} : memref<8x256xf32, #tpu.memory_space<vmem>>, vector<8x256xf32>,
    %c1_i32 = arith.constant 1 : i32
    %c0_18 = arith.constant 0 : index
    %c0_19 = arith.constant 0 : index
    %45 = vector.load %arg4[%c0_18, %c0_19] : memref<8x256xf32, #tpu.memory_space<vmem>>, vector<8x256xf32>
    %c0_20 = arith.constant 0 : index
    %c0_21 = arith.constant 0 : index
    %46 = vector.load %arg5[%c0_20, %c0_21] : memref<8x256xf32, #tpu.memory_space<vmem>>, vector<8x256xf32>
    %47 = arith.truncf %45 : vector<8x256xf32> to vector<8x256xbf16>
    %cst_22 = arith.constant dense<0.000000e+00> : vector<8x1024xf32>
    %48 = tpu.matmul %47, %3, %cst_22 {dimension_numbers = #tpu.dot_dimension_numbers<[1], [0], [0], [1], [0, 0, 1, 1], [], []>} : vector<8x256xbf16>, vector<256x1024xbf16>, vector<8x1024xf32> -> vector<8x1024xf32>
    %49 = arith.index_cast %c1_i32 : i32 to index
    %c0_23 = arith.constant 0 : index
    %c0_24 = arith.constant 0 : index
    %50 = vector.load %arg1[%49, %c0_23, %c0_24] : memref<8x8x1024xbf16, #tpu.memory_space<vmem>>, vector<1x8x1024xbf16>
    %51 = vector.shape_cast %50 : vector<1x8x1024xbf16> to vector<8x1024xbf16>
    %52 = arith.extf %51 : vector<8x1024xbf16> to vector<8x1024xf32>
    %53 = arith.addf %48, %52 : vector<8x1024xf32>
    %54 = vector.extract_strided_slice %53 {offsets = [0, 0], sizes = [8, 256], strides = [1, 1]} : vector<8x1024xf32> to vector<8x256xf32>
    %55 = arith.negf %54 : vector<8x256xf32>
    %56 = math.exp %55 : vector<8x256xf32>
    %cst_25 = arith.constant 1.000000e+00 : f32
    %57 = vector.broadcast %cst_25 : f32 to vector<8x256xf32>
    %58 = arith.addf %57, %56 : vector<8x256xf32>
    %59 = arith.divf %57, %58 : vector<8x256xf32>
    %60 = vector.extract_strided_slice %53 {offsets = [0, 256], sizes = [8, 256], strides = [1, 1]} : vector<8x1024xf32> to vector<8x256xf32>
    %61 = arith.negf %60 : vector<8x256xf32>
    %62 = math.exp %61 : vector<8x256xf32>
    %cst_26 = arith.constant 1.000000e+00 : f32
    %63 = vector.broadcast %cst_26 : f32 to vector<8x256xf32>
    %64 = arith.addf %63, %62 : vector<8x256xf32>
    %65 = arith.divf %63, %64 : vector<8x256xf32>
    %66 = vector.extract_strided_slice %53 {offsets = [0, 512], sizes = [8, 256], strides = [1, 1]} : vector<8x1024xf32> to vector<8x256xf32>
    %67 = math.tanh %66 : vector<8x256xf32>
    %68 = vector.extract_strided_slice %53 {offsets = [0, 768], sizes = [8, 256], strides = [1, 1]} : vector<8x1024xf32> to vector<8x256xf32>
    %69 = arith.negf %68 : vector<8x256xf32>
    %70 = math.exp %69 : vector<8x256xf32>
    %cst_27 = arith.constant 1.000000e+00 : f32
    %71 = vector.broadcast %cst_27 : f32 to vector<8x256xf32>
    %72 = arith.addf %71, %70 : vector<8x256xf32>
    %73 = arith.divf %71, %72 : vector<8x256xf32>
    %74 = arith.mulf %65, %46 : vector<8x256xf32>
    %75 = arith.mulf %59, %67 : vector<8x256xf32>
    %76 = arith.addf %74, %75 : vector<8x256xf32>
    %77 = math.tanh %76 : vector<8x256xf32>
    %78 = arith.mulf %73, %77 : vector<8x256xf32>
    %79 = arith.truncf %78 : vector<8x256xf32> to vector<8x256xbf16>
    %80 = arith.index_cast %c1_i32 : i32 to index
    %c0_28 = arith.constant 0 : index
    %c0_29 = arith.constant 0 : index
    %81 = vector.load %arg3[%80, %c0_28, %c0_29] : memref<8x8x256xbf16, #tpu.memory_space<vmem>>, vector<1x8x256xbf16>
    %82 = vector.shape_cast %81 : vector<1x8x256xbf16> to vector<8x256xbf16>
    %83 = vector.shape_cast %79 : vector<8x256xbf16> to vector<1x8x256xbf16>
    tpu.vector_store %arg3[%80, %c0_28, %c0_29], %83 {strides = array<i32>} : memref<8x8x256xbf16, #tpu.memory_space<vmem>>, vector<1x8x256xbf16>,
    %c0_30 = arith.constant 0 : index
    %c0_31 = arith.constant 0 : index
    %84 = vector.load %arg4[%c0_30, %c0_31] : memref<8x256xf32, #tpu.memory_space<vmem>>, vector<8x256xf32>
    tpu.vector_store %arg4[%c0_30, %c0_31], %78 {strides = array<i32>} : memref<8x256xf32, #tpu.memory_space<vmem>>, vector<8x256xf32>,
    %c0_32 = arith.constant 0 : index
    %c0_33 = arith.constant 0 : index
    %85 = vector.load %arg5[%c0_32, %c0_33] : memref<8x256xf32, #tpu.memory_space<vmem>>, vector<8x256xf32>
    tpu.vector_store %arg5[%c0_32, %c0_33], %76 {strides = array<i32>} : memref<8x256xf32, #tpu.memory_space<vmem>>, vector<8x256xf32>,
    %c2_i32 = arith.constant 2 : i32
    %c0_34 = arith.constant 0 : index
    %c0_35 = arith.constant 0 : index
    %86 = vector.load %arg4[%c0_34, %c0_35] : memref<8x256xf32, #tpu.memory_space<vmem>>, vector<8x256xf32>
    %c0_36 = arith.constant 0 : index
    %c0_37 = arith.constant 0 : index
    %87 = vector.load %arg5[%c0_36, %c0_37] : memref<8x256xf32, #tpu.memory_space<vmem>>, vector<8x256xf32>
    %88 = arith.truncf %86 : vector<8x256xf32> to vector<8x256xbf16>
    %cst_38 = arith.constant dense<0.000000e+00> : vector<8x1024xf32>
    %89 = tpu.matmul %88, %3, %cst_38 {dimension_numbers = #tpu.dot_dimension_numbers<[1], [0], [0], [1], [0, 0, 1, 1], [], []>} : vector<8x256xbf16>, vector<256x1024xbf16>, vector<8x1024xf32> -> vector<8x1024xf32>
    %90 = arith.index_cast %c2_i32 : i32 to index
    %c0_39 = arith.constant 0 : index
    %c0_40 = arith.constant 0 : index
    %91 = vector.load %arg1[%90, %c0_39, %c0_40] : memref<8x8x1024xbf16, #tpu.memory_space<vmem>>, vector<1x8x1024xbf16>
    %92 = vector.shape_cast %91 : vector<1x8x1024xbf16> to vector<8x1024xbf16>
    %93 = arith.extf %92 : vector<8x1024xbf16> to vector<8x1024xf32>
    %94 = arith.addf %89, %93 : vector<8x1024xf32>
    %95 = vector.extract_strided_slice %94 {offsets = [0, 0], sizes = [8, 256], strides = [1, 1]} : vector<8x1024xf32> to vector<8x256xf32>
    %96 = arith.negf %95 : vector<8x256xf32>
    %97 = math.exp %96 : vector<8x256xf32>
    %cst_41 = arith.constant 1.000000e+00 : f32
    %98 = vector.broadcast %cst_41 : f32 to vector<8x256xf32>
    %99 = arith.addf %98, %97 : vector<8x256xf32>
    %100 = arith.divf %98, %99 : vector<8x256xf32>
    %101 = vector.extract_strided_slice %94 {offsets = [0, 256], sizes = [8, 256], strides = [1, 1]} : vector<8x1024xf32> to vector<8x256xf32>
    %102 = arith.negf %101 : vector<8x256xf32>
    %103 = math.exp %102 : vector<8x256xf32>
    %cst_42 = arith.constant 1.000000e+00 : f32
    %104 = vector.broadcast %cst_42 : f32 to vector<8x256xf32>
    %105 = arith.addf %104, %103 : vector<8x256xf32>
    %106 = arith.divf %104, %105 : vector<8x256xf32>
    %107 = vector.extract_strided_slice %94 {offsets = [0, 512], sizes = [8, 256], strides = [1, 1]} : vector<8x1024xf32> to vector<8x256xf32>
    %108 = math.tanh %107 : vector<8x256xf32>
    %109 = vector.extract_strided_slice %94 {offsets = [0, 768], sizes = [8, 256], strides = [1, 1]} : vector<8x1024xf32> to vector<8x256xf32>
    %110 = arith.negf %109 : vector<8x256xf32>
    %111 = math.exp %110 : vector<8x256xf32>
    %cst_43 = arith.constant 1.000000e+00 : f32
    %112 = vector.broadcast %cst_43 : f32 to vector<8x256xf32>
    %113 = arith.addf %112, %111 : vector<8x256xf32>
    %114 = arith.divf %112, %113 : vector<8x256xf32>
    %115 = arith.mulf %106, %87 : vector<8x256xf32>
    %116 = arith.mulf %100, %108 : vector<8x256xf32>
    %117 = arith.addf %115, %116 : vector<8x256xf32>
    %118 = math.tanh %117 : vector<8x256xf32>
    %119 = arith.mulf %114, %118 : vector<8x256xf32>
    %120 = arith.truncf %119 : vector<8x256xf32> to vector<8x256xbf16>
    %121 = arith.index_cast %c2_i32 : i32 to index
    %c0_44 = arith.constant 0 : index
    %c0_45 = arith.constant 0 : index
    %122 = vector.load %arg3[%121, %c0_44, %c0_45] : memref<8x8x256xbf16, #tpu.memory_space<vmem>>, vector<1x8x256xbf16>
    %123 = vector.shape_cast %122 : vector<1x8x256xbf16> to vector<8x256xbf16>
    %124 = vector.shape_cast %120 : vector<8x256xbf16> to vector<1x8x256xbf16>
    tpu.vector_store %arg3[%121, %c0_44, %c0_45], %124 {strides = array<i32>} : memref<8x8x256xbf16, #tpu.memory_space<vmem>>, vector<1x8x256xbf16>,
    %c0_46 = arith.constant 0 : index
    %c0_47 = arith.constant 0 : index
    %125 = vector.load %arg4[%c0_46, %c0_47] : memref<8x256xf32, #tpu.memory_space<vmem>>, vector<8x256xf32>
    tpu.vector_store %arg4[%c0_46, %c0_47], %119 {strides = array<i32>} : memref<8x256xf32, #tpu.memory_space<vmem>>, vector<8x256xf32>,
    %c0_48 = arith.constant 0 : index
    %c0_49 = arith.constant 0 : index
    %126 = vector.load %arg5[%c0_48, %c0_49] : memref<8x256xf32, #tpu.memory_space<vmem>>, vector<8x256xf32>
    tpu.vector_store %arg5[%c0_48, %c0_49], %117 {strides = array<i32>} : memref<8x256xf32, #tpu.memory_space<vmem>>, vector<8x256xf32>,
    %c3_i32 = arith.constant 3 : i32
    %c0_50 = arith.constant 0 : index
    %c0_51 = arith.constant 0 : index
    %127 = vector.load %arg4[%c0_50, %c0_51] : memref<8x256xf32, #tpu.memory_space<vmem>>, vector<8x256xf32>
    %c0_52 = arith.constant 0 : index
    %c0_53 = arith.constant 0 : index
    %128 = vector.load %arg5[%c0_52, %c0_53] : memref<8x256xf32, #tpu.memory_space<vmem>>, vector<8x256xf32>
    %129 = arith.truncf %127 : vector<8x256xf32> to vector<8x256xbf16>
    %cst_54 = arith.constant dense<0.000000e+00> : vector<8x1024xf32>
    %130 = tpu.matmul %129, %3, %cst_54 {dimension_numbers = #tpu.dot_dimension_numbers<[1], [0], [0], [1], [0, 0, 1, 1], [], []>} : vector<8x256xbf16>, vector<256x1024xbf16>, vector<8x1024xf32> -> vector<8x1024xf32>
    %131 = arith.index_cast %c3_i32 : i32 to index
    %c0_55 = arith.constant 0 : index
    %c0_56 = arith.constant 0 : index
    %132 = vector.load %arg1[%131, %c0_55, %c0_56] : memref<8x8x1024xbf16, #tpu.memory_space<vmem>>, vector<1x8x1024xbf16>
    %133 = vector.shape_cast %132 : vector<1x8x1024xbf16> to vector<8x1024xbf16>
    %134 = arith.extf %133 : vector<8x1024xbf16> to vector<8x1024xf32>
    %135 = arith.addf %130, %134 : vector<8x1024xf32>
    %136 = vector.extract_strided_slice %135 {offsets = [0, 0], sizes = [8, 256], strides = [1, 1]} : vector<8x1024xf32> to vector<8x256xf32>
    %137 = arith.negf %136 : vector<8x256xf32>
    %138 = math.exp %137 : vector<8x256xf32>
    %cst_57 = arith.constant 1.000000e+00 : f32
    %139 = vector.broadcast %cst_57 : f32 to vector<8x256xf32>
    %140 = arith.addf %139, %138 : vector<8x256xf32>
    %141 = arith.divf %139, %140 : vector<8x256xf32>
    %142 = vector.extract_strided_slice %135 {offsets = [0, 256], sizes = [8, 256], strides = [1, 1]} : vector<8x1024xf32> to vector<8x256xf32>
    %143 = arith.negf %142 : vector<8x256xf32>
    %144 = math.exp %143 : vector<8x256xf32>
    %cst_58 = arith.constant 1.000000e+00 : f32
    %145 = vector.broadcast %cst_58 : f32 to vector<8x256xf32>
    %146 = arith.addf %145, %144 : vector<8x256xf32>
    %147 = arith.divf %145, %146 : vector<8x256xf32>
    %148 = vector.extract_strided_slice %135 {offsets = [0, 512], sizes = [8, 256], strides = [1, 1]} : vector<8x1024xf32> to vector<8x256xf32>
    %149 = math.tanh %148 : vector<8x256xf32>
    %150 = vector.extract_strided_slice %135 {offsets = [0, 768], sizes = [8, 256], strides = [1, 1]} : vector<8x1024xf32> to vector<8x256xf32>
    %151 = arith.negf %150 : vector<8x256xf32>
    %152 = math.exp %151 : vector<8x256xf32>
    %cst_59 = arith.constant 1.000000e+00 : f32
    %153 = vector.broadcast %cst_59 : f32 to vector<8x256xf32>
    %154 = arith.addf %153, %152 : vector<8x256xf32>
    %155 = arith.divf %153, %154 : vector<8x256xf32>
    %156 = arith.mulf %147, %128 : vector<8x256xf32>
    %157 = arith.mulf %141, %149 : vector<8x256xf32>
    %158 = arith.addf %156, %157 : vector<8x256xf32>
    %159 = math.tanh %158 : vector<8x256xf32>
    %160 = arith.mulf %155, %159 : vector<8x256xf32>
    %161 = arith.truncf %160 : vector<8x256xf32> to vector<8x256xbf16>
    %162 = arith.index_cast %c3_i32 : i32 to index
    %c0_60 = arith.constant 0 : index
    %c0_61 = arith.constant 0 : index
    %163 = vector.load %arg3[%162, %c0_60, %c0_61] : memref<8x8x256xbf16, #tpu.memory_space<vmem>>, vector<1x8x256xbf16>
    %164 = vector.shape_cast %163 : vector<1x8x256xbf16> to vector<8x256xbf16>
    %165 = vector.shape_cast %161 : vector<8x256xbf16> to vector<1x8x256xbf16>
    tpu.vector_store %arg3[%162, %c0_60, %c0_61], %165 {strides = array<i32>} : memref<8x8x256xbf16, #tpu.memory_space<vmem>>, vector<1x8x256xbf16>,
    %c0_62 = arith.constant 0 : index
    %c0_63 = arith.constant 0 : index
    %166 = vector.load %arg4[%c0_62, %c0_63] : memref<8x256xf32, #tpu.memory_space<vmem>>, vector<8x256xf32>
    tpu.vector_store %arg4[%c0_62, %c0_63], %160 {strides = array<i32>} : memref<8x256xf32, #tpu.memory_space<vmem>>, vector<8x256xf32>,
    %c0_64 = arith.constant 0 : index
    %c0_65 = arith.constant 0 : index
    %167 = vector.load %arg5[%c0_64, %c0_65] : memref<8x256xf32, #tpu.memory_space<vmem>>, vector<8x256xf32>
    tpu.vector_store %arg5[%c0_64, %c0_65], %158 {strides = array<i32>} : memref<8x256xf32, #tpu.memory_space<vmem>>, vector<8x256xf32>,
    %c4_i32 = arith.constant 4 : i32
    %c0_66 = arith.constant 0 : index
    %c0_67 = arith.constant 0 : index
    %168 = vector.load %arg4[%c0_66, %c0_67] : memref<8x256xf32, #tpu.memory_space<vmem>>, vector<8x256xf32>
    %c0_68 = arith.constant 0 : index
    %c0_69 = arith.constant 0 : index
    %169 = vector.load %arg5[%c0_68, %c0_69] : memref<8x256xf32, #tpu.memory_space<vmem>>, vector<8x256xf32>
    %170 = arith.truncf %168 : vector<8x256xf32> to vector<8x256xbf16>
    %cst_70 = arith.constant dense<0.000000e+00> : vector<8x1024xf32>
    %171 = tpu.matmul %170, %3, %cst_70 {dimension_numbers = #tpu.dot_dimension_numbers<[1], [0], [0], [1], [0, 0, 1, 1], [], []>} : vector<8x256xbf16>, vector<256x1024xbf16>, vector<8x1024xf32> -> vector<8x1024xf32>
    %172 = arith.index_cast %c4_i32 : i32 to index
    %c0_71 = arith.constant 0 : index
    %c0_72 = arith.constant 0 : index
    %173 = vector.load %arg1[%172, %c0_71, %c0_72] : memref<8x8x1024xbf16, #tpu.memory_space<vmem>>, vector<1x8x1024xbf16>
    %174 = vector.shape_cast %173 : vector<1x8x1024xbf16> to vector<8x1024xbf16>
    %175 = arith.extf %174 : vector<8x1024xbf16> to vector<8x1024xf32>
    %176 = arith.addf %171, %175 : vector<8x1024xf32>
    %177 = vector.extract_strided_slice %176 {offsets = [0, 0], sizes = [8, 256], strides = [1, 1]} : vector<8x1024xf32> to vector<8x256xf32>
    %178 = arith.negf %177 : vector<8x256xf32>
    %179 = math.exp %178 : vector<8x256xf32>
    %cst_73 = arith.constant 1.000000e+00 : f32
    %180 = vector.broadcast %cst_73 : f32 to vector<8x256xf32>
    %181 = arith.addf %180, %179 : vector<8x256xf32>
    %182 = arith.divf %180, %181 : vector<8x256xf32>
    %183 = vector.extract_strided_slice %176 {offsets = [0, 256], sizes = [8, 256], strides = [1, 1]} : vector<8x1024xf32> to vector<8x256xf32>
    %184 = arith.negf %183 : vector<8x256xf32>
    %185 = math.exp %184 : vector<8x256xf32>
    %cst_74 = arith.constant 1.000000e+00 : f32
    %186 = vector.broadcast %cst_74 : f32 to vector<8x256xf32>
    %187 = arith.addf %186, %185 : vector<8x256xf32>
    %188 = arith.divf %186, %187 : vector<8x256xf32>
    %189 = vector.extract_strided_slice %176 {offsets = [0, 512], sizes = [8, 256], strides = [1, 1]} : vector<8x1024xf32> to vector<8x256xf32>
    %190 = math.tanh %189 : vector<8x256xf32>
    %191 = vector.extract_strided_slice %176 {offsets = [0, 768], sizes = [8, 256], strides = [1, 1]} : vector<8x1024xf32> to vector<8x256xf32>
    %192 = arith.negf %191 : vector<8x256xf32>
    %193 = math.exp %192 : vector<8x256xf32>
    %cst_75 = arith.constant 1.000000e+00 : f32
    %194 = vector.broadcast %cst_75 : f32 to vector<8x256xf32>
    %195 = arith.addf %194, %193 : vector<8x256xf32>
    %196 = arith.divf %194, %195 : vector<8x256xf32>
    %197 = arith.mulf %188, %169 : vector<8x256xf32>
    %198 = arith.mulf %182, %190 : vector<8x256xf32>
    %199 = arith.addf %197, %198 : vector<8x256xf32>
    %200 = math.tanh %199 : vector<8x256xf32>
    %201 = arith.mulf %196, %200 : vector<8x256xf32>
    %202 = arith.truncf %201 : vector<8x256xf32> to vector<8x256xbf16>
    %203 = arith.index_cast %c4_i32 : i32 to index
    %c0_76 = arith.constant 0 : index
    %c0_77 = arith.constant 0 : index
    %204 = vector.load %arg3[%203, %c0_76, %c0_77] : memref<8x8x256xbf16, #tpu.memory_space<vmem>>, vector<1x8x256xbf16>
    %205 = vector.shape_cast %204 : vector<1x8x256xbf16> to vector<8x256xbf16>
    %206 = vector.shape_cast %202 : vector<8x256xbf16> to vector<1x8x256xbf16>
    tpu.vector_store %arg3[%203, %c0_76, %c0_77], %206 {strides = array<i32>} : memref<8x8x256xbf16, #tpu.memory_space<vmem>>, vector<1x8x256xbf16>,
    %c0_78 = arith.constant 0 : index
    %c0_79 = arith.constant 0 : index
    %207 = vector.load %arg4[%c0_78, %c0_79] : memref<8x256xf32, #tpu.memory_space<vmem>>, vector<8x256xf32>
    tpu.vector_store %arg4[%c0_78, %c0_79], %201 {strides = array<i32>} : memref<8x256xf32, #tpu.memory_space<vmem>>, vector<8x256xf32>,
    %c0_80 = arith.constant 0 : index
    %c0_81 = arith.constant 0 : index
    %208 = vector.load %arg5[%c0_80, %c0_81] : memref<8x256xf32, #tpu.memory_space<vmem>>, vector<8x256xf32>
    tpu.vector_store %arg5[%c0_80, %c0_81], %199 {strides = array<i32>} : memref<8x256xf32, #tpu.memory_space<vmem>>, vector<8x256xf32>,
    %c5_i32 = arith.constant 5 : i32
    %c0_82 = arith.constant 0 : index
    %c0_83 = arith.constant 0 : index
    %209 = vector.load %arg4[%c0_82, %c0_83] : memref<8x256xf32, #tpu.memory_space<vmem>>, vector<8x256xf32>
    %c0_84 = arith.constant 0 : index
    %c0_85 = arith.constant 0 : index
    %210 = vector.load %arg5[%c0_84, %c0_85] : memref<8x256xf32, #tpu.memory_space<vmem>>, vector<8x256xf32>
    %211 = arith.truncf %209 : vector<8x256xf32> to vector<8x256xbf16>
    %cst_86 = arith.constant dense<0.000000e+00> : vector<8x1024xf32>
    %212 = tpu.matmul %211, %3, %cst_86 {dimension_numbers = #tpu.dot_dimension_numbers<[1], [0], [0], [1], [0, 0, 1, 1], [], []>} : vector<8x256xbf16>, vector<256x1024xbf16>, vector<8x1024xf32> -> vector<8x1024xf32>
    %213 = arith.index_cast %c5_i32 : i32 to index
    %c0_87 = arith.constant 0 : index
    %c0_88 = arith.constant 0 : index
    %214 = vector.load %arg1[%213, %c0_87, %c0_88] : memref<8x8x1024xbf16, #tpu.memory_space<vmem>>, vector<1x8x1024xbf16>
    %215 = vector.shape_cast %214 : vector<1x8x1024xbf16> to vector<8x1024xbf16>
    %216 = arith.extf %215 : vector<8x1024xbf16> to vector<8x1024xf32>
    %217 = arith.addf %212, %216 : vector<8x1024xf32>
    %218 = vector.extract_strided_slice %217 {offsets = [0, 0], sizes = [8, 256], strides = [1, 1]} : vector<8x1024xf32> to vector<8x256xf32>
    %219 = arith.negf %218 : vector<8x256xf32>
    %220 = math.exp %219 : vector<8x256xf32>
    %cst_89 = arith.constant 1.000000e+00 : f32
    %221 = vector.broadcast %cst_89 : f32 to vector<8x256xf32>
    %222 = arith.addf %221, %220 : vector<8x256xf32>
    %223 = arith.divf %221, %222 : vector<8x256xf32>
    %224 = vector.extract_strided_slice %217 {offsets = [0, 256], sizes = [8, 256], strides = [1, 1]} : vector<8x1024xf32> to vector<8x256xf32>
    %225 = arith.negf %224 : vector<8x256xf32>
    %226 = math.exp %225 : vector<8x256xf32>
    %cst_90 = arith.constant 1.000000e+00 : f32
    %227 = vector.broadcast %cst_90 : f32 to vector<8x256xf32>
    %228 = arith.addf %227, %226 : vector<8x256xf32>
    %229 = arith.divf %227, %228 : vector<8x256xf32>
    %230 = vector.extract_strided_slice %217 {offsets = [0, 512], sizes = [8, 256], strides = [1, 1]} : vector<8x1024xf32> to vector<8x256xf32>
    %231 = math.tanh %230 : vector<8x256xf32>
    %232 = vector.extract_strided_slice %217 {offsets = [0, 768], sizes = [8, 256], strides = [1, 1]} : vector<8x1024xf32> to vector<8x256xf32>
    %233 = arith.negf %232 : vector<8x256xf32>
    %234 = math.exp %233 : vector<8x256xf32>
    %cst_91 = arith.constant 1.000000e+00 : f32
    %235 = vector.broadcast %cst_91 : f32 to vector<8x256xf32>
    %236 = arith.addf %235, %234 : vector<8x256xf32>
    %237 = arith.divf %235, %236 : vector<8x256xf32>
    %238 = arith.mulf %229, %210 : vector<8x256xf32>
    %239 = arith.mulf %223, %231 : vector<8x256xf32>
    %240 = arith.addf %238, %239 : vector<8x256xf32>
    %241 = math.tanh %240 : vector<8x256xf32>
    %242 = arith.mulf %237, %241 : vector<8x256xf32>
    %243 = arith.truncf %242 : vector<8x256xf32> to vector<8x256xbf16>
    %244 = arith.index_cast %c5_i32 : i32 to index
    %c0_92 = arith.constant 0 : index
    %c0_93 = arith.constant 0 : index
    %245 = vector.load %arg3[%244, %c0_92, %c0_93] : memref<8x8x256xbf16, #tpu.memory_space<vmem>>, vector<1x8x256xbf16>
    %246 = vector.shape_cast %245 : vector<1x8x256xbf16> to vector<8x256xbf16>
    %247 = vector.shape_cast %243 : vector<8x256xbf16> to vector<1x8x256xbf16>
    tpu.vector_store %arg3[%244, %c0_92, %c0_93], %247 {strides = array<i32>} : memref<8x8x256xbf16, #tpu.memory_space<vmem>>, vector<1x8x256xbf16>,
    %c0_94 = arith.constant 0 : index
    %c0_95 = arith.constant 0 : index
    %248 = vector.load %arg4[%c0_94, %c0_95] : memref<8x256xf32, #tpu.memory_space<vmem>>, vector<8x256xf32>
    tpu.vector_store %arg4[%c0_94, %c0_95], %242 {strides = array<i32>} : memref<8x256xf32, #tpu.memory_space<vmem>>, vector<8x256xf32>,
    %c0_96 = arith.constant 0 : index
    %c0_97 = arith.constant 0 : index
    %249 = vector.load %arg5[%c0_96, %c0_97] : memref<8x256xf32, #tpu.memory_space<vmem>>, vector<8x256xf32>
    tpu.vector_store %arg5[%c0_96, %c0_97], %240 {strides = array<i32>} : memref<8x256xf32, #tpu.memory_space<vmem>>, vector<8x256xf32>,
    %c6_i32 = arith.constant 6 : i32
    %c0_98 = arith.constant 0 : index
    %c0_99 = arith.constant 0 : index
    %250 = vector.load %arg4[%c0_98, %c0_99] : memref<8x256xf32, #tpu.memory_space<vmem>>, vector<8x256xf32>
    %c0_100 = arith.constant 0 : index
    %c0_101 = arith.constant 0 : index
    %251 = vector.load %arg5[%c0_100, %c0_101] : memref<8x256xf32, #tpu.memory_space<vmem>>, vector<8x256xf32>
    %252 = arith.truncf %250 : vector<8x256xf32> to vector<8x256xbf16>
    %cst_102 = arith.constant dense<0.000000e+00> : vector<8x1024xf32>
    %253 = tpu.matmul %252, %3, %cst_102 {dimension_numbers = #tpu.dot_dimension_numbers<[1], [0], [0], [1], [0, 0, 1, 1], [], []>} : vector<8x256xbf16>, vector<256x1024xbf16>, vector<8x1024xf32> -> vector<8x1024xf32>
    %254 = arith.index_cast %c6_i32 : i32 to index
    %c0_103 = arith.constant 0 : index
    %c0_104 = arith.constant 0 : index
    %255 = vector.load %arg1[%254, %c0_103, %c0_104] : memref<8x8x1024xbf16, #tpu.memory_space<vmem>>, vector<1x8x1024xbf16>
    %256 = vector.shape_cast %255 : vector<1x8x1024xbf16> to vector<8x1024xbf16>
    %257 = arith.extf %256 : vector<8x1024xbf16> to vector<8x1024xf32>
    %258 = arith.addf %253, %257 : vector<8x1024xf32>
    %259 = vector.extract_strided_slice %258 {offsets = [0, 0], sizes = [8, 256], strides = [1, 1]} : vector<8x1024xf32> to vector<8x256xf32>
    %260 = arith.negf %259 : vector<8x256xf32>
    %261 = math.exp %260 : vector<8x256xf32>
    %cst_105 = arith.constant 1.000000e+00 : f32
    %262 = vector.broadcast %cst_105 : f32 to vector<8x256xf32>
    %263 = arith.addf %262, %261 : vector<8x256xf32>
    %264 = arith.divf %262, %263 : vector<8x256xf32>
    %265 = vector.extract_strided_slice %258 {offsets = [0, 256], sizes = [8, 256], strides = [1, 1]} : vector<8x1024xf32> to vector<8x256xf32>
    %266 = arith.negf %265 : vector<8x256xf32>
    %267 = math.exp %266 : vector<8x256xf32>
    %cst_106 = arith.constant 1.000000e+00 : f32
    %268 = vector.broadcast %cst_106 : f32 to vector<8x256xf32>
    %269 = arith.addf %268, %267 : vector<8x256xf32>
    %270 = arith.divf %268, %269 : vector<8x256xf32>
    %271 = vector.extract_strided_slice %258 {offsets = [0, 512], sizes = [8, 256], strides = [1, 1]} : vector<8x1024xf32> to vector<8x256xf32>
    %272 = math.tanh %271 : vector<8x256xf32>
    %273 = vector.extract_strided_slice %258 {offsets = [0, 768], sizes = [8, 256], strides = [1, 1]} : vector<8x1024xf32> to vector<8x256xf32>
    %274 = arith.negf %273 : vector<8x256xf32>
    %275 = math.exp %274 : vector<8x256xf32>
    %cst_107 = arith.constant 1.000000e+00 : f32
    %276 = vector.broadcast %cst_107 : f32 to vector<8x256xf32>
    %277 = arith.addf %276, %275 : vector<8x256xf32>
    %278 = arith.divf %276, %277 : vector<8x256xf32>
    %279 = arith.mulf %270, %251 : vector<8x256xf32>
    %280 = arith.mulf %264, %272 : vector<8x256xf32>
    %281 = arith.addf %279, %280 : vector<8x256xf32>
    %282 = math.tanh %281 : vector<8x256xf32>
    %283 = arith.mulf %278, %282 : vector<8x256xf32>
    %284 = arith.truncf %283 : vector<8x256xf32> to vector<8x256xbf16>
    %285 = arith.index_cast %c6_i32 : i32 to index
    %c0_108 = arith.constant 0 : index
    %c0_109 = arith.constant 0 : index
    %286 = vector.load %arg3[%285, %c0_108, %c0_109] : memref<8x8x256xbf16, #tpu.memory_space<vmem>>, vector<1x8x256xbf16>
    %287 = vector.shape_cast %286 : vector<1x8x256xbf16> to vector<8x256xbf16>
    %288 = vector.shape_cast %284 : vector<8x256xbf16> to vector<1x8x256xbf16>
    tpu.vector_store %arg3[%285, %c0_108, %c0_109], %288 {strides = array<i32>} : memref<8x8x256xbf16, #tpu.memory_space<vmem>>, vector<1x8x256xbf16>,
    %c0_110 = arith.constant 0 : index
    %c0_111 = arith.constant 0 : index
    %289 = vector.load %arg4[%c0_110, %c0_111] : memref<8x256xf32, #tpu.memory_space<vmem>>, vector<8x256xf32>
    tpu.vector_store %arg4[%c0_110, %c0_111], %283 {strides = array<i32>} : memref<8x256xf32, #tpu.memory_space<vmem>>, vector<8x256xf32>,
    %c0_112 = arith.constant 0 : index
    %c0_113 = arith.constant 0 : index
    %290 = vector.load %arg5[%c0_112, %c0_113] : memref<8x256xf32, #tpu.memory_space<vmem>>, vector<8x256xf32>
    tpu.vector_store %arg5[%c0_112, %c0_113], %281 {strides = array<i32>} : memref<8x256xf32, #tpu.memory_space<vmem>>, vector<8x256xf32>,
    %c7_i32 = arith.constant 7 : i32
    %c0_114 = arith.constant 0 : index
    %c0_115 = arith.constant 0 : index
    %291 = vector.load %arg4[%c0_114, %c0_115] : memref<8x256xf32, #tpu.memory_space<vmem>>, vector<8x256xf32>
    %c0_116 = arith.constant 0 : index
    %c0_117 = arith.constant 0 : index
    %292 = vector.load %arg5[%c0_116, %c0_117] : memref<8x256xf32, #tpu.memory_space<vmem>>, vector<8x256xf32>
    %293 = arith.truncf %291 : vector<8x256xf32> to vector<8x256xbf16>
    %cst_118 = arith.constant dense<0.000000e+00> : vector<8x1024xf32>
    %294 = tpu.matmul %293, %3, %cst_118 {dimension_numbers = #tpu.dot_dimension_numbers<[1], [0], [0], [1], [0, 0, 1, 1], [], []>} : vector<8x256xbf16>, vector<256x1024xbf16>, vector<8x1024xf32> -> vector<8x1024xf32>
    %295 = arith.index_cast %c7_i32 : i32 to index
    %c0_119 = arith.constant 0 : index
    %c0_120 = arith.constant 0 : index
    %296 = vector.load %arg1[%295, %c0_119, %c0_120] : memref<8x8x1024xbf16, #tpu.memory_space<vmem>>, vector<1x8x1024xbf16>
    %297 = vector.shape_cast %296 : vector<1x8x1024xbf16> to vector<8x1024xbf16>
    %298 = arith.extf %297 : vector<8x1024xbf16> to vector<8x1024xf32>
    %299 = arith.addf %294, %298 : vector<8x1024xf32>
    %300 = vector.extract_strided_slice %299 {offsets = [0, 0], sizes = [8, 256], strides = [1, 1]} : vector<8x1024xf32> to vector<8x256xf32>
    %301 = arith.negf %300 : vector<8x256xf32>
    %302 = math.exp %301 : vector<8x256xf32>
    %cst_121 = arith.constant 1.000000e+00 : f32
    %303 = vector.broadcast %cst_121 : f32 to vector<8x256xf32>
    %304 = arith.addf %303, %302 : vector<8x256xf32>
    %305 = arith.divf %303, %304 : vector<8x256xf32>
    %306 = vector.extract_strided_slice %299 {offsets = [0, 256], sizes = [8, 256], strides = [1, 1]} : vector<8x1024xf32> to vector<8x256xf32>
    %307 = arith.negf %306 : vector<8x256xf32>
    %308 = math.exp %307 : vector<8x256xf32>
    %cst_122 = arith.constant 1.000000e+00 : f32
    %309 = vector.broadcast %cst_122 : f32 to vector<8x256xf32>
    %310 = arith.addf %309, %308 : vector<8x256xf32>
    %311 = arith.divf %309, %310 : vector<8x256xf32>
    %312 = vector.extract_strided_slice %299 {offsets = [0, 512], sizes = [8, 256], strides = [1, 1]} : vector<8x1024xf32> to vector<8x256xf32>
    %313 = math.tanh %312 : vector<8x256xf32>
    %314 = vector.extract_strided_slice %299 {offsets = [0, 768], sizes = [8, 256], strides = [1, 1]} : vector<8x1024xf32> to vector<8x256xf32>
    %315 = arith.negf %314 : vector<8x256xf32>
    %316 = math.exp %315 : vector<8x256xf32>
    %cst_123 = arith.constant 1.000000e+00 : f32
    %317 = vector.broadcast %cst_123 : f32 to vector<8x256xf32>
    %318 = arith.addf %317, %316 : vector<8x256xf32>
    %319 = arith.divf %317, %318 : vector<8x256xf32>
    %320 = arith.mulf %311, %292 : vector<8x256xf32>
    %321 = arith.mulf %305, %313 : vector<8x256xf32>
    %322 = arith.addf %320, %321 : vector<8x256xf32>
    %323 = math.tanh %322 : vector<8x256xf32>
    %324 = arith.mulf %319, %323 : vector<8x256xf32>
    %325 = arith.truncf %324 : vector<8x256xf32> to vector<8x256xbf16>
    %326 = arith.index_cast %c7_i32 : i32 to index
    %c0_124 = arith.constant 0 : index
    %c0_125 = arith.constant 0 : index
    %327 = vector.load %arg3[%326, %c0_124, %c0_125] : memref<8x8x256xbf16, #tpu.memory_space<vmem>>, vector<1x8x256xbf16>
    %328 = vector.shape_cast %327 : vector<1x8x256xbf16> to vector<8x256xbf16>
    %329 = vector.shape_cast %325 : vector<8x256xbf16> to vector<1x8x256xbf16>
    tpu.vector_store %arg3[%326, %c0_124, %c0_125], %329 {strides = array<i32>} : memref<8x8x256xbf16, #tpu.memory_space<vmem>>, vector<1x8x256xbf16>,
    %c0_126 = arith.constant 0 : index
    %c0_127 = arith.constant 0 : index
    %330 = vector.load %arg4[%c0_126, %c0_127] : memref<8x256xf32, #tpu.memory_space<vmem>>, vector<8x256xf32>
    tpu.vector_store %arg4[%c0_126, %c0_127], %324 {strides = array<i32>} : memref<8x256xf32, #tpu.memory_space<vmem>>, vector<8x256xf32>,
    %c0_128 = arith.constant 0 : index
    %c0_129 = arith.constant 0 : index
    %331 = vector.load %arg5[%c0_128, %c0_129] : memref<8x256xf32, #tpu.memory_space<vmem>>, vector<8x256xf32>
    tpu.vector_store %arg5[%c0_128, %c0_129], %322 {strides = array<i32>} : memref<8x256xf32, #tpu.memory_space<vmem>>, vector<8x256xf32>,
    %c8_i32 = arith.constant 8 : i32
    return
  }
  func.func @transform_0(%arg0: i32) -> (i32, i32, i32) {
    %c0_i32 = arith.constant 0 : i32
    %c0_i32_0 = arith.constant 0 : i32
    %c0_i32_1 = arith.constant 0 : i32
    return %arg0, %c0_i32, %c0_i32_0 : i32, i32, i32
  }
  func.func @transform_1(%arg0: i32) -> (i32, i32) {
    %c0_i32 = arith.constant 0 : i32
    %c0_i32_0 = arith.constant 0 : i32
    %c0_i32_1 = arith.constant 0 : i32
    return %c0_i32, %c0_i32_0 : i32, i32
  }
  func.func @transform_2(%arg0: i32) -> (i32, i32, i32) {
    %c0_i32 = arith.constant 0 : i32
    %c0_i32_0 = arith.constant 0 : i32
    %c0_i32_1 = arith.constant 0 : i32
    return %arg0, %c0_i32, %c0_i32_0 : i32, i32, i32
  }
}

</mosaic_0001>

<bundles_post_ra>
// kernel: tpu_custom_call.1
= control target key start
LH: loop header
LB: loop body
LE: loop exit
PB: predicated region body
PF: predicated region fallthrough
CT: control target
= control target key end

     0   :  { %7 = vsyncpa [#allocation5], 0  ;;  %s4765_s0 = inlined_call_operand.hbm [shape: bf16[8,8,1024], index: 0, kind: input, shape index: {}]   ;;  %s4766_s1 = inlined_call_operand.hbm [shape: bf16[256,1024], index: 1, kind: input, shape index: {}]   ;;  %s4767_s2 = inlined_call_operand.hbm [shape: bf16[8,8,256], index: 2, kind: output, shape index: {}]  }
   0x1   :  { %8 = vsyncpa [#allocation8], 0 }
   0x2   :  { %9 = vsyncpa [#allocation6], 0  ;;  %s3320_s9 = smov [#allocation4]   ;;  %s3248_s13 = scalar_lea.hbm %s4765_s0, 4096 }
   0x3   :  { %s15_s10 = sshll.u32 %s3320_s9, 4  ;;  %p3249_p0 = scmp.ne.s32.totalorder %s4765_s0, %s3248_s13  ;;  %s16_s10 = int_to_ptr.vmem [resolvable:$true] %s15_s10 }
   0x4   :  { %p3252_p1 = scmp.lt.u32.totalorder %s3248_s13, %s4765_s0 }
   0x6   :  { %p3254_p2 = pnand %p3252_p1, %p3249_p0 }
   0x8   :  { %3257 = shalt.err (!%p3254_p2)
}
   0x9   :  { %s3258_s18 = scalar_lea.vmem %s16_s10, 4096  ;;  %p3263_p4 = scmp.lt.s32.totalorder %s16_s10, %s16_s10 }
   0xa   :  { %p3259_p3 = scmp.ne.s32.totalorder %s16_s10, %s3258_s18  ;;  %p3264_p5 = scmp.lt.s32.totalorder %s3258_s18, %s3258_s18 }
   0xc   :  { %p3265_p6 = por %p3264_p5, %p3263_p4 }
   0xe   :  { %p3266_p7 = pnand %p3265_p6, %p3259_p3 }
  0x10   :  { %3269 = shalt.err (!%p3266_p7)
}
  0x11   :  { %s3321_s19 = smov 512   ;;  %s3322_s20 = smov 32  }
  0x12   :  { %21 = dma.hbm_to_vmem [thread:$0]  %s4765_s0, 4096, %s16_s10, [#allocation5], %s3321_s19, %s3321_s19, %s3322_s20  }
  0x13   :  { %s3323_s23 = smov [#allocation7]   ;;  %s3270_s27 = scalar_lea.hbm %s4766_s1, 16384 }
  0x14   :  { %s27_s24 = sshll.u32 %s3323_s23, 4  ;;  %p3271_p8 = scmp.ne.s32.totalorder %s4766_s1, %s3270_s27  ;;  %s28_s24 = int_to_ptr.vmem [resolvable:$true] %s27_s24 }
  0x15   :  { %p3274_p9 = scmp.lt.u32.totalorder %s3270_s27, %s4766_s1 }
  0x17   :  { %p3276_p10 = pnand %p3274_p9, %p3271_p8 }
  0x19   :  { %3279 = shalt.err (!%p3276_p10)
}
  0x1a   :  { %s3280_s4 = scalar_lea.vmem %s28_s24, 16384  ;;  %p3285_p12 = scmp.lt.s32.totalorder %s28_s24, %s28_s24 }
  0x1b   :  { %p3281_p11 = scmp.ne.s32.totalorder %s28_s24, %s3280_s4  ;;  %p3286_p13 = scmp.lt.s32.totalorder %s3280_s4, %s3280_s4 }
  0x1d   :  { %p3287_p0 = por %p3286_p13, %p3285_p12 }
  0x1f   :  { %p3288_p1 = pnand %p3287_p0, %p3281_p11 }
  0x21   :  { %3291 = shalt.err (!%p3288_p1)
}
  0x22   :  { %33 = dma.hbm_to_vmem [thread:$0]  %s4766_s1, 16384, %s28_s24, [#allocation8], %s3321_s19, %s3321_s19, %s3322_s20  }
  0x23   :  { %3314 = dma.done.wait [#allocation5], 4096  }
  0x24   :  { %3315 = vsyncadd [#allocation5], 4294963200 }
  0x25   :  { %3316 = dma.done.wait [#allocation8], 16384  }
  0x26   :  { %3317 = vsyncadd [#allocation8], 4294950912  ;;  %v4768_v0 = vmov 0.0|0.0   ;;  %v48_v1 = vld [vmem:[#allocation7] sm:$0xff]  ;;  %v49_v3 = vld [vmem:[#allocation7 + $0x8] sm:$0xff]  ;;  %s3325_s1 = smov [#allocation9]  }
  0x27   :  { %866 = vmatprep.mubr.bf16.mxu0 %v4768_v0  ;;  %907 = vmatprep.mubr.bf16.mxu1 %v4768_v0  ;;  %v52_v2 = vld [vmem:[#allocation7 + $0x20] sm:$0xff]  ;;  %v53_v5 = vld [vmem:[#allocation7 + $0x28] sm:$0xff]  ;;  %s2779_s6 = sshll.u32 %s3325_s1, 4  ;;  %s2780_s6 = int_to_ptr.vmem [resolvable:$true] %s2779_s6 }
  0x28   :  { %v3369_v4 = vcombine.high %v48_v1, %v52_v2  ;;  %v3371_v6 = vcombine.low %v48_v1, %v52_v2  ;;  %v56_v7 = vld [vmem:[#allocation7 + $0x40] sm:$0xff]  ;;  %v3373_v9 = vcombine.high %v49_v3, %v53_v5  ;;  %v3375_v10 = vcombine.low %v49_v3, %v53_v5  ;;  %v57_v12 = vld [vmem:[#allocation7 + $0x48] sm:$0xff]  ;;  %s3292_s7 = scalar_lea.vmem %s2780_s6, 1024  ;;  %p3297_p3 = scmp.lt.s32.totalorder %s2780_s6, %s2780_s6 }
  0x29   :  { %v60_v8 = vld [vmem:[#allocation7 + $0x60] sm:$0xff]  ;;  %v61_v13 = vld [vmem:[#allocation7 + $0x68] sm:$0xff]  ;;  %p3293_p2 = scmp.ne.s32.totalorder %s2780_s6, %s3292_s7  ;;  %p3298_p4 = scmp.lt.s32.totalorder %s3292_s7, %s3292_s7 }
  0x2a   :  { %5037 = vst [vmem:[#allocation13_spill] sm:$0xff] %v3369_v4  ;;  %5038 = vst [vmem:[#allocation14_spill] sm:$0xff] %v3371_v6  ;;  %v3377_v11 = vcombine.high %v56_v7, %v60_v8  ;;  %v64_v14 = vld [vmem:[#allocation7 + $0x80] sm:$0xff]  ;;  %834 = vmatprep.subr.bf16.mxu0 %v3369_v4  ;;  %v3380_v15 = vcombine.high %v57_v12, %v61_v13  ;;  %v65_v17 = vld [vmem:[#allocation7 + $0x88] sm:$0xff]  ;;  %875 = vmatprep.subr.bf16.mxu1 %v3373_v9 }
  0x2b   :  { %5039 = vst [vmem:[#allocation15_spill] sm:$0xff] %v3373_v9  ;;  %5040 = vst [vmem:[#allocation16_spill] sm:$0xff] %v3375_v10  ;;  %v68_v16 = vld [vmem:[#allocation7 + $0xa0] sm:$0xff]  ;;  %v69_v18 = vld [vmem:[#allocation7 + $0xa8] sm:$0xff]  ;;  %835 = vmatpush1.bf16.msra.mxu0 %v3371_v6  ;;  %v3384_v19 = vcombine.low %v56_v7, %v60_v8  ;;  %876 = vmatpush1.bf16.msra.mxu1 %v3375_v10  ;;  %v3388_v20 = vcombine.low %v57_v12, %v61_v13  ;;  %p3299_p5 = por %p3298_p4, %p3297_p3 }
  0x2c   :  { %5041 = vst [vmem:[#allocation17_spill] sm:$0xff] %v3377_v11  ;;  %5042 = vst [vmem:[#allocation18_spill] sm:$0xff] %v3380_v15  ;;  %836 = vmatprep.subr.bf16.mxu0 %v3377_v11  ;;  %v3390_v21 = vcombine.high %v64_v14, %v68_v16  ;;  %877 = vmatprep.subr.bf16.mxu1 %v3380_v15  ;;  %v3393_v22 = vcombine.high %v65_v17, %v69_v18  ;;  %v72_v23 = vld [vmem:[#allocation7 + $0xc0] sm:$0xff]  ;;  %v73_v25 = vld [vmem:[#allocation7 + $0xc8] sm:$0xff] }
  0x2d   :  { %5043 = vst [vmem:[#allocation19_spill] sm:$0xff] %v3384_v19  ;;  %5044 = vst [vmem:[#allocation20_spill] sm:$0xff] %v3388_v20  ;;  %v76_v24 = vld [vmem:[#allocation7 + $0xe0] sm:$0xff]  ;;  %v77_v26 = vld [vmem:[#allocation7 + $0xe8] sm:$0xff]  ;;  %v3396_v27 = vcombine.low %v64_v14, %v68_v16  ;;  %v3400_v28 = vcombine.low %v65_v17, %v69_v18  ;;  %p3300_p6 = pnand %p3299_p5, %p3293_p2 }
  0x2e   :  { %5045 = vst [vmem:[#allocation21_spill] sm:$0xff] %v3390_v21  ;;  %5046 = vst [vmem:[#allocation22_spill] sm:$0xff] %v3393_v22  ;;  %v3402_v29 = vcombine.high %v72_v23, %v76_v24  ;;  %v3405_v30 = vcombine.high %v73_v25, %v77_v26  ;;  %v80_v31 = vld [vmem:[#allocation7 + $0x100] sm:$0xff]  ;;  %v81_v33 = vld [vmem:[#allocation7 + $0x108] sm:$0xff]  ;;  %v3408_v35 = vcombine.low %v72_v23, %v76_v24 }
  0x2f   :  { %837 = vmatpush1.bf16.msra.mxu0 %v3384_v19  ;;  %5047 = vst [vmem:[#allocation23_spill] sm:$0xff] %v3396_v27  ;;  %878 = vmatpush1.bf16.msra.mxu1 %v3388_v20  ;;  %5048 = vst [vmem:[#allocation24_spill] sm:$0xff] %v3400_v28  ;;  %v84_v32 = vld [vmem:[#allocation7 + $0x120] sm:$0xff]  ;;  %v85_v34 = vld [vmem:[#allocation7 + $0x128] sm:$0xff]  ;;  %v3412_v36 = vcombine.low %v73_v25, %v77_v26 }
  0x30   :  { %838 = vmatprep.subr.bf16.mxu0 %v3390_v21  ;;  %5049 = vst [vmem:[#allocation25_spill] sm:$0xff] %v3402_v29  ;;  %879 = vmatprep.subr.bf16.mxu1 %v3393_v22  ;;  %5050 = vst [vmem:[#allocation26_spill] sm:$0xff] %v3405_v30  ;;  %v3414_v37 = vcombine.high %v80_v31, %v84_v32  ;;  %v3417_v38 = vcombine.high %v81_v33, %v85_v34  ;;  %v88_v39 = vld [vmem:[#allocation7 + $0x140] sm:$0xff]  ;;  %v89_v41 = vld [vmem:[#allocation7 + $0x148] sm:$0xff] }
  0x31   :  { %5051 = vst [vmem:[#allocation27_spill] sm:$0xff] %v3408_v35  ;;  %5052 = vst [vmem:[#allocation28_spill] sm:$0xff] %v3412_v36  ;;  %v92_v40 = vld [vmem:[#allocation7 + $0x160] sm:$0xff]  ;;  %v93_v42 = vld [vmem:[#allocation7 + $0x168] sm:$0xff]  ;;  %v3420_v43 = vcombine.low %v80_v31, %v84_v32  ;;  %v3424_v44 = vcombine.low %v81_v33, %v85_v34 }
  0x32   :  { %5053 = vst [vmem:[#allocation29_spill] sm:$0xff] %v3414_v37  ;;  %5054 = vst [vmem:[#allocation30_spill] sm:$0xff] %v3417_v38  ;;  %v3426_v45 = vcombine.high %v88_v39, %v92_v40  ;;  %v3429_v46 = vcombine.high %v89_v41, %v93_v42  ;;  %v96_v47 = vld [vmem:[#allocation7 + $0x180] sm:$0xff]  ;;  %v97_v49 = vld [vmem:[#allocation7 + $0x188] sm:$0xff]  ;;  %v3432_v51 = vcombine.low %v88_v39, %v92_v40 }
  0x33   :  { %839 = vmatpush1.bf16.msra.mxu0 %v3396_v27  ;;  %880 = vmatpush1.bf16.msra.mxu1 %v3400_v28  ;;  %5055 = vst [vmem:[#allocation31_spill] sm:$0xff] %v3420_v43  ;;  %5056 = vst [vmem:[#allocation32_spill] sm:$0xff] %v3424_v44  ;;  %v100_v48 = vld [vmem:[#allocation7 + $0x1a0] sm:$0xff]  ;;  %v101_v50 = vld [vmem:[#allocation7 + $0x1a8] sm:$0xff]  ;;  %v3436_v52 = vcombine.low %v89_v41, %v93_v42 }
  0x34   :  { %840 = vmatprep.subr.bf16.mxu0 %v3402_v29  ;;  %881 = vmatprep.subr.bf16.mxu1 %v3405_v30  ;;  %5057 = vst [vmem:[#allocation33_spill] sm:$0xff] %v3426_v45  ;;  %5058 = vst [vmem:[#allocation34_spill] sm:$0xff] %v3429_v46  ;;  %v3438_v53 = vcombine.high %v96_v47, %v100_v48  ;;  %v3441_v54 = vcombine.high %v97_v49, %v101_v50  ;;  %v104_v55 = vld [vmem:[#allocation7 + $0x1c0] sm:$0xff]  ;;  %v105_v57 = vld [vmem:[#allocation7 + $0x1c8] sm:$0xff] }
  0x35   :  { %5059 = vst [vmem:[#allocation35_spill] sm:$0xff] %v3432_v51  ;;  %5060 = vst [vmem:[#allocation36_spill] sm:$0xff] %v3436_v52  ;;  %v108_v56 = vld [vmem:[#allocation7 + $0x1e0] sm:$0xff]  ;;  %v109_v58 = vld [vmem:[#allocation7 + $0x1e8] sm:$0xff]  ;;  %v3444_v59 = vcombine.low %v96_v47, %v100_v48  ;;  %v3448_v60 = vcombine.low %v97_v49, %v101_v50 }
  0x36   :  { %5061 = vst [vmem:[#allocation37_spill] sm:$0xff] %v3438_v53  ;;  %5062 = vst [vmem:[#allocation38_spill] sm:$0xff] %v3441_v54  ;;  %v3450_v61 = vcombine.high %v104_v55, %v108_v56  ;;  %v3453_v62 = vcombine.high %v105_v57, %v109_v58  ;;  %v112_v63 = vld [vmem:[#allocation7 + $0x200] sm:$0xff]  ;;  %v113_v2 = vld [vmem:[#allocation7 + $0x208] sm:$0xff]  ;;  %v3456_v5 = vcombine.low %v104_v55, %v108_v56 }
  0x37   :  { %841 = vmatpush1.bf16.msra.mxu0 %v3408_v35  ;;  %882 = vmatpush1.bf16.msra.mxu1 %v3412_v36  ;;  %5063 = vst [vmem:[#allocation39_spill] sm:$0xff] %v3444_v59  ;;  %5064 = vst [vmem:[#allocation40_spill] sm:$0xff] %v3448_v60  ;;  %v116_v1 = vld [vmem:[#allocation7 + $0x220] sm:$0xff]  ;;  %v117_v3 = vld [vmem:[#allocation7 + $0x228] sm:$0xff]  ;;  %v3460_v7 = vcombine.low %v105_v57, %v109_v58 }
  0x38   :  { %842 = vmatprep.subr.bf16.mxu0 %v3414_v37  ;;  %883 = vmatprep.subr.bf16.mxu1 %v3417_v38  ;;  %5065 = vst [vmem:[#allocation41_spill] sm:$0xff] %v3450_v61  ;;  %5066 = vst [vmem:[#allocation42_spill] sm:$0xff] %v3453_v62  ;;  %v3462_v8 = vcombine.high %v112_v63, %v116_v1  ;;  %v3465_v12 = vcombine.high %v113_v2, %v117_v3  ;;  %v120_v13 = vld [vmem:[#allocation7 + $0x240] sm:$0xff]  ;;  %v121_v16 = vld [vmem:[#allocation7 + $0x248] sm:$0xff] }
  0x39   :  { %5067 = vst [vmem:[#allocation43_spill] sm:$0xff] %v3456_v5  ;;  %5068 = vst [vmem:[#allocation44_spill] sm:$0xff] %v3460_v7  ;;  %v124_v14 = vld [vmem:[#allocation7 + $0x260] sm:$0xff]  ;;  %v125_v17 = vld [vmem:[#allocation7 + $0x268] sm:$0xff]  ;;  %v3468_v18 = vcombine.low %v112_v63, %v116_v1  ;;  %v3472_v23 = vcombine.low %v113_v2, %v117_v3 }
  0x3a   :  { %5069 = vst [vmem:[#allocation45_spill] sm:$0xff] %v3462_v8  ;;  %5070 = vst [vmem:[#allocation46_spill] sm:$0xff] %v3465_v12  ;;  %v3474_v24 = vcombine.high %v120_v13, %v124_v14  ;;  %v3477_v25 = vcombine.high %v121_v16, %v125_v17  ;;  %v128_v26 = vld [vmem:[#allocation7 + $0x280] sm:$0xff]  ;;  %v129_v32 = vld [vmem:[#allocation7 + $0x288] sm:$0xff]  ;;  %v3480_v34 = vcombine.low %v120_v13, %v124_v14 }
  0x3b   :  { %843 = vmatpush1.bf16.msra.mxu0 %v3420_v43  ;;  %884 = vmatpush1.bf16.msra.mxu1 %v3424_v44  ;;  %5071 = vst [vmem:[#allocation47_spill] sm:$0xff] %v3468_v18  ;;  %5072 = vst [vmem:[#allocation48_spill] sm:$0xff] %v3472_v23  ;;  %v132_v31 = vld [vmem:[#allocation7 + $0x2a0] sm:$0xff]  ;;  %v133_v33 = vld [vmem:[#allocation7 + $0x2a8] sm:$0xff]  ;;  %v3484_v39 = vcombine.low %v121_v16, %v125_v17 }
  0x3c   :  { %844 = vmatprep.subr.bf16.mxu0 %v3426_v45  ;;  %885 = vmatprep.subr.bf16.mxu1 %v3429_v46  ;;  %5073 = vst [vmem:[#allocation49_spill] sm:$0xff] %v3474_v24  ;;  %5074 = vst [vmem:[#allocation50_spill] sm:$0xff] %v3477_v25  ;;  %v3486_v40 = vcombine.high %v128_v26, %v132_v31  ;;  %v3489_v41 = vcombine.high %v129_v32, %v133_v33  ;;  %v136_v42 = vld [vmem:[#allocation7 + $0x2c0] sm:$0xff]  ;;  %v137_v48 = vld [vmem:[#allocation7 + $0x2c8] sm:$0xff] }
  0x3d   :  { %5075 = vst [vmem:[#allocation51_spill] sm:$0xff] %v3480_v34  ;;  %5076 = vst [vmem:[#allocation52_spill] sm:$0xff] %v3484_v39  ;;  %v140_v47 = vld [vmem:[#allocation7 + $0x2e0] sm:$0xff]  ;;  %v141_v49 = vld [vmem:[#allocation7 + $0x2e8] sm:$0xff]  ;;  %v3492_v50 = vcombine.low %v128_v26, %v132_v31  ;;  %v3496_v55 = vcombine.low %v129_v32, %v133_v33 }
  0x3e   :  { %5077 = vst [vmem:[#allocation53_spill] sm:$0xff] %v3486_v40  ;;  %5078 = vst [vmem:[#allocation54_spill] sm:$0xff] %v3489_v41  ;;  %v3498_v56 = vcombine.high %v136_v42, %v140_v47  ;;  %v3501_v57 = vcombine.high %v137_v48, %v141_v49  ;;  %v144_v58 = vld [vmem:[#allocation7 + $0x300] sm:$0xff]  ;;  %v145_v1 = vld [vmem:[#allocation7 + $0x308] sm:$0xff]  ;;  %v3504_v3 = vcombine.low %v136_v42, %v140_v47 }
  0x3f   :  { %845 = vmatpush1.bf16.msra.mxu0 %v3432_v51  ;;  %886 = vmatpush1.bf16.msra.mxu1 %v3436_v52  ;;  %5079 = vst [vmem:[#allocation55_spill] sm:$0xff] %v3492_v50  ;;  %5080 = vst [vmem:[#allocation56_spill] sm:$0xff] %v3496_v55  ;;  %v148_v63 = vld [vmem:[#allocation7 + $0x320] sm:$0xff]  ;;  %v149_v2 = vld [vmem:[#allocation7 + $0x328] sm:$0xff]  ;;  %v3508_v13 = vcombine.low %v137_v48, %v141_v49 }
  0x40   :  { %846 = vmatprep.subr.bf16.mxu0 %v3438_v53  ;;  %887 = vmatprep.subr.bf16.mxu1 %v3441_v54  ;;  %5081 = vst [vmem:[#allocation57_spill] sm:$0xff] %v3498_v56  ;;  %5082 = vst [vmem:[#allocation58_spill] sm:$0xff] %v3501_v57  ;;  %v3510_v14 = vcombine.high %v144_v58, %v148_v63  ;;  %v3513_v16 = vcombine.high %v145_v1, %v149_v2  ;;  %v152_v17 = vld [vmem:[#allocation7 + $0x340] sm:$0xff]  ;;  %v153_v31 = vld [vmem:[#allocation7 + $0x348] sm:$0xff] }
  0x41   :  { %5083 = vst [vmem:[#allocation59_spill] sm:$0xff] %v3504_v3  ;;  %5084 = vst [vmem:[#allocation60_spill] sm:$0xff] %v3508_v13  ;;  %v156_v26 = vld [vmem:[#allocation7 + $0x360] sm:$0xff]  ;;  %v157_v32 = vld [vmem:[#allocation7 + $0x368] sm:$0xff]  ;;  %v3516_v33 = vcombine.low %v144_v58, %v148_v63  ;;  %v3520_v42 = vcombine.low %v145_v1, %v149_v2 }
  0x42   :  { %5085 = vst [vmem:[#allocation61_spill] sm:$0xff] %v3510_v14  ;;  %5086 = vst [vmem:[#allocation62_spill] sm:$0xff] %v3513_v16  ;;  %v3522_v47 = vcombine.high %v152_v17, %v156_v26  ;;  %v3525_v48 = vcombine.high %v153_v31, %v157_v32  ;;  %v160_v49 = vld [vmem:[#allocation7 + $0x380] sm:$0xff]  ;;  %v3528_v58 = vcombine.low %v152_v17, %v156_v26 }
  0x43   :  { %847 = vmatpush1.bf16.msra.mxu0 %v3444_v59  ;;  %888 = vmatpush1.bf16.msra.mxu1 %v3448_v60  ;;  %5087 = vst [vmem:[#allocation63_spill] sm:$0xff] %v3516_v33  ;;  %5088 = vst [vmem:[#allocation64_spill] sm:$0xff] %v3520_v42  ;;  %v164_v0 = vld [vmem:[#allocation7 + $0x3a0] sm:$0xff]  ;;  %v3532_v63 = vcombine.low %v153_v31, %v157_v32 }
  0x44   :  { %848 = vmatprep.subr.bf16.mxu0 %v3450_v61  ;;  %889 = vmatprep.subr.bf16.mxu1 %v3453_v62  ;;  %5089 = vst [vmem:[#allocation65_spill] sm:$0xff] %v3522_v47  ;;  %5090 = vst [vmem:[#allocation66_spill] sm:$0xff] %v3525_v48  ;;  %v3534_v1 = vcombine.high %v160_v49, %v164_v0  ;;  %v3540_v17 = vcombine.low %v160_v49, %v164_v0 }
  0x45   :  { %5091 = vst [vmem:[#allocation67_spill] sm:$0xff] %v3528_v58  ;;  %5092 = vst [vmem:[#allocation68_spill] sm:$0xff] %v3532_v63 }
  0x46   :  { %5093 = vst [vmem:[#allocation69_spill] sm:$0xff] %v3534_v1  ;;  %5095 = vst [vmem:[#allocation71_spill] sm:$0xff] %v3540_v17 }
  0x47   :  { %849 = vmatpush1.bf16.msra.mxu0 %v3456_v5  ;;  %890 = vmatpush1.bf16.msra.mxu1 %v3460_v7 }
  0x48   :  { %850 = vmatprep.subr.bf16.mxu0 %v3462_v8  ;;  %891 = vmatprep.subr.bf16.mxu1 %v3465_v12 }
  0x4b   :  { %851 = vmatpush1.bf16.msra.mxu0 %v3468_v18  ;;  %892 = vmatpush1.bf16.msra.mxu1 %v3472_v23 }
  0x4c   :  { %852 = vmatprep.subr.bf16.mxu0 %v3474_v24  ;;  %893 = vmatprep.subr.bf16.mxu1 %v3477_v25 }
  0x4f   :  { %853 = vmatpush1.bf16.msra.mxu0 %v3480_v34  ;;  %894 = vmatpush1.bf16.msra.mxu1 %v3484_v39 }
  0x50   :  { %854 = vmatprep.subr.bf16.mxu0 %v3486_v40  ;;  %895 = vmatprep.subr.bf16.mxu1 %v3489_v41 }
  0x53   :  { %855 = vmatpush1.bf16.msra.mxu0 %v3492_v50  ;;  %896 = vmatpush1.bf16.msra.mxu1 %v3496_v55  ;;  %v87_v55 = vld [vmem:[#allocation7 + $0x138] sm:$0xff] }
  0x54   :  { %856 = vmatprep.subr.bf16.mxu0 %v3498_v56  ;;  %897 = vmatprep.subr.bf16.mxu1 %v3501_v57  ;;  %v161_v57 = vld [vmem:[#allocation7 + $0x388] sm:$0xff] }
  0x55   :  { %v165_v56 = vld [vmem:[#allocation7 + $0x3a8] sm:$0xff] }
  0x56   :  { %v3537_v2 = vcombine.high %v161_v57, %v165_v56  ;;  %v3544_v26 = vcombine.low %v161_v57, %v165_v56 }
  0x57   :  { %857 = vmatpush1.bf16.msra.mxu0 %v3504_v3  ;;  %898 = vmatpush1.bf16.msra.mxu1 %v3508_v13  ;;  %v169_v13 = vld [vmem:[#allocation7 + $0x3c8] sm:$0xff] }
  0x58   :  { %858 = vmatprep.subr.bf16.mxu0 %v3510_v14  ;;  %899 = vmatprep.subr.bf16.mxu1 %v3513_v16  ;;  %5094 = vst [vmem:[#allocation70_spill] sm:$0xff] %v3537_v2  ;;  %v168_v16 = vld [vmem:[#allocation7 + $0x3c0] sm:$0xff]  ;;  %v173_v3 = vld [vmem:[#allocation7 + $0x3e8] sm:$0xff]  ;;  %5096 = vst [vmem:[#allocation72_spill] sm:$0xff] %v3544_v26 }
  0x59   :  { %v172_v14 = vld [vmem:[#allocation7 + $0x3e0] sm:$0xff]  ;;  %v3549_v32 = vcombine.high %v169_v13, %v173_v3  ;;  %v3556_v56 = vcombine.low %v169_v13, %v173_v3 }
  0x5a   :  { %v3546_v31 = vcombine.high %v168_v16, %v172_v14  ;;  %v3552_v0 = vcombine.low %v168_v16, %v172_v14 }
  0x5b   :  { %859 = vmatpush1.bf16.msra.mxu0 %v3516_v33  ;;  %900 = vmatpush1.bf16.msra.mxu1 %v3520_v42  ;;  %5098 = vst [vmem:[#allocation74_spill] sm:$0xff] %v3549_v32  ;;  %v51_v42 = vld [vmem:[#allocation7 + $0x18] sm:$0xff]  ;;  %5100 = vst [vmem:[#allocation76_spill] sm:$0xff] %v3556_v56 }
  0x5c   :  { %860 = vmatprep.subr.bf16.mxu0 %v3522_v47  ;;  %901 = vmatprep.subr.bf16.mxu1 %v3525_v48  ;;  %5097 = vst [vmem:[#allocation73_spill] sm:$0xff] %v3546_v31  ;;  %v50_v48 = vld [vmem:[#allocation7 + $0x10] sm:$0xff]  ;;  %v55_v33 = vld [vmem:[#allocation7 + $0x38] sm:$0xff]  ;;  %5099 = vst [vmem:[#allocation75_spill] sm:$0xff] %v3552_v0 }
  0x5d   :  { %v54_v47 = vld [vmem:[#allocation7 + $0x30] sm:$0xff]  ;;  %v3561_v49 = vcombine.high %v51_v42, %v55_v33  ;;  %v3568_v3 = vcombine.low %v51_v42, %v55_v33 }
  0x5e   :  { %v3558_v57 = vcombine.high %v50_v48, %v54_v47  ;;  %v3564_v14 = vcombine.low %v50_v48, %v54_v47 }
  0x5f   :  { %861 = vmatpush1.bf16.msra.mxu0 %v3528_v58  ;;  %902 = vmatpush1.bf16.msra.mxu1 %v3532_v63  ;;  %5102 = vst [vmem:[#allocation78_spill] sm:$0xff] %v3561_v49  ;;  %v59_v63 = vld [vmem:[#allocation7 + $0x58] sm:$0xff]  ;;  %5104 = vst [vmem:[#allocation80_spill] sm:$0xff] %v3568_v3 }
  0x60   :  { %862 = vmatprep.subr.bf16.mxu0 %v3534_v1  ;;  %903 = vmatprep.subr.bf16.mxu1 %v3537_v2  ;;  %5101 = vst [vmem:[#allocation77_spill] sm:$0xff] %v3558_v57  ;;  %v58_v2 = vld [vmem:[#allocation7 + $0x50] sm:$0xff]  ;;  %v63_v58 = vld [vmem:[#allocation7 + $0x78] sm:$0xff]  ;;  %5103 = vst [vmem:[#allocation79_spill] sm:$0xff] %v3564_v14 }
  0x61   :  { %v62_v1 = vld [vmem:[#allocation7 + $0x70] sm:$0xff]  ;;  %v3573_v16 = vcombine.high %v59_v63, %v63_v58  ;;  %v3582_v33 = vcombine.low %v59_v63, %v63_v58 }
  0x62   :  { %v3570_v13 = vcombine.high %v58_v2, %v62_v1  ;;  %v3578_v47 = vcombine.low %v58_v2, %v62_v1 }
  0x63   :  { %863 = vmatpush1.bf16.msra.mxu0 %v3540_v17  ;;  %904 = vmatpush1.bf16.msra.mxu1 %v3544_v26  ;;  %5106 = vst [vmem:[#allocation82_spill] sm:$0xff] %v3573_v16  ;;  %v5107_v26 = vmov 0.0|0.0   ;;  %v67_v17 = vld [vmem:[#allocation7 + $0x98] sm:$0xff]  ;;  %5109 = vst [vmem:[#allocation84_spill] sm:$0xff] %v3582_v33 }
  0x64   :  { %864 = vmatprep.subr.bf16.mxu0 %v3546_v31  ;;  %905 = vmatprep.subr.bf16.mxu1 %v3549_v32  ;;  %5105 = vst [vmem:[#allocation81_spill] sm:$0xff] %v3570_v13  ;;  %v66_v32 = vld [vmem:[#allocation7 + $0x90] sm:$0xff]  ;;  %5108 = vst [vmem:[#allocation83_spill] sm:$0xff] %v3578_v47 }
  0x65   :  { %v70_v31 = vld [vmem:[#allocation7 + $0xb0] sm:$0xff] }
  0x66   :  { %v3584_v42 = vcombine.high %v66_v32, %v70_v31  ;;  %v3592_v1 = vcombine.low %v66_v32, %v70_v31 }
  0x67   :  { %865 = vmatpush1.bf16.msra.mxu0 %v3552_v0  ;;  %906 = vmatpush1.bf16.msra.mxu1 %v3556_v56  ;;  %v71_v0 = vld [vmem:[#allocation7 + $0xb8] sm:$0xff] }
  0x68   :  { %916 = vmatprep.subr.bf16.mxu0 %v3558_v57  ;;  %957 = vmatprep.subr.bf16.mxu1 %v3561_v49  ;;  %5110 = vst [vmem:[#allocation85_spill] sm:$0xff] %v3584_v42  ;;  %v3587_v48 = vcombine.high %v67_v17, %v71_v0  ;;  %v74_v49 = vld [vmem:[#allocation7 + $0xd0] sm:$0xff]  ;;  %v75_v56 = vld [vmem:[#allocation7 + $0xd8] sm:$0xff]  ;;  %5112 = vst [vmem:[#allocation87_spill] sm:$0xff] %v3592_v1  ;;  %v3596_v58 = vcombine.low %v67_v17, %v71_v0 }
  0x69   :  { %v78_v57 = vld [vmem:[#allocation7 + $0xf0] sm:$0xff] }
  0x6a   :  { %867 = vmatmul.mubr.bf16.vlgmr.msra.gmra.mrb[0].mxu0 %v5107_v26  ;;  %908 = vmatmul.mubr.bf16.vlgmr.msra.gmra.mrb[0].mxu1 %v5107_v26  ;;  %5111 = vst [vmem:[#allocation86_spill] sm:$0xff] %v3587_v48  ;;  %5113 = vst [vmem:[#allocation88_spill] sm:$0xff] %v3596_v58  ;;  %v3598_v63 = vcombine.high %v74_v49, %v78_v57  ;;  %v3604_v31 = vcombine.low %v74_v49, %v78_v57 }
  0x6b   :  { %917 = vmatpush1.bf16.msra.mxu0 %v3564_v14  ;;  %958 = vmatpush1.bf16.msra.mxu1 %v3568_v3  ;;  %v79_v14 = vld [vmem:[#allocation7 + $0xf8] sm:$0xff] }
  0x6c   :  { %918 = vmatprep.subr.bf16.mxu0 %v3570_v13  ;;  %959 = vmatprep.subr.bf16.mxu1 %v3573_v16  ;;  %5114 = vst [vmem:[#allocation89_spill] sm:$0xff] %v3598_v63  ;;  %v3601_v2 = vcombine.high %v75_v56, %v79_v14  ;;  %v82_v16 = vld [vmem:[#allocation7 + $0x110] sm:$0xff]  ;;  %v83_v3 = vld [vmem:[#allocation7 + $0x118] sm:$0xff]  ;;  %5116 = vst [vmem:[#allocation91_spill] sm:$0xff] %v3604_v31  ;;  %v3608_v17 = vcombine.low %v75_v56, %v79_v14 }
  0x6d   :  { %948 = vmatprep.mubr.bf16.mxu0 %v5107_v26  ;;  %989 = vmatprep.mubr.bf16.mxu1 %v5107_v26  ;;  %v86_v13 = vld [vmem:[#allocation7 + $0x130] sm:$0xff]  ;;  %v3613_v0 = vcombine.high %v83_v3, %v87_v55  ;;  %v3620_v56 = vcombine.low %v83_v3, %v87_v55 }
  0x6e   :  { %5115 = vst [vmem:[#allocation90_spill] sm:$0xff] %v3601_v2  ;;  %5117 = vst [vmem:[#allocation92_spill] sm:$0xff] %v3608_v17  ;;  %v3610_v32 = vcombine.high %v82_v16, %v86_v13  ;;  %v3616_v57 = vcombine.low %v82_v16, %v86_v13 }
  0x6f   :  { %919 = vmatpush1.bf16.msra.mxu0 %v3578_v47  ;;  %960 = vmatpush1.bf16.msra.mxu1 %v3582_v33  ;;  %5119 = vst [vmem:[#allocation94_spill] sm:$0xff] %v3613_v0  ;;  %v91_v33 = vld [vmem:[#allocation7 + $0x158] sm:$0xff]  ;;  %5121 = vst [vmem:[#allocation96_spill] sm:$0xff] %v3620_v56 }
  0x70   :  { %920 = vmatprep.subr.bf16.mxu0 %v3584_v42  ;;  %961 = vmatprep.subr.bf16.mxu1 %v3587_v48  ;;  %5118 = vst [vmem:[#allocation93_spill] sm:$0xff] %v3610_v32  ;;  %v90_v48 = vld [vmem:[#allocation7 + $0x150] sm:$0xff]  ;;  %v95_v47 = vld [vmem:[#allocation7 + $0x178] sm:$0xff]  ;;  %5120 = vst [vmem:[#allocation95_spill] sm:$0xff] %v3616_v57 }
  0x71   :  { %v94_v42 = vld [vmem:[#allocation7 + $0x170] sm:$0xff]  ;;  %v3625_v14 = vcombine.high %v91_v33, %v95_v47  ;;  %v3632_v55 = vcombine.low %v91_v33, %v95_v47 }
  0x72   :  { %v3622_v49 = vcombine.high %v90_v48, %v94_v42  ;;  %v3628_v13 = vcombine.low %v90_v48, %v94_v42 }
  0x73   :  { %921 = vmatpush1.bf16.msra.mxu0 %v3592_v1  ;;  %962 = vmatpush1.bf16.msra.mxu1 %v3596_v58  ;;  %5123 = vst [vmem:[#allocation98_spill] sm:$0xff] %v3625_v14  ;;  %v99_v58 = vld [vmem:[#allocation7 + $0x198] sm:$0xff]  ;;  %5125 = vst [vmem:[#allocation100_spill] sm:$0xff] %v3632_v55 }
  0x74   :  { %922 = vmatprep.subr.bf16.mxu0 %v3598_v63  ;;  %963 = vmatprep.subr.bf16.mxu1 %v3601_v2  ;;  %5122 = vst [vmem:[#allocation97_spill] sm:$0xff] %v3622_v49  ;;  %v98_v2 = vld [vmem:[#allocation7 + $0x190] sm:$0xff]  ;;  %v103_v1 = vld [vmem:[#allocation7 + $0x1b8] sm:$0xff]  ;;  %5124 = vst [vmem:[#allocation99_spill] sm:$0xff] %v3628_v13 }
  0x75   :  { %v102_v63 = vld [vmem:[#allocation7 + $0x1b0] sm:$0xff]  ;;  %v3637_v16 = vcombine.high %v99_v58, %v103_v1  ;;  %v3644_v47 = vcombine.low %v99_v58, %v103_v1 }
  0x76   :  { %v3634_v3 = vcombine.high %v98_v2, %v102_v63  ;;  %v3640_v42 = vcombine.low %v98_v2, %v102_v63 }
  0x77   :  { %923 = vmatpush1.bf16.msra.mxu0 %v3604_v31  ;;  %964 = vmatpush1.bf16.msra.mxu1 %v3608_v17  ;;  %5127 = vst [vmem:[#allocation102_spill] sm:$0xff] %v3637_v16  ;;  %v107_v17 = vld [vmem:[#allocation7 + $0x1d8] sm:$0xff]  ;;  %5129 = vst [vmem:[#allocation104_spill] sm:$0xff] %v3644_v47 }
  0x78   :  { %924 = vmatprep.subr.bf16.mxu0 %v3610_v32  ;;  %965 = vmatprep.subr.bf16.mxu1 %v3613_v0  ;;  %5126 = vst [vmem:[#allocation101_spill] sm:$0xff] %v3634_v3  ;;  %v106_v0 = vld [vmem:[#allocation7 + $0x1d0] sm:$0xff]  ;;  %v111_v31 = vld [vmem:[#allocation7 + $0x1f8] sm:$0xff]  ;;  %5128 = vst [vmem:[#allocation103_spill] sm:$0xff] %v3640_v42 }
  0x79   :  { %v110_v32 = vld [vmem:[#allocation7 + $0x1f0] sm:$0xff]  ;;  %v3649_v48 = vcombine.high %v107_v17, %v111_v31  ;;  %v3656_v1 = vcombine.low %v107_v17, %v111_v31 }
  0x7a   :  { %v3646_v33 = vcombine.high %v106_v0, %v110_v32  ;;  %v3652_v63 = vcombine.low %v106_v0, %v110_v32 }
  0x7b   :  { %925 = vmatpush1.bf16.msra.mxu0 %v3616_v57  ;;  %966 = vmatpush1.bf16.msra.mxu1 %v3620_v56  ;;  %5131 = vst [vmem:[#allocation106_spill] sm:$0xff] %v3649_v48  ;;  %v115_v56 = vld [vmem:[#allocation7 + $0x218] sm:$0xff]  ;;  %5133 = vst [vmem:[#allocation108_spill] sm:$0xff] %v3656_v1 }
  0x7c   :  { %926 = vmatprep.subr.bf16.mxu0 %v3622_v49  ;;  %967 = vmatprep.subr.bf16.mxu1 %v3625_v14  ;;  %5130 = vst [vmem:[#allocation105_spill] sm:$0xff] %v3646_v33  ;;  %v114_v14 = vld [vmem:[#allocation7 + $0x210] sm:$0xff]  ;;  %v119_v57 = vld [vmem:[#allocation7 + $0x238] sm:$0xff]  ;;  %5132 = vst [vmem:[#allocation107_spill] sm:$0xff] %v3652_v63 }
  0x7d   :  { %v118_v49 = vld [vmem:[#allocation7 + $0x230] sm:$0xff]  ;;  %v3661_v2 = vcombine.high %v115_v56, %v119_v57  ;;  %v3668_v31 = vcombine.low %v115_v56, %v119_v57 }
  0x7e   :  { %v3658_v58 = vcombine.high %v114_v14, %v118_v49  ;;  %v3664_v32 = vcombine.low %v114_v14, %v118_v49 }
  0x7f   :  { %927 = vmatpush1.bf16.msra.mxu0 %v3628_v13  ;;  %968 = vmatpush1.bf16.msra.mxu1 %v3632_v55  ;;  %5135 = vst [vmem:[#allocation110_spill] sm:$0xff] %v3661_v2  ;;  %v123_v55 = vld [vmem:[#allocation7 + $0x258] sm:$0xff]  ;;  %5137 = vst [vmem:[#allocation112_spill] sm:$0xff] %v3668_v31 }
  0x80   :  { %928 = vmatprep.subr.bf16.mxu0 %v3634_v3  ;;  %969 = vmatprep.subr.bf16.mxu1 %v3637_v16  ;;  %5134 = vst [vmem:[#allocation109_spill] sm:$0xff] %v3658_v58  ;;  %v122_v16 = vld [vmem:[#allocation7 + $0x250] sm:$0xff]  ;;  %v127_v13 = vld [vmem:[#allocation7 + $0x278] sm:$0xff]  ;;  %5136 = vst [vmem:[#allocation111_spill] sm:$0xff] %v3664_v32 }
  0x81   :  { %v126_v3 = vld [vmem:[#allocation7 + $0x270] sm:$0xff]  ;;  %v3673_v0 = vcombine.high %v123_v55, %v127_v13  ;;  %v3680_v57 = vcombine.low %v123_v55, %v127_v13 }
  0x82   :  { %v3670_v17 = vcombine.high %v122_v16, %v126_v3  ;;  %v3676_v49 = vcombine.low %v122_v16, %v126_v3 }
  0x83   :  { %929 = vmatpush1.bf16.msra.mxu0 %v3640_v42  ;;  %970 = vmatpush1.bf16.msra.mxu1 %v3644_v47  ;;  %5139 = vst [vmem:[#allocation114_spill] sm:$0xff] %v3673_v0  ;;  %v131_v47 = vld [vmem:[#allocation7 + $0x298] sm:$0xff]  ;;  %5141 = vst [vmem:[#allocation116_spill] sm:$0xff] %v3680_v57 }
  0x84   :  { %930 = vmatprep.subr.bf16.mxu0 %v3646_v33  ;;  %971 = vmatprep.subr.bf16.mxu1 %v3649_v48  ;;  %5138 = vst [vmem:[#allocation113_spill] sm:$0xff] %v3670_v17  ;;  %v130_v48 = vld [vmem:[#allocation7 + $0x290] sm:$0xff]  ;;  %v135_v42 = vld [vmem:[#allocation7 + $0x2b8] sm:$0xff]  ;;  %5140 = vst [vmem:[#allocation115_spill] sm:$0xff] %v3676_v49 }
  0x85   :  { %v134_v33 = vld [vmem:[#allocation7 + $0x2b0] sm:$0xff]  ;;  %v3685_v14 = vcombine.high %v131_v47, %v135_v42  ;;  %v3692_v13 = vcombine.low %v131_v47, %v135_v42 }
  0x86   :  { %v3682_v56 = vcombine.high %v130_v48, %v134_v33  ;;  %v3688_v3 = vcombine.low %v130_v48, %v134_v33 }
  0x87   :  { %931 = vmatpush1.bf16.msra.mxu0 %v3652_v63  ;;  %972 = vmatpush1.bf16.msra.mxu1 %v3656_v1  ;;  %5143 = vst [vmem:[#allocation118_spill] sm:$0xff] %v3685_v14  ;;  %v139_v1 = vld [vmem:[#allocation7 + $0x2d8] sm:$0xff]  ;;  %5145 = vst [vmem:[#allocation120_spill] sm:$0xff] %v3692_v13 }
  0x88   :  { %932 = vmatprep.subr.bf16.mxu0 %v3658_v58  ;;  %973 = vmatprep.subr.bf16.mxu1 %v3661_v2  ;;  %5142 = vst [vmem:[#allocation117_spill] sm:$0xff] %v3682_v56  ;;  %v138_v2 = vld [vmem:[#allocation7 + $0x2d0] sm:$0xff]  ;;  %v143_v63 = vld [vmem:[#allocation7 + $0x2f8] sm:$0xff]  ;;  %5144 = vst [vmem:[#allocation119_spill] sm:$0xff] %v3688_v3 }
  0x89   :  { %v142_v58 = vld [vmem:[#allocation7 + $0x2f0] sm:$0xff]  ;;  %v3697_v16 = vcombine.high %v139_v1, %v143_v63  ;;  %v3704_v42 = vcombine.low %v139_v1, %v143_v63 }
  0x8a   :  { %v3694_v55 = vcombine.high %v138_v2, %v142_v58  ;;  %v3700_v33 = vcombine.low %v138_v2, %v142_v58 }
  0x8b   :  { %933 = vmatpush1.bf16.msra.mxu0 %v3664_v32  ;;  %974 = vmatpush1.bf16.msra.mxu1 %v3668_v31  ;;  %5147 = vst [vmem:[#allocation122_spill] sm:$0xff] %v3697_v16  ;;  %v147_v31 = vld [vmem:[#allocation7 + $0x318] sm:$0xff]  ;;  %5149 = vst [vmem:[#allocation124_spill] sm:$0xff] %v3704_v42 }
  0x8c   :  { %934 = vmatprep.subr.bf16.mxu0 %v3670_v17  ;;  %975 = vmatprep.subr.bf16.mxu1 %v3673_v0  ;;  %5146 = vst [vmem:[#allocation121_spill] sm:$0xff] %v3694_v55  ;;  %v146_v0 = vld [vmem:[#allocation7 + $0x310] sm:$0xff]  ;;  %v151_v32 = vld [vmem:[#allocation7 + $0x338] sm:$0xff]  ;;  %5148 = vst [vmem:[#allocation123_spill] sm:$0xff] %v3700_v33 }
  0x8d   :  { %v150_v17 = vld [vmem:[#allocation7 + $0x330] sm:$0xff]  ;;  %v3709_v48 = vcombine.high %v147_v31, %v151_v32  ;;  %v3716_v63 = vcombine.low %v147_v31, %v151_v32 }
  0x8e   :  { %v3706_v47 = vcombine.high %v146_v0, %v150_v17  ;;  %v3712_v58 = vcombine.low %v146_v0, %v150_v17 }
  0x8f   :  { %935 = vmatpush1.bf16.msra.mxu0 %v3676_v49  ;;  %976 = vmatpush1.bf16.msra.mxu1 %v3680_v57  ;;  %5151 = vst [vmem:[#allocation126_spill] sm:$0xff] %v3709_v48  ;;  %v155_v57 = vld [vmem:[#allocation7 + $0x358] sm:$0xff]  ;;  %5153 = vst [vmem:[#allocation128_spill] sm:$0xff] %v3716_v63 }
  0x90   :  { %936 = vmatprep.subr.bf16.mxu0 %v3682_v56  ;;  %977 = vmatprep.subr.bf16.mxu1 %v3685_v14  ;;  %5150 = vst [vmem:[#allocation125_spill] sm:$0xff] %v3706_v47  ;;  %v154_v14 = vld [vmem:[#allocation7 + $0x350] sm:$0xff]  ;;  %v159_v49 = vld [vmem:[#allocation7 + $0x378] sm:$0xff]  ;;  %5152 = vst [vmem:[#allocation127_spill] sm:$0xff] %v3712_v58 }
  0x91   :  { %v158_v56 = vld [vmem:[#allocation7 + $0x370] sm:$0xff]  ;;  %v3721_v2 = vcombine.high %v155_v57, %v159_v49  ;;  %v3728_v32 = vcombine.low %v155_v57, %v159_v49 }
  0x92   :  { %v3718_v1 = vcombine.high %v154_v14, %v158_v56  ;;  %v3724_v17 = vcombine.low %v154_v14, %v158_v56 }
  0x93   :  { %937 = vmatpush1.bf16.msra.mxu0 %v3688_v3  ;;  %978 = vmatpush1.bf16.msra.mxu1 %v3692_v13  ;;  %5155 = vst [vmem:[#allocation130_spill] sm:$0xff] %v3721_v2  ;;  %v163_v13 = vld [vmem:[#allocation7 + $0x398] sm:$0xff]  ;;  %5157 = vst [vmem:[#allocation132_spill] sm:$0xff] %v3728_v32 }
  0x94   :  { %938 = vmatprep.subr.bf16.mxu0 %v3694_v55  ;;  %979 = vmatprep.subr.bf16.mxu1 %v3697_v16  ;;  %5154 = vst [vmem:[#allocation129_spill] sm:$0xff] %v3718_v1  ;;  %v162_v16 = vld [vmem:[#allocation7 + $0x390] sm:$0xff]  ;;  %v167_v3 = vld [vmem:[#allocation7 + $0x3b8] sm:$0xff]  ;;  %5156 = vst [vmem:[#allocation131_spill] sm:$0xff] %v3724_v17 }
  0x95   :  { %v166_v55 = vld [vmem:[#allocation7 + $0x3b0] sm:$0xff]  ;;  %v3733_v0 = vcombine.high %v163_v13, %v167_v3  ;;  %v3740_v49 = vcombine.low %v163_v13, %v167_v3  ;;  %v5167_v3 = vld [vmem:[#allocation57_spill] sm:$0xff]  ;;  %v5168_v13 = vld [vmem:[#allocation58_spill] sm:$0xff] }
  0x96   :  { %v3730_v31 = vcombine.high %v162_v16, %v166_v55  ;;  %v3736_v56 = vcombine.low %v162_v16, %v166_v55  ;;  %v5169_v16 = vld [vmem:[#allocation59_spill] sm:$0xff] }
  0x97   :  { %939 = vmatpush1.bf16.msra.mxu0 %v3700_v33  ;;  %980 = vmatpush1.bf16.msra.mxu1 %v3704_v42  ;;  %5159 = vst [vmem:[#allocation134_spill] sm:$0xff] %v3733_v0  ;;  %v171_v42 = vld [vmem:[#allocation7 + $0x3d8] sm:$0xff]  ;;  %5161 = vst [vmem:[#allocation136_spill] sm:$0xff] %v3740_v49 }
  0x98   :  { %940 = vmatprep.subr.bf16.mxu0 %v3706_v47  ;;  %981 = vmatprep.subr.bf16.mxu1 %v3709_v48  ;;  %5158 = vst [vmem:[#allocation133_spill] sm:$0xff] %v3730_v31  ;;  %v170_v48 = vld [vmem:[#allocation7 + $0x3d0] sm:$0xff]  ;;  %v175_v33 = vld [vmem:[#allocation7 + $0x3f8] sm:$0xff]  ;;  %5160 = vst [vmem:[#allocation135_spill] sm:$0xff] %v3736_v56 }
  0x99   :  { %v174_v47 = vld [vmem:[#allocation7 + $0x3f0] sm:$0xff]  ;;  %v3745_v14 = vcombine.high %v171_v42, %v175_v33  ;;  %v3752_v55 = vcombine.low %v171_v42, %v175_v33  ;;  %v5170_v33 = vld [vmem:[#allocation60_spill] sm:$0xff]  ;;  %v5171_v42 = vld [vmem:[#allocation61_spill] sm:$0xff] }
  0x9a   :  { %v3742_v57 = vcombine.high %v170_v48, %v174_v47 }
  0x9b   :  { %941 = vmatpush1.bf16.msra.mxu0 %v3712_v58  ;;  %982 = vmatpush1.bf16.msra.mxu1 %v3716_v63  ;;  %5163 = vst [vmem:[#allocation138_spill] sm:$0xff] %v3745_v14  ;;  %5165 = vst [vmem:[#allocation140_spill] sm:$0xff] %v3752_v55 }
  0x9c   :  { %942 = vmatprep.subr.bf16.mxu0 %v3718_v1  ;;  %983 = vmatprep.subr.bf16.mxu1 %v3721_v2  ;;  %5162 = vst [vmem:[#allocation137_spill] sm:$0xff] %v3742_v57  ;;  %v3748_v2 = vcombine.low %v170_v48, %v174_v47  ;;  %v5172_v47 = vld [vmem:[#allocation62_spill] sm:$0xff]  ;;  %v5173_v48 = vld [vmem:[#allocation63_spill] sm:$0xff] }
  0x9e   :  { %5164 = vst [vmem:[#allocation139_spill] sm:$0xff] %v3748_v2 }
  0x9f   :  { %943 = vmatpush1.bf16.msra.mxu0 %v3724_v17  ;;  %984 = vmatpush1.bf16.msra.mxu1 %v3728_v32 }
  0xa0   :  { %944 = vmatprep.subr.bf16.mxu0 %v3730_v31  ;;  %985 = vmatprep.subr.bf16.mxu1 %v3733_v0 }
  0xa3   :  { %945 = vmatpush1.bf16.msra.mxu0 %v3736_v56  ;;  %986 = vmatpush1.bf16.msra.mxu1 %v3740_v49 }
  0xa4   :  { %946 = vmatprep.subr.bf16.mxu0 %v3742_v57  ;;  %987 = vmatprep.subr.bf16.mxu1 %v3745_v14 }
  0xa7   :  { %947 = vmatpush1.bf16.msra.mxu0 %v3748_v2  ;;  %988 = vmatpush1.bf16.msra.mxu1 %v3752_v55 }
  0xa8   :  { %1078 = vmatprep.subr.bf16.mxu0 %v3369_v4  ;;  %1119 = vmatprep.subr.bf16.mxu1 %v3373_v9 }
  0xaa   :  { %949 = vmatmul.mubr.bf16.vlgmr.msra.gmra.mrb[4].mxu0 %v5107_v26  ;;  %990 = vmatmul.mubr.bf16.vlgmr.msra.gmra.mrb[4].mxu1 %v5107_v26  ;;  %v5166_v26 = vld [vmem:[#allocation56_spill] sm:$0xff] }
  0xab   :  { %1079 = vmatpush1.bf16.msra.mxu0 %v3371_v6  ;;  %1120 = vmatpush1.bf16.msra.mxu1 %v3375_v10 }
  0xac   :  { %1080 = vmatprep.subr.bf16.mxu0 %v3377_v11  ;;  %1121 = vmatprep.subr.bf16.mxu1 %v3380_v15 }
  0xaf   :  { %1081 = vmatpush1.bf16.msra.mxu0 %v3384_v19  ;;  %1122 = vmatpush1.bf16.msra.mxu1 %v3388_v20 }
  0xb0   :  { %1082 = vmatprep.subr.bf16.mxu0 %v3390_v21  ;;  %1123 = vmatprep.subr.bf16.mxu1 %v3393_v22 }
  0xb3   :  { %1083 = vmatpush1.bf16.msra.mxu0 %v3396_v27  ;;  %1124 = vmatpush1.bf16.msra.mxu1 %v3400_v28 }
  0xb4   :  { %1084 = vmatprep.subr.bf16.mxu0 %v3402_v29  ;;  %1125 = vmatprep.subr.bf16.mxu1 %v3405_v30 }
  0xb7   :  { %1085 = vmatpush1.bf16.msra.mxu0 %v3408_v35  ;;  %1126 = vmatpush1.bf16.msra.mxu1 %v3412_v36 }
  0xb8   :  { %1086 = vmatprep.subr.bf16.mxu0 %v3414_v37  ;;  %1127 = vmatprep.subr.bf16.mxu1 %v3417_v38 }
  0xbb   :  { %1087 = vmatpush1.bf16.msra.mxu0 %v3420_v43  ;;  %1128 = vmatpush1.bf16.msra.mxu1 %v3424_v44 }
  0xbc   :  { %1088 = vmatprep.subr.bf16.mxu0 %v3426_v45  ;;  %1129 = vmatprep.subr.bf16.mxu1 %v3429_v46 }
  0xbf   :  { %1089 = vmatpush1.bf16.msra.mxu0 %v3432_v51  ;;  %1130 = vmatpush1.bf16.msra.mxu1 %v3436_v52 }
  0xc0   :  { %1090 = vmatprep.subr.bf16.mxu0 %v3438_v53  ;;  %1131 = vmatprep.subr.bf16.mxu1 %v3441_v54 }
  0xc3   :  { %1091 = vmatpush1.bf16.msra.mxu0 %v3444_v59  ;;  %1132 = vmatpush1.bf16.msra.mxu1 %v3448_v60 }
  0xc4   :  { %1092 = vmatprep.subr.bf16.mxu0 %v3450_v61  ;;  %1133 = vmatprep.subr.bf16.mxu1 %v3453_v62 }
  0xc7   :  { %1093 = vmatpush1.bf16.msra.mxu0 %v3456_v5  ;;  %1134 = vmatpush1.bf16.msra.mxu1 %v3460_v7 }
  0xc8   :  { %1094 = vmatprep.subr.bf16.mxu0 %v3462_v8  ;;  %1135 = vmatprep.subr.bf16.mxu1 %v3465_v12 }
  0xcb   :  { %1095 = vmatpush1.bf16.msra.mxu0 %v3468_v18  ;;  %1136 = vmatpush1.bf16.msra.mxu1 %v3472_v23 }
  0xcc   :  { %1096 = vmatprep.subr.bf16.mxu0 %v3474_v24  ;;  %1137 = vmatprep.subr.bf16.mxu1 %v3477_v25  ;;  %v182_v24 = vld [vmem:[#allocation4] sm:$0xff] }
  0xcd   :  { %v186_v23 = vunpack.c.l.bf16 %v182_v24  ;;  %v187_v18 = vunpack.c.h.bf16 %v182_v24  ;;  %v185_v24 = vld [vmem:[#allocation4 + $0x18] sm:$0xff] }
  0xcf   :  { %1097 = vmatpush1.bf16.msra.mxu0 %v3480_v34  ;;  %1138 = vmatpush1.bf16.msra.mxu1 %v3484_v39 }
  0xd0   :  { %1098 = vmatprep.subr.bf16.mxu0 %v3486_v40  ;;  %1139 = vmatprep.subr.bf16.mxu1 %v3489_v41  ;;  %v5174_v40 = vld [vmem:[#allocation64_spill] sm:$0xff]  ;;  %v5175_v41 = vld [vmem:[#allocation65_spill] sm:$0xff] }
  0xd3   :  { %1099 = vmatpush1.bf16.msra.mxu0 %v3492_v50  ;;  %1140 = vmatpush1.bf16.msra.mxu1 %v5166_v26  ;;  %v5176_v50 = vld [vmem:[#allocation66_spill] sm:$0xff]  ;;  %v5177_v26 = vld [vmem:[#allocation67_spill] sm:$0xff] }
  0xd4   :  { %1100 = vmatprep.subr.bf16.mxu0 %v5167_v3  ;;  %1141 = vmatprep.subr.bf16.mxu1 %v5168_v13  ;;  %v5178_v3 = vld [vmem:[#allocation68_spill] sm:$0xff]  ;;  %v5179_v13 = vld [vmem:[#allocation69_spill] sm:$0xff] }
  0xd7   :  { %1101 = vmatpush1.bf16.msra.mxu0 %v5169_v16  ;;  %1142 = vmatpush1.bf16.msra.mxu1 %v5170_v33  ;;  %v5180_v16 = vld [vmem:[#allocation70_spill] sm:$0xff]  ;;  %v5181_v33 = vld [vmem:[#allocation71_spill] sm:$0xff] }
  0xd8   :  { %1102 = vmatprep.subr.bf16.mxu0 %v5171_v42  ;;  %1143 = vmatprep.subr.bf16.mxu1 %v5172_v47  ;;  %v5182_v42 = vld [vmem:[#allocation72_spill] sm:$0xff]  ;;  %v5183_v47 = vld [vmem:[#allocation73_spill] sm:$0xff] }
  0xdb   :  { %1103 = vmatpush1.bf16.msra.mxu0 %v5173_v48  ;;  %1144 = vmatpush1.bf16.msra.mxu1 %v5174_v40  ;;  %v5184_v48 = vld [vmem:[#allocation74_spill] sm:$0xff]  ;;  %v5185_v40 = vld [vmem:[#allocation75_spill] sm:$0xff] }
  0xdc   :  { %1104 = vmatprep.subr.bf16.mxu0 %v5175_v41  ;;  %1145 = vmatprep.subr.bf16.mxu1 %v5176_v50  ;;  %v5186_v41 = vld [vmem:[#allocation76_spill] sm:$0xff]  ;;  %v5187_v50 = vld [vmem:[#allocation77_spill] sm:$0xff] }
  0xdf   :  { %1105 = vmatpush1.bf16.msra.mxu0 %v5177_v26  ;;  %1146 = vmatpush1.bf16.msra.mxu1 %v5178_v3  ;;  %v5188_v26 = vld [vmem:[#allocation78_spill] sm:$0xff] }
  0xe0   :  { %1106 = vmatprep.subr.bf16.mxu0 %v5179_v13  ;;  %1147 = vmatprep.subr.bf16.mxu1 %v5180_v16 }
  0xe3   :  { %1107 = vmatpush1.bf16.msra.mxu0 %v5181_v33  ;;  %1148 = vmatpush1.bf16.msra.mxu1 %v5182_v42 }
  0xe4   :  { %1108 = vmatprep.subr.bf16.mxu0 %v5183_v47  ;;  %1149 = vmatprep.subr.bf16.mxu1 %v5184_v48  ;;  %v183_v47 = vld [vmem:[#allocation4 + $0x8] sm:$0xff] }
  0xe5   :  { %v188_v48 = vunpack.c.l.bf16 %v183_v47 }
  0xe7   :  { %1109 = vmatpush1.bf16.msra.mxu0 %v5185_v40  ;;  %1150 = vmatpush1.bf16.msra.mxu1 %v5186_v41  ;;  %v189_v40 = vunpack.c.h.bf16 %v183_v47 }
  0xe8   :  { %1160 = vmatprep.subr.bf16.mxu0 %v5187_v50  ;;  %1201 = vmatprep.subr.bf16.mxu1 %v5188_v26 }
 0x13d   :  { %v868_v3 = vpop.f32.mrb[0].mxu0  ;;  %v909_v13 = vpop.f32.mrb[0].mxu1 }
 0x13e   :  { %v870_v39 = vpop.f32.mrb[1].mxu0  ;;  %v911_v16 = vpop.f32.mrb[1].mxu1  ;;  %v869_v12 = vadd.f32 %v868_v3, %v186_v23  ;;  %v910_v41 = vadd.f32 %v909_v13, %v188_v48 }
 0x13f   :  { %v872_v34 = vpop.f32.mrb[2].mxu0  ;;  %v913_v33 = vpop.f32.mrb[2].mxu1  ;;  %v871_v8 = vadd.f32 %v870_v39, %v187_v18  ;;  %v912_v50 = vadd.f32 %v911_v16, %v189_v40  ;;  %v192_v39 = vunpack.c.l.bf16 %v185_v24 }
 0x140   :  { %v873_v25 = vpop.f32.mrb[3].mxu0  ;;  %v914_v42 = vpop.f32.mrb[3].mxu1  ;;  %v2920_v7 = vmul.f32 -1.442695, %v869_v12  ;;  %v2922_v26 = vmul.f32 -1.442695, %v910_v41 }
 0x141   :  { %v2921_v5 = vmul.f32 -1.442695, %v871_v8  ;;  %v2923_v62 = vmul.f32 -1.442695, %v912_v50  ;;  %v184_v42 = vld [vmem:[#allocation4 + $0x10] sm:$0xff]  ;;  %v193_v8 = vunpack.c.h.bf16 %v185_v24 }
 0x142   :  { %2992 = vpow2.f32 %v2920_v7  ;;  %v190_v3 = vunpack.c.l.bf16 %v184_v42  ;;  %v191_v12 = vunpack.c.h.bf16 %v184_v42 }
 0x143   :  { %2994 = vpow2.f32 %v2922_v26 }
 0x144   :  { %2996 = vpow2.f32 %v2921_v5 }
 0x145   :  { %2998 = vpow2.f32 %v2923_v62 }
 0x14c   :  { %v2993_v25 = vpop.eup %2992 }
 0x14d   :  { %v2995_v34 = vpop.eup %2994  ;;  %v1004_v60 = vadd.f32 1.0, %v2993_v25 }
 0x14e   :  { %v2997_v33 = vpop.eup %2996  ;;  %v1016_v47 = vadd.f32 1.0, %v2995_v34 }
 0x14f   :  { %v2999_v61 = vpop.eup %2998  ;;  %v1005_v23 = vadd.f32 1.0, %v2997_v33  ;;  %3000 = vrcp.f32 %v1004_v60 }
 0x150   :  { %v1017_v18 = vadd.f32 1.0, %v2999_v61  ;;  %3002 = vrcp.f32 %v1016_v47 }
 0x151   :  { %3004 = vrcp.f32 %v1005_v23 }
 0x152   :  { %3006 = vrcp.f32 %v1017_v18 }
 0x159   :  { %v3001_v33 = vpop.eup %3000 }
 0x15a   :  { %v3003_v42 = vpop.eup %3002 }
 0x15b   :  { %v3005_v24 = vpop.eup %3004  ;;  %v1036_v18 = vmul.f32 0.0, %v3003_v42  ;;  %v5189_v42 = vld [vmem:[#allocation79_spill] sm:$0xff] }
 0x15c   :  { %v3007_v47 = vpop.eup %3006 }
 0x17d   :  { %v950_v7 = vpop.f32.mrb[4].mxu0  ;;  %v991_v62 = vpop.f32.mrb[4].mxu1 }
 0x17e   :  { %v951_v5 = vadd.f32 %v950_v7, %v190_v3  ;;  %v952_v40 = vpop.f32.mrb[5].mxu0  ;;  %v992_v41 = vadd.f32 %v991_v62, %v192_v39  ;;  %v993_v26 = vpop.f32.mrb[5].mxu1 }
 0x17f   :  { %v953_v50 = vadd.f32 %v952_v40, %v191_v12  ;;  %v954_v13 = vpop.f32.mrb[6].mxu0  ;;  %v994_v16 = vadd.f32 %v993_v26, %v193_v8  ;;  %v995_v48 = vpop.f32.mrb[6].mxu1  ;;  %v1037_v12 = vmul.f32 0.0, %v3007_v47  ;;  %v5191_v47 = vld [vmem:[#allocation81_spill] sm:$0xff] }
 0x180   :  { %3008 = vtanh.f32 %v951_v5  ;;  %v955_v25 = vpop.f32.mrb[7].mxu0  ;;  %v2924_v61 = vmul.f32 -1.442695, %v992_v41  ;;  %v996_v34 = vpop.f32.mrb[7].mxu1 }
 0x181   :  { %3010 = vtanh.f32 %v953_v50  ;;  %v2925_v60 = vmul.f32 -1.442695, %v994_v16 }
 0x182   :  { %3012 = vpow2.f32 %v2924_v61 }
 0x183   :  { %3014 = vpow2.f32 %v2925_v60 }
 0x18a   :  { %v3009_v23 = vpop.eup %3008 }
 0x18b   :  { %v3011_v3 = vpop.eup %3010  ;;  %v1038_v39 = vmul.f32 %v3009_v23, %v3001_v33  ;;  %v5192_v23 = vld [vmem:[#allocation82_spill] sm:$0xff] }
 0x18c   :  { %v1039_v7 = vmul.f32 %v3011_v3, %v3005_v24  ;;  %v3013_v5 = vpop.eup %3012  ;;  %v5190_v24 = vld [vmem:[#allocation80_spill] sm:$0xff]  ;;  %v5193_v3 = vld [vmem:[#allocation83_spill] sm:$0xff] }
 0x18d   :  { %v3825_v8 = vadd.f32 %v1038_v39, %v1036_v18  ;;  %v3015_v62 = vpop.eup %3014  ;;  %v1030_v40 = vadd.f32 1.0, %v3013_v5  ;;  %v5194_v18 = vld [vmem:[#allocation84_spill] sm:$0xff]  ;;  %v5195_v39 = vld [vmem:[#allocation85_spill] sm:$0xff] }
 0x18e   :  { %v3827_v41 = vadd.f32 %v1039_v7, %v1037_v12  ;;  %v1031_v50 = vadd.f32 1.0, %v3015_v62  ;;  %v5196_v12 = vld [vmem:[#allocation86_spill] sm:$0xff]  ;;  %v5197_v7 = vld [vmem:[#allocation87_spill] sm:$0xff]  ;;  %v5198_v5 = vld [vmem:[#allocation88_spill] sm:$0xff] }
 0x18f   :  { %3016 = vtanh.f32 %v3825_v8  ;;  %v5199_v62 = vld [vmem:[#allocation89_spill] sm:$0xff] }
 0x190   :  { %3018 = vrcp.f32 %v1030_v40  ;;  %v5200_v40 = vld [vmem:[#allocation90_spill] sm:$0xff] }
 0x191   :  { %3020 = vtanh.f32 %v3827_v41 }
 0x192   :  { %3022 = vrcp.f32 %v1031_v50  ;;  %v5201_v50 = vld [vmem:[#allocation91_spill] sm:$0xff] }
 0x199   :  { %v3017_v26 = vpop.eup %3016 }
 0x19a   :  { %v3019_v13 = vpop.eup %3018 }
 0x19b   :  { %v3021_v16 = vpop.eup %3020  ;;  %v1044_v48 = vmul.f32 %v3019_v13, %v3017_v26  ;;  %v5202_v26 = vld [vmem:[#allocation92_spill] sm:$0xff]  ;;  %v5203_v13 = vld [vmem:[#allocation93_spill] sm:$0xff] }
 0x19c   :  { %v3023_v25 = vpop.eup %3022 }
 0x19d   :  { %v1045_v61 = vmul.f32 %v3023_v25, %v3021_v16  ;;  %v3831_v33 = vpack.c.bf16 %v1044_v48, %v1044_v48  ;;  %v5204_v16 = vld [vmem:[#allocation94_spill] sm:$0xff]  ;;  %v5206_v25 = vld [vmem:[#allocation96_spill] sm:$0xff] }
 0x19f   :  { %v1064_v34 = vpack.c.bf16 %v1045_v61, %v1045_v61  ;;  %v2976_v60 = vpack.c.bf16 %v1045_v61, %v1044_v48  ;;  %v5205_v48 = vld [vmem:[#allocation95_spill] sm:$0xff]  ;;  %v5207_v61 = vld [vmem:[#allocation97_spill] sm:$0xff] }
 0x1a1   :  { %1110 = vmatprep.mubr.bf16.mxu0 %v1064_v34  ;;  %1151 = vmatprep.mubr.bf16.mxu1 %v1064_v34  ;;  %1054 = vst [vmem:[#allocation9] sm:$0xff] %v2976_v60  ;;  %v5209_v60 = vld [vmem:[#allocation99_spill] sm:$0xff] }
 0x1a2   :  { %1111 = vmatmul.mubr.bf16.vlgmr.msra.gmra.mrb[8].mxu0 %v3831_v33  ;;  %1152 = vmatmul.mubr.bf16.vlgmr.msra.gmra.mrb[8].mxu1 %v3831_v33 }
 0x1a3   :  { %1161 = vmatpush1.bf16.msra.mxu0 %v5189_v42  ;;  %1202 = vmatpush1.bf16.msra.mxu1 %v5190_v24 }
 0x1a4   :  { %1192 = vmatprep.mubr.bf16.mxu0 %v1064_v34  ;;  %1233 = vmatprep.mubr.bf16.mxu1 %v1064_v34  ;;  %v5208_v34 = vld [vmem:[#allocation98_spill] sm:$0xff] }
 0x1a5   :  { %1162 = vmatprep.subr.bf16.mxu0 %v5191_v47  ;;  %1203 = vmatprep.subr.bf16.mxu1 %v5192_v23 }
 0x1a7   :  { %1163 = vmatpush1.bf16.msra.mxu0 %v5193_v3  ;;  %1204 = vmatpush1.bf16.msra.mxu1 %v5194_v18 }
 0x1a8   :  { %1164 = vmatprep.subr.bf16.mxu0 %v5195_v39  ;;  %1205 = vmatprep.subr.bf16.mxu1 %v5196_v12 }
 0x1ab   :  { %1165 = vmatpush1.bf16.msra.mxu0 %v5197_v7  ;;  %1206 = vmatpush1.bf16.msra.mxu1 %v5198_v5 }
 0x1ac   :  { %1166 = vmatprep.subr.bf16.mxu0 %v5199_v62  ;;  %1207 = vmatprep.subr.bf16.mxu1 %v5200_v40  ;;  %v5210_v62 = vld [vmem:[#allocation100_spill] sm:$0xff]  ;;  %v5211_v40 = vld [vmem:[#allocation101_spill] sm:$0xff] }
 0x1af   :  { %1167 = vmatpush1.bf16.msra.mxu0 %v5201_v50  ;;  %1208 = vmatpush1.bf16.msra.mxu1 %v5202_v26  ;;  %v5212_v50 = vld [vmem:[#allocation102_spill] sm:$0xff]  ;;  %v5213_v26 = vld [vmem:[#allocation103_spill] sm:$0xff] }
 0x1b0   :  { %1168 = vmatprep.subr.bf16.mxu0 %v5203_v13  ;;  %1209 = vmatprep.subr.bf16.mxu1 %v5204_v16  ;;  %v5214_v13 = vld [vmem:[#allocation104_spill] sm:$0xff]  ;;  %v5215_v16 = vld [vmem:[#allocation105_spill] sm:$0xff] }
 0x1b3   :  { %1169 = vmatpush1.bf16.msra.mxu0 %v5205_v48  ;;  %1210 = vmatpush1.bf16.msra.mxu1 %v5206_v25  ;;  %v5216_v48 = vld [vmem:[#allocation106_spill] sm:$0xff]  ;;  %v5217_v25 = vld [vmem:[#allocation107_spill] sm:$0xff] }
 0x1b4   :  { %1170 = vmatprep.subr.bf16.mxu0 %v5207_v61  ;;  %1211 = vmatprep.subr.bf16.mxu1 %v5208_v34  ;;  %v5218_v61 = vld [vmem:[#allocation108_spill] sm:$0xff]  ;;  %v5219_v34 = vld [vmem:[#allocation109_spill] sm:$0xff] }
 0x1b7   :  { %1171 = vmatpush1.bf16.msra.mxu0 %v5209_v60  ;;  %1212 = vmatpush1.bf16.msra.mxu1 %v5210_v62  ;;  %v5220_v60 = vld [vmem:[#allocation110_spill] sm:$0xff]  ;;  %v5221_v62 = vld [vmem:[#allocation111_spill] sm:$0xff] }
 0x1b8   :  { %1172 = vmatprep.subr.bf16.mxu0 %v5211_v40  ;;  %1213 = vmatprep.subr.bf16.mxu1 %v5212_v50  ;;  %v5222_v40 = vld [vmem:[#allocation112_spill] sm:$0xff]  ;;  %v5223_v50 = vld [vmem:[#allocation113_spill] sm:$0xff] }
 0x1bb   :  { %1173 = vmatpush1.bf16.msra.mxu0 %v5213_v26  ;;  %1214 = vmatpush1.bf16.msra.mxu1 %v5214_v13  ;;  %v5224_v26 = vld [vmem:[#allocation114_spill] sm:$0xff]  ;;  %v5225_v13 = vld [vmem:[#allocation115_spill] sm:$0xff] }
 0x1bc   :  { %1174 = vmatprep.subr.bf16.mxu0 %v5215_v16  ;;  %1215 = vmatprep.subr.bf16.mxu1 %v5216_v48  ;;  %v5226_v16 = vld [vmem:[#allocation116_spill] sm:$0xff]  ;;  %v5227_v48 = vld [vmem:[#allocation117_spill] sm:$0xff] }
 0x1bf   :  { %1175 = vmatpush1.bf16.msra.mxu0 %v5217_v25  ;;  %1216 = vmatpush1.bf16.msra.mxu1 %v5218_v61  ;;  %v5228_v25 = vld [vmem:[#allocation118_spill] sm:$0xff]  ;;  %v5229_v61 = vld [vmem:[#allocation119_spill] sm:$0xff] }
 0x1c0   :  { %1176 = vmatprep.subr.bf16.mxu0 %v5219_v34  ;;  %1217 = vmatprep.subr.bf16.mxu1 %v5220_v60  ;;  %v5230_v34 = vld [vmem:[#allocation120_spill] sm:$0xff]  ;;  %v5231_v60 = vld [vmem:[#allocation121_spill] sm:$0xff] }
 0x1c3   :  { %1177 = vmatpush1.bf16.msra.mxu0 %v5221_v62  ;;  %1218 = vmatpush1.bf16.msra.mxu1 %v5222_v40  ;;  %v5232_v62 = vld [vmem:[#allocation122_spill] sm:$0xff]  ;;  %v5233_v40 = vld [vmem:[#allocation123_spill] sm:$0xff] }
 0x1c4   :  { %1178 = vmatprep.subr.bf16.mxu0 %v5223_v50  ;;  %1219 = vmatprep.subr.bf16.mxu1 %v5224_v26  ;;  %v5234_v50 = vld [vmem:[#allocation124_spill] sm:$0xff]  ;;  %v5235_v26 = vld [vmem:[#allocation125_spill] sm:$0xff] }
 0x1c7   :  { %1179 = vmatpush1.bf16.msra.mxu0 %v5225_v13  ;;  %1220 = vmatpush1.bf16.msra.mxu1 %v5226_v16  ;;  %v5236_v13 = vld [vmem:[#allocation126_spill] sm:$0xff] }
 0x1c8   :  { %1180 = vmatprep.subr.bf16.mxu0 %v5227_v48  ;;  %1221 = vmatprep.subr.bf16.mxu1 %v5228_v25 }
 0x1cb   :  { %1181 = vmatpush1.bf16.msra.mxu0 %v5229_v61  ;;  %1222 = vmatpush1.bf16.msra.mxu1 %v5230_v34  ;;  %v5237_v61 = vld [vmem:[#allocation130_spill] sm:$0xff] }
 0x1cc   :  { %1182 = vmatprep.subr.bf16.mxu0 %v5231_v60  ;;  %1223 = vmatprep.subr.bf16.mxu1 %v5232_v62 }
 0x1cf   :  { %1183 = vmatpush1.bf16.msra.mxu0 %v5233_v40  ;;  %1224 = vmatpush1.bf16.msra.mxu1 %v5234_v50 }
 0x1d0   :  { %1184 = vmatprep.subr.bf16.mxu0 %v5235_v26  ;;  %1225 = vmatprep.subr.bf16.mxu1 %v5236_v13 }
 0x1d3   :  { %1185 = vmatpush1.bf16.msra.mxu0 %v3712_v58  ;;  %1226 = vmatpush1.bf16.msra.mxu1 %v3716_v63 }
 0x1d4   :  { %1186 = vmatprep.subr.bf16.mxu0 %v3718_v1  ;;  %1227 = vmatprep.subr.bf16.mxu1 %v5237_v61 }
 0x1d7   :  { %1187 = vmatpush1.bf16.msra.mxu0 %v3724_v17  ;;  %1228 = vmatpush1.bf16.msra.mxu1 %v3728_v32 }
 0x1d8   :  { %1188 = vmatprep.subr.bf16.mxu0 %v3730_v31  ;;  %1229 = vmatprep.subr.bf16.mxu1 %v3733_v0 }
 0x1db   :  { %1189 = vmatpush1.bf16.msra.mxu0 %v3736_v56  ;;  %1230 = vmatpush1.bf16.msra.mxu1 %v3740_v49 }
 0x1dc   :  { %1190 = vmatprep.subr.bf16.mxu0 %v3742_v57  ;;  %1231 = vmatprep.subr.bf16.mxu1 %v3745_v14 }
 0x1df   :  { %1191 = vmatpush1.bf16.msra.mxu0 %v3748_v2  ;;  %1232 = vmatpush1.bf16.msra.mxu1 %v3752_v55 }
 0x1e0   :  { %1323 = vmatprep.subr.bf16.mxu0 %v3369_v4  ;;  %1364 = vmatprep.subr.bf16.mxu1 %v3373_v9 }
 0x1e2   :  { %1193 = vmatmul.mubr.bf16.vlgmr.msra.gmra.mrb[12].mxu0 %v3831_v33  ;;  %1234 = vmatmul.mubr.bf16.vlgmr.msra.gmra.mrb[12].mxu1 %v3831_v33  ;;  %v5238_v33 = vld [vmem:[#allocation40_spill] sm:$0xff] }
 0x1e3   :  { %1324 = vmatpush1.bf16.msra.mxu0 %v3371_v6  ;;  %1365 = vmatpush1.bf16.msra.mxu1 %v3375_v10 }
 0x1e4   :  { %1325 = vmatprep.subr.bf16.mxu0 %v3377_v11  ;;  %1366 = vmatprep.subr.bf16.mxu1 %v3380_v15  ;;  %v1069_v15 = vld [vmem:[#allocation4 + $0x38] sm:$0xff] }
 0x1e7   :  { %1326 = vmatpush1.bf16.msra.mxu0 %v3384_v19  ;;  %1367 = vmatpush1.bf16.msra.mxu1 %v3388_v20 }
 0x1e8   :  { %1327 = vmatprep.subr.bf16.mxu0 %v3390_v21  ;;  %1368 = vmatprep.subr.bf16.mxu1 %v3393_v22 }
 0x1eb   :  { %1328 = vmatpush1.bf16.msra.mxu0 %v3396_v27  ;;  %1369 = vmatpush1.bf16.msra.mxu1 %v3400_v28 }
 0x1ec   :  { %1329 = vmatprep.subr.bf16.mxu0 %v3402_v29  ;;  %1370 = vmatprep.subr.bf16.mxu1 %v3405_v30  ;;  %v1066_v30 = vld [vmem:[#allocation4 + $0x20] sm:$0xff] }
 0x1ed   :  { %v1070_v29 = vunpack.c.l.bf16 %v1066_v30  ;;  %v1071_v28 = vunpack.c.h.bf16 %v1066_v30 }
 0x1ef   :  { %1330 = vmatpush1.bf16.msra.mxu0 %v3408_v35  ;;  %1371 = vmatpush1.bf16.msra.mxu1 %v3412_v36 }
 0x1f0   :  { %1331 = vmatprep.subr.bf16.mxu0 %v3414_v37  ;;  %1372 = vmatprep.subr.bf16.mxu1 %v3417_v38  ;;  %v5239_v38 = vld [vmem:[#allocation41_spill] sm:$0xff] }
 0x1f3   :  { %1332 = vmatpush1.bf16.msra.mxu0 %v3420_v43  ;;  %1373 = vmatpush1.bf16.msra.mxu1 %v3424_v44  ;;  %v5240_v43 = vld [vmem:[#allocation42_spill] sm:$0xff]  ;;  %v5241_v44 = vld [vmem:[#allocation43_spill] sm:$0xff] }
 0x1f4   :  { %1333 = vmatprep.subr.bf16.mxu0 %v3426_v45  ;;  %1374 = vmatprep.subr.bf16.mxu1 %v3429_v46  ;;  %v5242_v45 = vld [vmem:[#allocation44_spill] sm:$0xff]  ;;  %v5243_v46 = vld [vmem:[#allocation45_spill] sm:$0xff] }
 0x1f7   :  { %1334 = vmatpush1.bf16.msra.mxu0 %v3432_v51  ;;  %1375 = vmatpush1.bf16.msra.mxu1 %v3436_v52  ;;  %v5244_v51 = vld [vmem:[#allocation46_spill] sm:$0xff]  ;;  %v5245_v52 = vld [vmem:[#allocation47_spill] sm:$0xff] }
 0x1f8   :  { %1335 = vmatprep.subr.bf16.mxu0 %v3438_v53  ;;  %1376 = vmatprep.subr.bf16.mxu1 %v3441_v54  ;;  %v5246_v53 = vld [vmem:[#allocation48_spill] sm:$0xff]  ;;  %v5247_v54 = vld [vmem:[#allocation49_spill] sm:$0xff] }
 0x1fb   :  { %1336 = vmatpush1.bf16.msra.mxu0 %v3444_v59  ;;  %1377 = vmatpush1.bf16.msra.mxu1 %v5238_v33  ;;  %v5248_v59 = vld [vmem:[#allocation50_spill] sm:$0xff]  ;;  %v5249_v33 = vld [vmem:[#allocation51_spill] sm:$0xff] }
 0x1fc   :  { %1337 = vmatprep.subr.bf16.mxu0 %v5239_v38  ;;  %1378 = vmatprep.subr.bf16.mxu1 %v5240_v43  ;;  %v5250_v38 = vld [vmem:[#allocation52_spill] sm:$0xff]  ;;  %v5251_v43 = vld [vmem:[#allocation53_spill] sm:$0xff] }
 0x1ff   :  { %1338 = vmatpush1.bf16.msra.mxu0 %v5241_v44  ;;  %1379 = vmatpush1.bf16.msra.mxu1 %v5242_v45  ;;  %v5252_v44 = vld [vmem:[#allocation54_spill] sm:$0xff]  ;;  %v5253_v45 = vld [vmem:[#allocation55_spill] sm:$0xff] }
 0x200   :  { %1339 = vmatprep.subr.bf16.mxu0 %v5243_v46  ;;  %1380 = vmatprep.subr.bf16.mxu1 %v5244_v51  ;;  %v5254_v46 = vld [vmem:[#allocation56_spill] sm:$0xff]  ;;  %v5255_v51 = vld [vmem:[#allocation57_spill] sm:$0xff] }
 0x203   :  { %1340 = vmatpush1.bf16.msra.mxu0 %v5245_v52  ;;  %1381 = vmatpush1.bf16.msra.mxu1 %v5246_v53  ;;  %v5256_v52 = vld [vmem:[#allocation58_spill] sm:$0xff]  ;;  %v5257_v53 = vld [vmem:[#allocation59_spill] sm:$0xff] }
 0x204   :  { %1341 = vmatprep.subr.bf16.mxu0 %v5247_v54  ;;  %1382 = vmatprep.subr.bf16.mxu1 %v5248_v59  ;;  %v5258_v54 = vld [vmem:[#allocation60_spill] sm:$0xff]  ;;  %v5259_v59 = vld [vmem:[#allocation61_spill] sm:$0xff] }
 0x207   :  { %1342 = vmatpush1.bf16.msra.mxu0 %v5249_v33  ;;  %1383 = vmatpush1.bf16.msra.mxu1 %v5250_v38  ;;  %v5260_v33 = vld [vmem:[#allocation62_spill] sm:$0xff]  ;;  %v5261_v38 = vld [vmem:[#allocation63_spill] sm:$0xff] }
 0x208   :  { %1343 = vmatprep.subr.bf16.mxu0 %v5251_v43  ;;  %1384 = vmatprep.subr.bf16.mxu1 %v5252_v44  ;;  %v5262_v43 = vld [vmem:[#allocation64_spill] sm:$0xff]  ;;  %v5263_v44 = vld [vmem:[#allocation65_spill] sm:$0xff] }
 0x20b   :  { %1344 = vmatpush1.bf16.msra.mxu0 %v5253_v45  ;;  %1385 = vmatpush1.bf16.msra.mxu1 %v5254_v46  ;;  %v5264_v45 = vld [vmem:[#allocation66_spill] sm:$0xff]  ;;  %v5265_v46 = vld [vmem:[#allocation67_spill] sm:$0xff] }
 0x20c   :  { %1345 = vmatprep.subr.bf16.mxu0 %v5255_v51  ;;  %1386 = vmatprep.subr.bf16.mxu1 %v5256_v52  ;;  %v5266_v51 = vld [vmem:[#allocation68_spill] sm:$0xff]  ;;  %v5267_v52 = vld [vmem:[#allocation69_spill] sm:$0xff] }
 0x20f   :  { %1346 = vmatpush1.bf16.msra.mxu0 %v5257_v53  ;;  %1387 = vmatpush1.bf16.msra.mxu1 %v5258_v54  ;;  %v5268_v53 = vld [vmem:[#allocation70_spill] sm:$0xff]  ;;  %v5269_v54 = vld [vmem:[#allocation71_spill] sm:$0xff] }
 0x210   :  { %1347 = vmatprep.subr.bf16.mxu0 %v5259_v59  ;;  %1388 = vmatprep.subr.bf16.mxu1 %v5260_v33  ;;  %v5270_v59 = vld [vmem:[#allocation72_spill] sm:$0xff]  ;;  %v5271_v33 = vld [vmem:[#allocation73_spill] sm:$0xff] }
 0x213   :  { %1348 = vmatpush1.bf16.msra.mxu0 %v5261_v38  ;;  %1389 = vmatpush1.bf16.msra.mxu1 %v5262_v43  ;;  %v5272_v38 = vld [vmem:[#allocation74_spill] sm:$0xff]  ;;  %v5273_v43 = vld [vmem:[#allocation75_spill] sm:$0xff] }
 0x214   :  { %1349 = vmatprep.subr.bf16.mxu0 %v5263_v44  ;;  %1390 = vmatprep.subr.bf16.mxu1 %v5264_v45  ;;  %v5274_v44 = vld [vmem:[#allocation76_spill] sm:$0xff]  ;;  %v5275_v45 = vld [vmem:[#allocation77_spill] sm:$0xff] }
 0x217   :  { %1350 = vmatpush1.bf16.msra.mxu0 %v5265_v46  ;;  %1391 = vmatpush1.bf16.msra.mxu1 %v5266_v51  ;;  %v5276_v46 = vld [vmem:[#allocation78_spill] sm:$0xff] }
 0x218   :  { %1351 = vmatprep.subr.bf16.mxu0 %v5267_v52  ;;  %1392 = vmatprep.subr.bf16.mxu1 %v5268_v53 }
 0x21b   :  { %1352 = vmatpush1.bf16.msra.mxu0 %v5269_v54  ;;  %1393 = vmatpush1.bf16.msra.mxu1 %v5270_v59 }
 0x21c   :  { %1353 = vmatprep.subr.bf16.mxu0 %v5271_v33  ;;  %1394 = vmatprep.subr.bf16.mxu1 %v5272_v38  ;;  %v1067_v33 = vld [vmem:[#allocation4 + $0x28] sm:$0xff] }
 0x21d   :  { %v1072_v38 = vunpack.c.l.bf16 %v1067_v33 }
 0x21f   :  { %1354 = vmatpush1.bf16.msra.mxu0 %v5273_v43  ;;  %1395 = vmatpush1.bf16.msra.mxu1 %v5274_v44  ;;  %v1073_v43 = vunpack.c.h.bf16 %v1067_v33 }
 0x220   :  { %1405 = vmatprep.subr.bf16.mxu0 %v5275_v45  ;;  %1446 = vmatprep.subr.bf16.mxu1 %v5276_v46 }
 0x275   :  { %v1112_v51 = vpop.f32.mrb[8].mxu0  ;;  %v1153_v52 = vpop.f32.mrb[8].mxu1 }
 0x276   :  { %v1114_v37 = vpop.f32.mrb[9].mxu0  ;;  %v1155_v53 = vpop.f32.mrb[9].mxu1  ;;  %v1113_v27 = vadd.f32 %v1112_v51, %v1070_v29  ;;  %v1154_v44 = vadd.f32 %v1153_v52, %v1072_v38 }
 0x277   :  { %v1116_v36 = vpop.f32.mrb[10].mxu0  ;;  %v1157_v54 = vpop.f32.mrb[10].mxu1  ;;  %v1115_v22 = vadd.f32 %v1114_v37, %v1071_v28  ;;  %v1156_v45 = vadd.f32 %v1155_v53, %v1073_v43  ;;  %v1076_v28 = vunpack.c.l.bf16 %v1069_v15  ;;  %v1077_v43 = vunpack.c.h.bf16 %v1069_v15 }
 0x278   :  { %v1117_v35 = vpop.f32.mrb[11].mxu0  ;;  %v1158_v59 = vpop.f32.mrb[11].mxu1  ;;  %v2927_v21 = vmul.f32 -1.442695, %v1113_v27  ;;  %v2929_v46 = vmul.f32 -1.442695, %v1154_v44 }
 0x279   :  { %v2928_v20 = vmul.f32 -1.442695, %v1115_v22  ;;  %v2930_v19 = vmul.f32 -1.442695, %v1156_v45  ;;  %v1068_v59 = vld [vmem:[#allocation4 + $0x30] sm:$0xff] }
 0x27a   :  { %3024 = vpow2.f32 %v2927_v21  ;;  %v1074_v38 = vunpack.c.l.bf16 %v1068_v59  ;;  %v1075_v27 = vunpack.c.h.bf16 %v1068_v59 }
 0x27b   :  { %3026 = vpow2.f32 %v2929_v46 }
 0x27c   :  { %3028 = vpow2.f32 %v2928_v20 }
 0x27d   :  { %3030 = vpow2.f32 %v2930_v19 }
 0x284   :  { %v3025_v35 = vpop.eup %3024 }
 0x285   :  { %v3027_v36 = vpop.eup %3026  ;;  %v1248_v30 = vadd.f32 1.0, %v3025_v35 }
 0x286   :  { %v3029_v54 = vpop.eup %3028  ;;  %v1260_v33 = vadd.f32 1.0, %v3027_v36 }
 0x287   :  { %v3031_v11 = vpop.eup %3030  ;;  %v1249_v29 = vadd.f32 1.0, %v3029_v54  ;;  %3032 = vrcp.f32 %v1248_v30 }
 0x288   :  { %v1261_v37 = vadd.f32 1.0, %v3031_v11  ;;  %3034 = vrcp.f32 %v1260_v33 }
 0x289   :  { %3036 = vrcp.f32 %v1249_v29 }
 0x28a   :  { %3038 = vrcp.f32 %v1261_v37 }
 0x291   :  { %v3033_v54 = vpop.eup %3032 }
 0x292   :  { %v3035_v59 = vpop.eup %3034 }
 0x293   :  { %v3037_v30 = vpop.eup %3036 }
 0x294   :  { %v3039_v33 = vpop.eup %3038 }
 0x2b5   :  { %v1194_v21 = vpop.f32.mrb[12].mxu0  ;;  %v1235_v22 = vpop.f32.mrb[12].mxu1 }
 0x2b6   :  { %v1195_v19 = vadd.f32 %v1194_v21, %v1074_v38  ;;  %v1236_v20 = vadd.f32 %v1235_v22, %v1076_v28  ;;  %v1196_v44 = vpop.f32.mrb[13].mxu0  ;;  %v1237_v45 = vpop.f32.mrb[13].mxu1  ;;  %v1280_v28 = vmul.f32 %v3035_v59, %v3825_v8  ;;  %v5279_v59 = vld [vmem:[#allocation91_spill] sm:$0xff] }
 0x2b7   :  { %v1197_v46 = vadd.f32 %v1196_v44, %v1075_v27  ;;  %v1238_v51 = vadd.f32 %v1237_v45, %v1077_v43  ;;  %v1198_v52 = vpop.f32.mrb[14].mxu0  ;;  %v1239_v53 = vpop.f32.mrb[14].mxu1  ;;  %v1281_v43 = vmul.f32 %v3039_v33, %v3827_v41  ;;  %v5281_v33 = vld [vmem:[#allocation93_spill] sm:$0xff] }
 0x2b8   :  { %3040 = vtanh.f32 %v1195_v19  ;;  %v2931_v35 = vmul.f32 -1.442695, %v1236_v20  ;;  %v1199_v36 = vpop.f32.mrb[15].mxu0  ;;  %v1240_v11 = vpop.f32.mrb[15].mxu1 }
 0x2b9   :  { %3042 = vtanh.f32 %v1197_v46  ;;  %v2932_v15 = vmul.f32 -1.442695, %v1238_v51 }
 0x2ba   :  { %3044 = vpow2.f32 %v2931_v35 }
 0x2bb   :  { %3046 = vpow2.f32 %v2932_v15  ;;  %v5277_v15 = vld [vmem:[#allocation89_spill] sm:$0xff] }
 0x2c2   :  { %v3041_v29 = vpop.eup %3040 }
 0x2c3   :  { %v3043_v38 = vpop.eup %3042  ;;  %v1282_v37 = vmul.f32 %v3041_v29, %v3033_v54  ;;  %v5278_v54 = vld [vmem:[#allocation90_spill] sm:$0xff] }
 0x2c4   :  { %v3045_v27 = vpop.eup %3044  ;;  %v1283_v21 = vmul.f32 %v3043_v38, %v3037_v30  ;;  %v5280_v30 = vld [vmem:[#allocation92_spill] sm:$0xff]  ;;  %v5282_v29 = vld [vmem:[#allocation94_spill] sm:$0xff]  ;;  %v5283_v38 = vld [vmem:[#allocation95_spill] sm:$0xff] }
 0x2c5   :  { %v3047_v22 = vpop.eup %3046  ;;  %v3967_v19 = vadd.f32 %v1282_v37, %v1280_v28  ;;  %v1274_v20 = vadd.f32 1.0, %v3045_v27  ;;  %v5284_v28 = vld [vmem:[#allocation96_spill] sm:$0xff]  ;;  %v5285_v37 = vld [vmem:[#allocation97_spill] sm:$0xff]  ;;  %v5286_v27 = vld [vmem:[#allocation98_spill] sm:$0xff] }
 0x2c6   :  { %v3969_v44 = vadd.f32 %v1283_v21, %v1281_v43  ;;  %v1275_v45 = vadd.f32 1.0, %v3047_v22  ;;  %v5287_v43 = vld [vmem:[#allocation99_spill] sm:$0xff]  ;;  %v5288_v21 = vld [vmem:[#allocation100_spill] sm:$0xff]  ;;  %v5289_v22 = vld [vmem:[#allocation101_spill] sm:$0xff] }
 0x2c7   :  { %3048 = vtanh.f32 %v3967_v19 }
 0x2c8   :  { %3050 = vrcp.f32 %v1274_v20  ;;  %v5290_v20 = vld [vmem:[#allocation102_spill] sm:$0xff] }
 0x2c9   :  { %3052 = vtanh.f32 %v3969_v44 }
 0x2ca   :  { %3054 = vrcp.f32 %v1275_v45  ;;  %v5291_v45 = vld [vmem:[#allocation103_spill] sm:$0xff] }
 0x2d1   :  { %v3049_v46 = vpop.eup %3048 }
 0x2d2   :  { %v3051_v8 = vpop.eup %3050 }
 0x2d3   :  { %v3053_v51 = vpop.eup %3052  ;;  %v1288_v52 = vmul.f32 %v3051_v8, %v3049_v46  ;;  %v5292_v46 = vld [vmem:[#allocation104_spill] sm:$0xff]  ;;  %v5293_v8 = vld [vmem:[#allocation105_spill] sm:$0xff] }
 0x2d4   :  { %v3055_v53 = vpop.eup %3054 }
 0x2d5   :  { %v1289_v41 = vmul.f32 %v3055_v53, %v3053_v51  ;;  %v3973_v11 = vpack.c.bf16 %v1288_v52, %v1288_v52  ;;  %v5294_v51 = vld [vmem:[#allocation106_spill] sm:$0xff]  ;;  %v5296_v53 = vld [vmem:[#allocation108_spill] sm:$0xff] }
 0x2d7   :  { %v1309_v35 = vpack.c.bf16 %v1289_v41, %v1289_v41  ;;  %v2977_v36 = vpack.c.bf16 %v1289_v41, %v1288_v52  ;;  %v5295_v52 = vld [vmem:[#allocation107_spill] sm:$0xff]  ;;  %v5297_v41 = vld [vmem:[#allocation109_spill] sm:$0xff] }
 0x2d9   :  { %1355 = vmatprep.mubr.bf16.mxu0 %v1309_v35  ;;  %1396 = vmatprep.mubr.bf16.mxu1 %v1309_v35  ;;  %1299 = vst [vmem:[#allocation9 + $0x8] sm:$0xff] %v2977_v36  ;;  %v5299_v36 = vld [vmem:[#allocation111_spill] sm:$0xff] }
 0x2da   :  { %1356 = vmatmul.mubr.bf16.vlgmr.msra.gmra.mrb[16].mxu0 %v3973_v11  ;;  %1397 = vmatmul.mubr.bf16.vlgmr.msra.gmra.mrb[16].mxu1 %v3973_v11 }
 0x2db   :  { %1406 = vmatpush1.bf16.msra.mxu0 %v5189_v42  ;;  %1447 = vmatpush1.bf16.msra.mxu1 %v5190_v24 }
 0x2dc   :  { %1437 = vmatprep.mubr.bf16.mxu0 %v1309_v35  ;;  %1478 = vmatprep.mubr.bf16.mxu1 %v1309_v35  ;;  %v5298_v35 = vld [vmem:[#allocation110_spill] sm:$0xff] }
 0x2dd   :  { %1407 = vmatprep.subr.bf16.mxu0 %v5191_v47  ;;  %1448 = vmatprep.subr.bf16.mxu1 %v5192_v23 }
 0x2df   :  { %1408 = vmatpush1.bf16.msra.mxu0 %v5193_v3  ;;  %1449 = vmatpush1.bf16.msra.mxu1 %v5194_v18 }
 0x2e0   :  { %1409 = vmatprep.subr.bf16.mxu0 %v5195_v39  ;;  %1450 = vmatprep.subr.bf16.mxu1 %v5196_v12 }
 0x2e3   :  { %1410 = vmatpush1.bf16.msra.mxu0 %v5197_v7  ;;  %1451 = vmatpush1.bf16.msra.mxu1 %v5198_v5 }
 0x2e4   :  { %1411 = vmatprep.subr.bf16.mxu0 %v5277_v15  ;;  %1452 = vmatprep.subr.bf16.mxu1 %v5278_v54 }
 0x2e7   :  { %1412 = vmatpush1.bf16.msra.mxu0 %v5279_v59  ;;  %1453 = vmatpush1.bf16.msra.mxu1 %v5280_v30 }
 0x2e8   :  { %1413 = vmatprep.subr.bf16.mxu0 %v5281_v33  ;;  %1454 = vmatprep.subr.bf16.mxu1 %v5282_v29 }
 0x2eb   :  { %1414 = vmatpush1.bf16.msra.mxu0 %v5283_v38  ;;  %1455 = vmatpush1.bf16.msra.mxu1 %v5284_v28 }
 0x2ec   :  { %1415 = vmatprep.subr.bf16.mxu0 %v5285_v37  ;;  %1456 = vmatprep.subr.bf16.mxu1 %v5286_v27 }
 0x2ef   :  { %1416 = vmatpush1.bf16.msra.mxu0 %v5287_v43  ;;  %1457 = vmatpush1.bf16.msra.mxu1 %v5288_v21 }
 0x2f0   :  { %1417 = vmatprep.subr.bf16.mxu0 %v5289_v22  ;;  %1458 = vmatprep.subr.bf16.mxu1 %v5290_v20  ;;  %v5300_v22 = vld [vmem:[#allocation112_spill] sm:$0xff]  ;;  %v5301_v20 = vld [vmem:[#allocation113_spill] sm:$0xff] }
 0x2f3   :  { %1418 = vmatpush1.bf16.msra.mxu0 %v5291_v45  ;;  %1459 = vmatpush1.bf16.msra.mxu1 %v5292_v46  ;;  %v5302_v45 = vld [vmem:[#allocation114_spill] sm:$0xff]  ;;  %v5303_v46 = vld [vmem:[#allocation115_spill] sm:$0xff] }
 0x2f4   :  { %1419 = vmatprep.subr.bf16.mxu0 %v5293_v8  ;;  %1460 = vmatprep.subr.bf16.mxu1 %v5294_v51 }
 0x2f7   :  { %1420 = vmatpush1.bf16.msra.mxu0 %v5295_v52  ;;  %1461 = vmatpush1.bf16.msra.mxu1 %v5296_v53  ;;  %v5304_v53 = vld [vmem:[#allocation119_spill] sm:$0xff] }
 0x2f8   :  { %1421 = vmatprep.subr.bf16.mxu0 %v5297_v41  ;;  %1462 = vmatprep.subr.bf16.mxu1 %v5298_v35 }
 0x2fb   :  { %1422 = vmatpush1.bf16.msra.mxu0 %v5299_v36  ;;  %1463 = vmatpush1.bf16.msra.mxu1 %v5300_v22 }
 0x2fc   :  { %1423 = vmatprep.subr.bf16.mxu0 %v5301_v20  ;;  %1464 = vmatprep.subr.bf16.mxu1 %v5302_v45 }
 0x2ff   :  { %1424 = vmatpush1.bf16.msra.mxu0 %v5303_v46  ;;  %1465 = vmatpush1.bf16.msra.mxu1 %v5226_v16 }
 0x300   :  { %1425 = vmatprep.subr.bf16.mxu0 %v5227_v48  ;;  %1466 = vmatprep.subr.bf16.mxu1 %v5228_v25 }
 0x303   :  { %1426 = vmatpush1.bf16.msra.mxu0 %v5304_v53  ;;  %1467 = vmatpush1.bf16.msra.mxu1 %v5230_v34 }
 0x304   :  { %1427 = vmatprep.subr.bf16.mxu0 %v5231_v60  ;;  %1468 = vmatprep.subr.bf16.mxu1 %v5232_v62 }
 0x307   :  { %1428 = vmatpush1.bf16.msra.mxu0 %v5233_v40  ;;  %1469 = vmatpush1.bf16.msra.mxu1 %v5234_v50  ;;  %v1314_v40 = vld [vmem:[#allocation4 + $0x58] sm:$0xff] }
 0x308   :  { %1429 = vmatprep.subr.bf16.mxu0 %v5235_v26  ;;  %1470 = vmatprep.subr.bf16.mxu1 %v5236_v13 }
 0x30b   :  { %1430 = vmatpush1.bf16.msra.mxu0 %v3712_v58  ;;  %1471 = vmatpush1.bf16.msra.mxu1 %v3716_v63 }
 0x30c   :  { %1431 = vmatprep.subr.bf16.mxu0 %v3718_v1  ;;  %1472 = vmatprep.subr.bf16.mxu1 %v5237_v61 }
 0x30f   :  { %1432 = vmatpush1.bf16.msra.mxu0 %v3724_v17  ;;  %1473 = vmatpush1.bf16.msra.mxu1 %v3728_v32  ;;  %v1311_v17 = vld [vmem:[#allocation4 + $0x40] sm:$0xff] }
 0x310   :  { %1433 = vmatprep.subr.bf16.mxu0 %v3730_v31  ;;  %1474 = vmatprep.subr.bf16.mxu1 %v3733_v0  ;;  %v1315_v61 = vunpack.c.l.bf16 %v1311_v17  ;;  %v1316_v1 = vunpack.c.h.bf16 %v1311_v17 }
 0x313   :  { %1434 = vmatpush1.bf16.msra.mxu0 %v3736_v56  ;;  %1475 = vmatpush1.bf16.msra.mxu1 %v3740_v49  ;;  %v5305_v49 = vld [vmem:[#allocation17_spill] sm:$0xff]  ;;  %v5312_v56 = vld [vmem:[#allocation24_spill] sm:$0xff] }
 0x314   :  { %1435 = vmatprep.subr.bf16.mxu0 %v3742_v57  ;;  %1476 = vmatprep.subr.bf16.mxu1 %v3745_v14  ;;  %v5306_v57 = vld [vmem:[#allocation18_spill] sm:$0xff]  ;;  %v5307_v14 = vld [vmem:[#allocation19_spill] sm:$0xff] }
 0x317   :  { %1436 = vmatpush1.bf16.msra.mxu0 %v3748_v2  ;;  %1477 = vmatpush1.bf16.msra.mxu1 %v3752_v55  ;;  %v5308_v2 = vld [vmem:[#allocation20_spill] sm:$0xff]  ;;  %v5309_v55 = vld [vmem:[#allocation21_spill] sm:$0xff] }
 0x318   :  { %1568 = vmatprep.subr.bf16.mxu0 %v3369_v4  ;;  %1609 = vmatprep.subr.bf16.mxu1 %v3373_v9  ;;  %v5310_v4 = vld [vmem:[#allocation22_spill] sm:$0xff]  ;;  %v5311_v9 = vld [vmem:[#allocation23_spill] sm:$0xff] }
 0x31a   :  { %1438 = vmatmul.mubr.bf16.vlgmr.msra.gmra.mrb[20].mxu0 %v3973_v11  ;;  %1479 = vmatmul.mubr.bf16.vlgmr.msra.gmra.mrb[20].mxu1 %v3973_v11  ;;  %v5313_v11 = vld [vmem:[#allocation25_spill] sm:$0xff] }
 0x31b   :  { %1569 = vmatpush1.bf16.msra.mxu0 %v3371_v6  ;;  %1610 = vmatpush1.bf16.msra.mxu1 %v3375_v10  ;;  %v5314_v6 = vld [vmem:[#allocation26_spill] sm:$0xff]  ;;  %v5315_v10 = vld [vmem:[#allocation27_spill] sm:$0xff] }
 0x31c   :  { %1570 = vmatprep.subr.bf16.mxu0 %v5305_v49  ;;  %1611 = vmatprep.subr.bf16.mxu1 %v5306_v57  ;;  %v5316_v49 = vld [vmem:[#allocation28_spill] sm:$0xff]  ;;  %v5317_v57 = vld [vmem:[#allocation29_spill] sm:$0xff] }
 0x31f   :  { %1571 = vmatpush1.bf16.msra.mxu0 %v5307_v14  ;;  %1612 = vmatpush1.bf16.msra.mxu1 %v5308_v2  ;;  %v5318_v14 = vld [vmem:[#allocation30_spill] sm:$0xff]  ;;  %v5319_v2 = vld [vmem:[#allocation31_spill] sm:$0xff] }
 0x320   :  { %1572 = vmatprep.subr.bf16.mxu0 %v5309_v55  ;;  %1613 = vmatprep.subr.bf16.mxu1 %v5310_v4  ;;  %v5320_v55 = vld [vmem:[#allocation32_spill] sm:$0xff]  ;;  %v5321_v4 = vld [vmem:[#allocation33_spill] sm:$0xff] }
 0x323   :  { %1573 = vmatpush1.bf16.msra.mxu0 %v5311_v9  ;;  %1614 = vmatpush1.bf16.msra.mxu1 %v5312_v56  ;;  %v5322_v9 = vld [vmem:[#allocation34_spill] sm:$0xff]  ;;  %v5323_v56 = vld [vmem:[#allocation35_spill] sm:$0xff] }
 0x324   :  { %1574 = vmatprep.subr.bf16.mxu0 %v5313_v11  ;;  %1615 = vmatprep.subr.bf16.mxu1 %v5314_v6  ;;  %v5324_v11 = vld [vmem:[#allocation36_spill] sm:$0xff]  ;;  %v5325_v6 = vld [vmem:[#allocation37_spill] sm:$0xff] }
 0x327   :  { %1575 = vmatpush1.bf16.msra.mxu0 %v5315_v10  ;;  %1616 = vmatpush1.bf16.msra.mxu1 %v5316_v49  ;;  %v5326_v10 = vld [vmem:[#allocation38_spill] sm:$0xff]  ;;  %v5327_v49 = vld [vmem:[#allocation39_spill] sm:$0xff] }
 0x328   :  { %1576 = vmatprep.subr.bf16.mxu0 %v5317_v57  ;;  %1617 = vmatprep.subr.bf16.mxu1 %v5318_v14  ;;  %v5328_v57 = vld [vmem:[#allocation40_spill] sm:$0xff]  ;;  %v5329_v14 = vld [vmem:[#allocation41_spill] sm:$0xff] }
 0x32b   :  { %1577 = vmatpush1.bf16.msra.mxu0 %v5319_v2  ;;  %1618 = vmatpush1.bf16.msra.mxu1 %v5320_v55  ;;  %v5330_v2 = vld [vmem:[#allocation42_spill] sm:$0xff]  ;;  %v5331_v55 = vld [vmem:[#allocation43_spill] sm:$0xff] }
 0x32c   :  { %1578 = vmatprep.subr.bf16.mxu0 %v5321_v4  ;;  %1619 = vmatprep.subr.bf16.mxu1 %v5322_v9  ;;  %v5332_v4 = vld [vmem:[#allocation44_spill] sm:$0xff]  ;;  %v5333_v9 = vld [vmem:[#allocation45_spill] sm:$0xff] }
 0x32f   :  { %1579 = vmatpush1.bf16.msra.mxu0 %v5323_v56  ;;  %1620 = vmatpush1.bf16.msra.mxu1 %v5324_v11  ;;  %v5334_v56 = vld [vmem:[#allocation46_spill] sm:$0xff]  ;;  %v5335_v11 = vld [vmem:[#allocation47_spill] sm:$0xff] }
 0x330   :  { %1580 = vmatprep.subr.bf16.mxu0 %v5325_v6  ;;  %1621 = vmatprep.subr.bf16.mxu1 %v5326_v10  ;;  %v5336_v6 = vld [vmem:[#allocation48_spill] sm:$0xff]  ;;  %v5337_v10 = vld [vmem:[#allocation49_spill] sm:$0xff] }
 0x333   :  { %1581 = vmatpush1.bf16.msra.mxu0 %v5327_v49  ;;  %1622 = vmatpush1.bf16.msra.mxu1 %v5328_v57  ;;  %v5338_v49 = vld [vmem:[#allocation50_spill] sm:$0xff]  ;;  %v5339_v57 = vld [vmem:[#allocation51_spill] sm:$0xff] }
 0x334   :  { %1582 = vmatprep.subr.bf16.mxu0 %v5329_v14  ;;  %1623 = vmatprep.subr.bf16.mxu1 %v5330_v2  ;;  %v5340_v14 = vld [vmem:[#allocation52_spill] sm:$0xff]  ;;  %v5341_v2 = vld [vmem:[#allocation53_spill] sm:$0xff] }
 0x337   :  { %1583 = vmatpush1.bf16.msra.mxu0 %v5331_v55  ;;  %1624 = vmatpush1.bf16.msra.mxu1 %v5332_v4  ;;  %v5342_v55 = vld [vmem:[#allocation54_spill] sm:$0xff]  ;;  %v5343_v4 = vld [vmem:[#allocation55_spill] sm:$0xff] }
 0x338   :  { %1584 = vmatprep.subr.bf16.mxu0 %v5333_v9  ;;  %1625 = vmatprep.subr.bf16.mxu1 %v5334_v56  ;;  %v5344_v9 = vld [vmem:[#allocation56_spill] sm:$0xff]  ;;  %v5345_v56 = vld [vmem:[#allocation57_spill] sm:$0xff] }
 0x33b   :  { %1585 = vmatpush1.bf16.msra.mxu0 %v5335_v11  ;;  %1626 = vmatpush1.bf16.msra.mxu1 %v5336_v6  ;;  %v5346_v11 = vld [vmem:[#allocation58_spill] sm:$0xff]  ;;  %v5347_v6 = vld [vmem:[#allocation59_spill] sm:$0xff] }
 0x33c   :  { %1586 = vmatprep.subr.bf16.mxu0 %v5337_v10  ;;  %1627 = vmatprep.subr.bf16.mxu1 %v5338_v49  ;;  %v5348_v10 = vld [vmem:[#allocation60_spill] sm:$0xff]  ;;  %v5349_v49 = vld [vmem:[#allocation61_spill] sm:$0xff] }
 0x33f   :  { %1587 = vmatpush1.bf16.msra.mxu0 %v5339_v57  ;;  %1628 = vmatpush1.bf16.msra.mxu1 %v5340_v14  ;;  %v5350_v57 = vld [vmem:[#allocation62_spill] sm:$0xff]  ;;  %v5351_v14 = vld [vmem:[#allocation63_spill] sm:$0xff] }
 0x340   :  { %1588 = vmatprep.subr.bf16.mxu0 %v5341_v2  ;;  %1629 = vmatprep.subr.bf16.mxu1 %v5342_v55  ;;  %v5352_v2 = vld [vmem:[#allocation64_spill] sm:$0xff]  ;;  %v5353_v55 = vld [vmem:[#allocation65_spill] sm:$0xff] }
 0x343   :  { %1589 = vmatpush1.bf16.msra.mxu0 %v5343_v4  ;;  %1630 = vmatpush1.bf16.msra.mxu1 %v5344_v9  ;;  %v5354_v4 = vld [vmem:[#allocation66_spill] sm:$0xff]  ;;  %v5355_v9 = vld [vmem:[#allocation67_spill] sm:$0xff] }
 0x344   :  { %1590 = vmatprep.subr.bf16.mxu0 %v5345_v56  ;;  %1631 = vmatprep.subr.bf16.mxu1 %v5346_v11  ;;  %v5356_v56 = vld [vmem:[#allocation68_spill] sm:$0xff]  ;;  %v5357_v11 = vld [vmem:[#allocation69_spill] sm:$0xff] }
 0x347   :  { %1591 = vmatpush1.bf16.msra.mxu0 %v5347_v6  ;;  %1632 = vmatpush1.bf16.msra.mxu1 %v5348_v10  ;;  %v5358_v6 = vld [vmem:[#allocation70_spill] sm:$0xff]  ;;  %v5359_v10 = vld [vmem:[#allocation71_spill] sm:$0xff] }
 0x348   :  { %1592 = vmatprep.subr.bf16.mxu0 %v5349_v49  ;;  %1633 = vmatprep.subr.bf16.mxu1 %v5350_v57  ;;  %v5360_v49 = vld [vmem:[#allocation72_spill] sm:$0xff]  ;;  %v5361_v57 = vld [vmem:[#allocation73_spill] sm:$0xff] }
 0x34b   :  { %1593 = vmatpush1.bf16.msra.mxu0 %v5351_v14  ;;  %1634 = vmatpush1.bf16.msra.mxu1 %v5352_v2  ;;  %v5362_v14 = vld [vmem:[#allocation74_spill] sm:$0xff]  ;;  %v5363_v2 = vld [vmem:[#allocation75_spill] sm:$0xff] }
 0x34c   :  { %1594 = vmatprep.subr.bf16.mxu0 %v5353_v55  ;;  %1635 = vmatprep.subr.bf16.mxu1 %v5354_v4  ;;  %v5364_v55 = vld [vmem:[#allocation76_spill] sm:$0xff]  ;;  %v5365_v4 = vld [vmem:[#allocation77_spill] sm:$0xff] }
 0x34f   :  { %1595 = vmatpush1.bf16.msra.mxu0 %v5355_v9  ;;  %1636 = vmatpush1.bf16.msra.mxu1 %v5356_v56  ;;  %v5366_v9 = vld [vmem:[#allocation78_spill] sm:$0xff] }
 0x350   :  { %1596 = vmatprep.subr.bf16.mxu0 %v5357_v11  ;;  %1637 = vmatprep.subr.bf16.mxu1 %v5358_v6 }
 0x353   :  { %1597 = vmatpush1.bf16.msra.mxu0 %v5359_v10  ;;  %1638 = vmatpush1.bf16.msra.mxu1 %v5360_v49 }
 0x354   :  { %1598 = vmatprep.subr.bf16.mxu0 %v5361_v57  ;;  %1639 = vmatprep.subr.bf16.mxu1 %v5362_v14  ;;  %v1312_v57 = vld [vmem:[#allocation4 + $0x48] sm:$0xff] }
 0x355   :  { %v1317_v14 = vunpack.c.l.bf16 %v1312_v57 }
 0x357   :  { %1599 = vmatpush1.bf16.msra.mxu0 %v5363_v2  ;;  %1640 = vmatpush1.bf16.msra.mxu1 %v5364_v55  ;;  %v1318_v2 = vunpack.c.h.bf16 %v1312_v57 }
 0x358   :  { %1650 = vmatprep.subr.bf16.mxu0 %v5365_v4  ;;  %1691 = vmatprep.subr.bf16.mxu1 %v5366_v9 }
 0x3ad   :  { %v1357_v56 = vpop.f32.mrb[16].mxu0  ;;  %v1398_v11 = vpop.f32.mrb[16].mxu1 }
 0x3ae   :  { %v1359_v0 = vpop.f32.mrb[17].mxu0  ;;  %v1400_v6 = vpop.f32.mrb[17].mxu1  ;;  %v1358_v63 = vadd.f32 %v1357_v56, %v1315_v61  ;;  %v1399_v55 = vadd.f32 %v1398_v11, %v1317_v14 }
 0x3af   :  { %v1361_v31 = vpop.f32.mrb[18].mxu0  ;;  %v1402_v10 = vpop.f32.mrb[18].mxu1  ;;  %v1360_v58 = vadd.f32 %v1359_v0, %v1316_v1  ;;  %v1401_v4 = vadd.f32 %v1400_v6, %v1318_v2  ;;  %v1321_v1 = vunpack.c.l.bf16 %v1314_v40  ;;  %v1322_v2 = vunpack.c.h.bf16 %v1314_v40 }
 0x3b0   :  { %v1362_v32 = vpop.f32.mrb[19].mxu0  ;;  %v1403_v49 = vpop.f32.mrb[19].mxu1  ;;  %v2934_v13 = vmul.f32 -1.442695, %v1358_v63  ;;  %v2936_v9 = vmul.f32 -1.442695, %v1399_v55 }
 0x3b1   :  { %v2935_v26 = vmul.f32 -1.442695, %v1360_v58  ;;  %v2937_v50 = vmul.f32 -1.442695, %v1401_v4  ;;  %v1313_v49 = vld [vmem:[#allocation4 + $0x50] sm:$0xff] }
 0x3b2   :  { %3056 = vpow2.f32 %v2934_v13  ;;  %v1319_v14 = vunpack.c.l.bf16 %v1313_v49  ;;  %v1320_v63 = vunpack.c.h.bf16 %v1313_v49 }
 0x3b3   :  { %3058 = vpow2.f32 %v2936_v9 }
 0x3b4   :  { %3060 = vpow2.f32 %v2935_v26 }
 0x3b5   :  { %3062 = vpow2.f32 %v2937_v50 }
 0x3bc   :  { %v3057_v10 = vpop.eup %3056 }
 0x3bd   :  { %v3059_v32 = vpop.eup %3058  ;;  %v1493_v17 = vadd.f32 1.0, %v3057_v10 }
 0x3be   :  { %v3061_v31 = vpop.eup %3060  ;;  %v1505_v57 = vadd.f32 1.0, %v3059_v32 }
 0x3bf   :  { %v3063_v62 = vpop.eup %3062  ;;  %v1494_v56 = vadd.f32 1.0, %v3061_v31  ;;  %3064 = vrcp.f32 %v1493_v17 }
 0x3c0   :  { %v1506_v6 = vadd.f32 1.0, %v3063_v62  ;;  %3066 = vrcp.f32 %v1505_v57 }
 0x3c1   :  { %3068 = vrcp.f32 %v1494_v56 }
 0x3c2   :  { %3070 = vrcp.f32 %v1506_v6 }
 0x3c9   :  { %v3065_v31 = vpop.eup %3064 }
 0x3ca   :  { %v3067_v49 = vpop.eup %3066 }
 0x3cb   :  { %v3069_v17 = vpop.eup %3068 }
 0x3cc   :  { %v3071_v57 = vpop.eup %3070 }
 0x3ed   :  { %v1439_v4 = vpop.f32.mrb[20].mxu0  ;;  %v1480_v9 = vpop.f32.mrb[20].mxu1 }
 0x3ee   :  { %v1440_v58 = vadd.f32 %v1439_v4, %v1319_v14  ;;  %v1481_v0 = vadd.f32 %v1480_v9, %v1321_v1  ;;  %v1441_v55 = vpop.f32.mrb[21].mxu0  ;;  %v1482_v50 = vpop.f32.mrb[21].mxu1  ;;  %v1525_v1 = vmul.f32 %v3067_v49, %v3967_v19  ;;  %v5369_v49 = vld [vmem:[#allocation103_spill] sm:$0xff] }
 0x3ef   :  { %v1442_v26 = vadd.f32 %v1441_v55, %v1320_v63  ;;  %v1483_v13 = vadd.f32 %v1482_v50, %v1322_v2  ;;  %v1443_v61 = vpop.f32.mrb[22].mxu0  ;;  %v1484_v11 = vpop.f32.mrb[22].mxu1  ;;  %v1526_v2 = vmul.f32 %v3071_v57, %v3969_v44  ;;  %v5371_v57 = vld [vmem:[#allocation108_spill] sm:$0xff] }
 0x3f0   :  { %3072 = vtanh.f32 %v1440_v58  ;;  %v2938_v10 = vmul.f32 -1.442695, %v1481_v0  ;;  %v1444_v32 = vpop.f32.mrb[23].mxu0  ;;  %v1485_v62 = vpop.f32.mrb[23].mxu1 }
 0x3f1   :  { %3074 = vtanh.f32 %v1442_v26  ;;  %v2939_v40 = vmul.f32 -1.442695, %v1483_v13 }
 0x3f2   :  { %3076 = vpow2.f32 %v2938_v10 }
 0x3f3   :  { %3078 = vpow2.f32 %v2939_v40  ;;  %v5367_v40 = vld [vmem:[#allocation101_spill] sm:$0xff] }
 0x3fa   :  { %v3073_v56 = vpop.eup %3072 }
 0x3fb   :  { %v3075_v14 = vpop.eup %3074  ;;  %v1527_v6 = vmul.f32 %v3073_v56, %v3065_v31  ;;  %v5368_v31 = vld [vmem:[#allocation102_spill] sm:$0xff] }
 0x3fc   :  { %v3077_v63 = vpop.eup %3076  ;;  %v1528_v4 = vmul.f32 %v3075_v14, %v3069_v17  ;;  %v5370_v17 = vld [vmem:[#allocation104_spill] sm:$0xff]  ;;  %v5372_v56 = vld [vmem:[#allocation122_spill] sm:$0xff]  ;;  %v5373_v14 = vld [vmem:[#allocation123_spill] sm:$0xff] }
 0x3fd   :  { %v3079_v9 = vpop.eup %3078  ;;  %v4109_v58 = vadd.f32 %v1527_v6, %v1525_v1  ;;  %v1519_v0 = vadd.f32 1.0, %v3077_v63  ;;  %v5374_v1 = vld [vmem:[#allocation124_spill] sm:$0xff]  ;;  %v5375_v6 = vld [vmem:[#allocation125_spill] sm:$0xff]  ;;  %v5376_v63 = vld [vmem:[#allocation126_spill] sm:$0xff] }
 0x3fe   :  { %v4111_v55 = vadd.f32 %v1528_v4, %v1526_v2  ;;  %v1520_v50 = vadd.f32 1.0, %v3079_v9  ;;  %v5377_v2 = vld [vmem:[#allocation127_spill] sm:$0xff]  ;;  %v5378_v4 = vld [vmem:[#allocation128_spill] sm:$0xff]  ;;  %v5379_v9 = vld [vmem:[#allocation129_spill] sm:$0xff] }
 0x3ff   :  { %3080 = vtanh.f32 %v4109_v58 }
 0x400   :  { %3082 = vrcp.f32 %v1519_v0  ;;  %v5380_v0 = vld [vmem:[#allocation130_spill] sm:$0xff] }
 0x401   :  { %3084 = vtanh.f32 %v4111_v55 }
 0x402   :  { %3086 = vrcp.f32 %v1520_v50  ;;  %v5381_v50 = vld [vmem:[#allocation131_spill] sm:$0xff] }
 0x409   :  { %v3081_v26 = vpop.eup %3080 }
 0x40a   :  { %v3083_v19 = vpop.eup %3082 }
 0x40b   :  { %v3085_v13 = vpop.eup %3084  ;;  %v1533_v61 = vmul.f32 %v3083_v19, %v3081_v26  ;;  %v5382_v26 = vld [vmem:[#allocation132_spill] sm:$0xff]  ;;  %v5383_v19 = vld [vmem:[#allocation133_spill] sm:$0xff] }
 0x40c   :  { %v3087_v11 = vpop.eup %3086 }
 0x40d   :  { %v1534_v44 = vmul.f32 %v3087_v11, %v3085_v13  ;;  %v4115_v62 = vpack.c.bf16 %v1533_v61, %v1533_v61  ;;  %v5384_v13 = vld [vmem:[#allocation134_spill] sm:$0xff]  ;;  %v5386_v11 = vld [vmem:[#allocation136_spill] sm:$0xff] }
 0x40f   :  { %v1554_v10 = vpack.c.bf16 %v1534_v44, %v1534_v44  ;;  %v2978_v32 = vpack.c.bf16 %v1534_v44, %v1533_v61  ;;  %v5385_v61 = vld [vmem:[#allocation135_spill] sm:$0xff]  ;;  %v5387_v44 = vld [vmem:[#allocation137_spill] sm:$0xff] }
 0x411   :  { %1600 = vmatprep.mubr.bf16.mxu0 %v1554_v10  ;;  %1641 = vmatprep.mubr.bf16.mxu1 %v1554_v10  ;;  %1544 = vst [vmem:[#allocation9 + $0x10] sm:$0xff] %v2978_v32  ;;  %v5389_v32 = vld [vmem:[#allocation139_spill] sm:$0xff] }
 0x412   :  { %1601 = vmatmul.mubr.bf16.vlgmr.msra.gmra.mrb[24].mxu0 %v4115_v62  ;;  %1642 = vmatmul.mubr.bf16.vlgmr.msra.gmra.mrb[24].mxu1 %v4115_v62 }
 0x413   :  { %1651 = vmatpush1.bf16.msra.mxu0 %v5189_v42  ;;  %1692 = vmatpush1.bf16.msra.mxu1 %v5190_v24 }
 0x414   :  { %1682 = vmatprep.mubr.bf16.mxu0 %v1554_v10  ;;  %1723 = vmatprep.mubr.bf16.mxu1 %v1554_v10  ;;  %v5388_v10 = vld [vmem:[#allocation138_spill] sm:$0xff] }
 0x415   :  { %1652 = vmatprep.subr.bf16.mxu0 %v5191_v47  ;;  %1693 = vmatprep.subr.bf16.mxu1 %v5192_v23 }
 0x417   :  { %1653 = vmatpush1.bf16.msra.mxu0 %v5193_v3  ;;  %1694 = vmatpush1.bf16.msra.mxu1 %v5194_v18 }
 0x418   :  { %1654 = vmatprep.subr.bf16.mxu0 %v5195_v39  ;;  %1695 = vmatprep.subr.bf16.mxu1 %v5196_v12 }
 0x41b   :  { %1655 = vmatpush1.bf16.msra.mxu0 %v5197_v7  ;;  %1696 = vmatpush1.bf16.msra.mxu1 %v5198_v5 }
 0x41c   :  { %1656 = vmatprep.subr.bf16.mxu0 %v5277_v15  ;;  %1697 = vmatprep.subr.bf16.mxu1 %v5278_v54 }
 0x41f   :  { %1657 = vmatpush1.bf16.msra.mxu0 %v5279_v59  ;;  %1698 = vmatpush1.bf16.msra.mxu1 %v5280_v30 }
 0x420   :  { %1658 = vmatprep.subr.bf16.mxu0 %v5281_v33  ;;  %1699 = vmatprep.subr.bf16.mxu1 %v5282_v29 }
 0x423   :  { %1659 = vmatpush1.bf16.msra.mxu0 %v5283_v38  ;;  %1700 = vmatpush1.bf16.msra.mxu1 %v5284_v28 }
 0x424   :  { %1660 = vmatprep.subr.bf16.mxu0 %v5285_v37  ;;  %1701 = vmatprep.subr.bf16.mxu1 %v5286_v27 }
 0x427   :  { %1661 = vmatpush1.bf16.msra.mxu0 %v5287_v43  ;;  %1702 = vmatpush1.bf16.msra.mxu1 %v5288_v21 }
 0x428   :  { %1662 = vmatprep.subr.bf16.mxu0 %v5367_v40  ;;  %1703 = vmatprep.subr.bf16.mxu1 %v5368_v31 }
 0x42b   :  { %1663 = vmatpush1.bf16.msra.mxu0 %v5369_v49  ;;  %1704 = vmatpush1.bf16.msra.mxu1 %v5370_v17 }
 0x42c   :  { %1664 = vmatprep.subr.bf16.mxu0 %v5293_v8  ;;  %1705 = vmatprep.subr.bf16.mxu1 %v5294_v51 }
 0x42f   :  { %1665 = vmatpush1.bf16.msra.mxu0 %v5295_v52  ;;  %1706 = vmatpush1.bf16.msra.mxu1 %v5371_v57 }
 0x430   :  { %1666 = vmatprep.subr.bf16.mxu0 %v5297_v41  ;;  %1707 = vmatprep.subr.bf16.mxu1 %v5298_v35 }
 0x433   :  { %1667 = vmatpush1.bf16.msra.mxu0 %v5299_v36  ;;  %1708 = vmatpush1.bf16.msra.mxu1 %v5300_v22 }
 0x434   :  { %1668 = vmatprep.subr.bf16.mxu0 %v5301_v20  ;;  %1709 = vmatprep.subr.bf16.mxu1 %v5302_v45 }
 0x437   :  { %1669 = vmatpush1.bf16.msra.mxu0 %v5303_v46  ;;  %1710 = vmatpush1.bf16.msra.mxu1 %v5226_v16 }
 0x438   :  { %1670 = vmatprep.subr.bf16.mxu0 %v5227_v48  ;;  %1711 = vmatprep.subr.bf16.mxu1 %v5228_v25  ;;  %v1559_v25 = vld [vmem:[#allocation4 + $0x78] sm:$0xff] }
 0x43b   :  { %1671 = vmatpush1.bf16.msra.mxu0 %v5304_v53  ;;  %1712 = vmatpush1.bf16.msra.mxu1 %v5230_v34 }
 0x43c   :  { %1672 = vmatprep.subr.bf16.mxu0 %v5231_v60  ;;  %1713 = vmatprep.subr.bf16.mxu1 %v5372_v56 }
 0x43f   :  { %1673 = vmatpush1.bf16.msra.mxu0 %v5373_v14  ;;  %1714 = vmatpush1.bf16.msra.mxu1 %v5374_v1 }
 0x440   :  { %1674 = vmatprep.subr.bf16.mxu0 %v5375_v6  ;;  %1715 = vmatprep.subr.bf16.mxu1 %v5376_v63  ;;  %v1556_v63 = vld [vmem:[#allocation4 + $0x60] sm:$0xff] }
 0x441   :  { %v1560_v6 = vunpack.c.l.bf16 %v1556_v63  ;;  %v1561_v1 = vunpack.c.h.bf16 %v1556_v63 }
 0x443   :  { %1675 = vmatpush1.bf16.msra.mxu0 %v5377_v2  ;;  %1716 = vmatpush1.bf16.msra.mxu1 %v5378_v4 }
 0x444   :  { %1676 = vmatprep.subr.bf16.mxu0 %v5379_v9  ;;  %1717 = vmatprep.subr.bf16.mxu1 %v5380_v0  ;;  %v5390_v9 = vld [vmem:[#allocation140_spill] sm:$0xff]  ;;  %v5391_v0 = vld [vmem:[#allocation13_spill] sm:$0xff] }
 0x447   :  { %1677 = vmatpush1.bf16.msra.mxu0 %v5381_v50  ;;  %1718 = vmatpush1.bf16.msra.mxu1 %v5382_v26  ;;  %v5392_v50 = vld [vmem:[#allocation15_spill] sm:$0xff] }
 0x448   :  { %1678 = vmatprep.subr.bf16.mxu0 %v5383_v19  ;;  %1719 = vmatprep.subr.bf16.mxu1 %v5384_v13  ;;  %v5393_v13 = vld [vmem:[#allocation14_spill] sm:$0xff]  ;;  %v5402_v19 = vld [vmem:[#allocation24_spill] sm:$0xff] }
 0x44b   :  { %1679 = vmatpush1.bf16.msra.mxu0 %v5385_v61  ;;  %1720 = vmatpush1.bf16.msra.mxu1 %v5386_v11  ;;  %v5394_v61 = vld [vmem:[#allocation16_spill] sm:$0xff]  ;;  %v5395_v11 = vld [vmem:[#allocation17_spill] sm:$0xff] }
 0x44c   :  { %1680 = vmatprep.subr.bf16.mxu0 %v5387_v44  ;;  %1721 = vmatprep.subr.bf16.mxu1 %v5388_v10  ;;  %v5396_v44 = vld [vmem:[#allocation18_spill] sm:$0xff]  ;;  %v5397_v10 = vld [vmem:[#allocation19_spill] sm:$0xff] }
 0x44f   :  { %1681 = vmatpush1.bf16.msra.mxu0 %v5389_v32  ;;  %1722 = vmatpush1.bf16.msra.mxu1 %v5390_v9  ;;  %v5398_v32 = vld [vmem:[#allocation20_spill] sm:$0xff]  ;;  %v5399_v9 = vld [vmem:[#allocation21_spill] sm:$0xff] }
 0x450   :  { %1813 = vmatprep.subr.bf16.mxu0 %v5391_v0  ;;  %1854 = vmatprep.subr.bf16.mxu1 %v5392_v50  ;;  %v5400_v0 = vld [vmem:[#allocation22_spill] sm:$0xff]  ;;  %v5401_v50 = vld [vmem:[#allocation23_spill] sm:$0xff] }
 0x452   :  { %1683 = vmatmul.mubr.bf16.vlgmr.msra.gmra.mrb[28].mxu0 %v4115_v62  ;;  %1724 = vmatmul.mubr.bf16.vlgmr.msra.gmra.mrb[28].mxu1 %v4115_v62  ;;  %v5403_v62 = vld [vmem:[#allocation25_spill] sm:$0xff] }
 0x453   :  { %1814 = vmatpush1.bf16.msra.mxu0 %v5393_v13  ;;  %1855 = vmatpush1.bf16.msra.mxu1 %v5394_v61  ;;  %v5404_v13 = vld [vmem:[#allocation26_spill] sm:$0xff]  ;;  %v5405_v61 = vld [vmem:[#allocation27_spill] sm:$0xff] }
 0x454   :  { %1815 = vmatprep.subr.bf16.mxu0 %v5395_v11  ;;  %1856 = vmatprep.subr.bf16.mxu1 %v5396_v44  ;;  %v5406_v11 = vld [vmem:[#allocation28_spill] sm:$0xff]  ;;  %v5407_v44 = vld [vmem:[#allocation29_spill] sm:$0xff] }
 0x457   :  { %1816 = vmatpush1.bf16.msra.mxu0 %v5397_v10  ;;  %1857 = vmatpush1.bf16.msra.mxu1 %v5398_v32  ;;  %v5408_v10 = vld [vmem:[#allocation30_spill] sm:$0xff]  ;;  %v5409_v32 = vld [vmem:[#allocation31_spill] sm:$0xff] }
 0x458   :  { %1817 = vmatprep.subr.bf16.mxu0 %v5399_v9  ;;  %1858 = vmatprep.subr.bf16.mxu1 %v5400_v0  ;;  %v5410_v9 = vld [vmem:[#allocation32_spill] sm:$0xff]  ;;  %v5411_v0 = vld [vmem:[#allocation33_spill] sm:$0xff] }
 0x45b   :  { %1818 = vmatpush1.bf16.msra.mxu0 %v5401_v50  ;;  %1859 = vmatpush1.bf16.msra.mxu1 %v5402_v19  ;;  %v5412_v50 = vld [vmem:[#allocation34_spill] sm:$0xff]  ;;  %v5413_v19 = vld [vmem:[#allocation35_spill] sm:$0xff] }
 0x45c   :  { %1819 = vmatprep.subr.bf16.mxu0 %v5403_v62  ;;  %1860 = vmatprep.subr.bf16.mxu1 %v5404_v13  ;;  %v5414_v62 = vld [vmem:[#allocation36_spill] sm:$0xff]  ;;  %v5415_v13 = vld [vmem:[#allocation37_spill] sm:$0xff] }
 0x45f   :  { %1820 = vmatpush1.bf16.msra.mxu0 %v5405_v61  ;;  %1861 = vmatpush1.bf16.msra.mxu1 %v5406_v11  ;;  %v5416_v61 = vld [vmem:[#allocation38_spill] sm:$0xff]  ;;  %v5417_v11 = vld [vmem:[#allocation39_spill] sm:$0xff] }
 0x460   :  { %1821 = vmatprep.subr.bf16.mxu0 %v5407_v44  ;;  %1862 = vmatprep.subr.bf16.mxu1 %v5408_v10  ;;  %v5418_v44 = vld [vmem:[#allocation40_spill] sm:$0xff]  ;;  %v5419_v10 = vld [vmem:[#allocation41_spill] sm:$0xff] }
 0x463   :  { %1822 = vmatpush1.bf16.msra.mxu0 %v5409_v32  ;;  %1863 = vmatpush1.bf16.msra.mxu1 %v5410_v9  ;;  %v5420_v32 = vld [vmem:[#allocation42_spill] sm:$0xff]  ;;  %v5421_v9 = vld [vmem:[#allocation43_spill] sm:$0xff] }
 0x464   :  { %1823 = vmatprep.subr.bf16.mxu0 %v5411_v0  ;;  %1864 = vmatprep.subr.bf16.mxu1 %v5412_v50  ;;  %v5422_v0 = vld [vmem:[#allocation44_spill] sm:$0xff]  ;;  %v5423_v50 = vld [vmem:[#allocation45_spill] sm:$0xff] }
 0x467   :  { %1824 = vmatpush1.bf16.msra.mxu0 %v5413_v19  ;;  %1865 = vmatpush1.bf16.msra.mxu1 %v5414_v62  ;;  %v5424_v19 = vld [vmem:[#allocation46_spill] sm:$0xff]  ;;  %v5425_v62 = vld [vmem:[#allocation47_spill] sm:$0xff] }
 0x468   :  { %1825 = vmatprep.subr.bf16.mxu0 %v5415_v13  ;;  %1866 = vmatprep.subr.bf16.mxu1 %v5416_v61  ;;  %v5426_v13 = vld [vmem:[#allocation48_spill] sm:$0xff]  ;;  %v5427_v61 = vld [vmem:[#allocation49_spill] sm:$0xff] }
 0x46b   :  { %1826 = vmatpush1.bf16.msra.mxu0 %v5417_v11  ;;  %1867 = vmatpush1.bf16.msra.mxu1 %v5418_v44  ;;  %v5428_v11 = vld [vmem:[#allocation50_spill] sm:$0xff]  ;;  %v5429_v44 = vld [vmem:[#allocation51_spill] sm:$0xff] }
 0x46c   :  { %1827 = vmatprep.subr.bf16.mxu0 %v5419_v10  ;;  %1868 = vmatprep.subr.bf16.mxu1 %v5420_v32  ;;  %v5430_v10 = vld [vmem:[#allocation52_spill] sm:$0xff]  ;;  %v5431_v32 = vld [vmem:[#allocation53_spill] sm:$0xff] }
 0x46f   :  { %1828 = vmatpush1.bf16.msra.mxu0 %v5421_v9  ;;  %1869 = vmatpush1.bf16.msra.mxu1 %v5422_v0  ;;  %v5432_v9 = vld [vmem:[#allocation54_spill] sm:$0xff]  ;;  %v5433_v0 = vld [vmem:[#allocation55_spill] sm:$0xff] }
 0x470   :  { %1829 = vmatprep.subr.bf16.mxu0 %v5423_v50  ;;  %1870 = vmatprep.subr.bf16.mxu1 %v5424_v19  ;;  %v5434_v50 = vld [vmem:[#allocation56_spill] sm:$0xff]  ;;  %v5435_v19 = vld [vmem:[#allocation57_spill] sm:$0xff] }
 0x473   :  { %1830 = vmatpush1.bf16.msra.mxu0 %v5425_v62  ;;  %1871 = vmatpush1.bf16.msra.mxu1 %v5426_v13  ;;  %v5436_v62 = vld [vmem:[#allocation58_spill] sm:$0xff]  ;;  %v5437_v13 = vld [vmem:[#allocation59_spill] sm:$0xff] }
 0x474   :  { %1831 = vmatprep.subr.bf16.mxu0 %v5427_v61  ;;  %1872 = vmatprep.subr.bf16.mxu1 %v5428_v11  ;;  %v5438_v61 = vld [vmem:[#allocation60_spill] sm:$0xff]  ;;  %v5439_v11 = vld [vmem:[#allocation61_spill] sm:$0xff] }
 0x477   :  { %1832 = vmatpush1.bf16.msra.mxu0 %v5429_v44  ;;  %1873 = vmatpush1.bf16.msra.mxu1 %v5430_v10  ;;  %v5440_v44 = vld [vmem:[#allocation62_spill] sm:$0xff]  ;;  %v5441_v10 = vld [vmem:[#allocation63_spill] sm:$0xff] }
 0x478   :  { %1833 = vmatprep.subr.bf16.mxu0 %v5431_v32  ;;  %1874 = vmatprep.subr.bf16.mxu1 %v5432_v9  ;;  %v5442_v32 = vld [vmem:[#allocation64_spill] sm:$0xff]  ;;  %v5443_v9 = vld [vmem:[#allocation65_spill] sm:$0xff] }
 0x47b   :  { %1834 = vmatpush1.bf16.msra.mxu0 %v5433_v0  ;;  %1875 = vmatpush1.bf16.msra.mxu1 %v5434_v50  ;;  %v5444_v0 = vld [vmem:[#allocation66_spill] sm:$0xff]  ;;  %v5445_v50 = vld [vmem:[#allocation67_spill] sm:$0xff] }
 0x47c   :  { %1835 = vmatprep.subr.bf16.mxu0 %v5435_v19  ;;  %1876 = vmatprep.subr.bf16.mxu1 %v5436_v62  ;;  %v5446_v19 = vld [vmem:[#allocation68_spill] sm:$0xff]  ;;  %v5447_v62 = vld [vmem:[#allocation69_spill] sm:$0xff] }
 0x47f   :  { %1836 = vmatpush1.bf16.msra.mxu0 %v5437_v13  ;;  %1877 = vmatpush1.bf16.msra.mxu1 %v5438_v61  ;;  %v5448_v13 = vld [vmem:[#allocation70_spill] sm:$0xff]  ;;  %v5449_v61 = vld [vmem:[#allocation71_spill] sm:$0xff] }
 0x480   :  { %1837 = vmatprep.subr.bf16.mxu0 %v5439_v11  ;;  %1878 = vmatprep.subr.bf16.mxu1 %v5440_v44  ;;  %v5450_v11 = vld [vmem:[#allocation72_spill] sm:$0xff]  ;;  %v5451_v44 = vld [vmem:[#allocation73_spill] sm:$0xff] }
 0x483   :  { %1838 = vmatpush1.bf16.msra.mxu0 %v5441_v10  ;;  %1879 = vmatpush1.bf16.msra.mxu1 %v5442_v32  ;;  %v5452_v10 = vld [vmem:[#allocation74_spill] sm:$0xff]  ;;  %v5453_v32 = vld [vmem:[#allocation75_spill] sm:$0xff] }
 0x484   :  { %1839 = vmatprep.subr.bf16.mxu0 %v5443_v9  ;;  %1880 = vmatprep.subr.bf16.mxu1 %v5444_v0  ;;  %v5454_v9 = vld [vmem:[#allocation76_spill] sm:$0xff]  ;;  %v5455_v0 = vld [vmem:[#allocation77_spill] sm:$0xff] }
 0x487   :  { %1840 = vmatpush1.bf16.msra.mxu0 %v5445_v50  ;;  %1881 = vmatpush1.bf16.msra.mxu1 %v5446_v19  ;;  %v5456_v50 = vld [vmem:[#allocation78_spill] sm:$0xff] }
 0x488   :  { %1841 = vmatprep.subr.bf16.mxu0 %v5447_v62  ;;  %1882 = vmatprep.subr.bf16.mxu1 %v5448_v13 }
 0x48b   :  { %1842 = vmatpush1.bf16.msra.mxu0 %v5449_v61  ;;  %1883 = vmatpush1.bf16.msra.mxu1 %v5450_v11 }
 0x48c   :  { %1843 = vmatprep.subr.bf16.mxu0 %v5451_v44  ;;  %1884 = vmatprep.subr.bf16.mxu1 %v5452_v10  ;;  %v1557_v44 = vld [vmem:[#allocation4 + $0x68] sm:$0xff] }
 0x48d   :  { %v1562_v10 = vunpack.c.l.bf16 %v1557_v44 }
 0x48f   :  { %1844 = vmatpush1.bf16.msra.mxu0 %v5453_v32  ;;  %1885 = vmatpush1.bf16.msra.mxu1 %v5454_v9  ;;  %v1563_v32 = vunpack.c.h.bf16 %v1557_v44 }
 0x490   :  { %1895 = vmatprep.subr.bf16.mxu0 %v5455_v0  ;;  %1936 = vmatprep.subr.bf16.mxu1 %v5456_v50 }
 0x4e5   :  { %v1602_v19 = vpop.f32.mrb[24].mxu0  ;;  %v1643_v62 = vpop.f32.mrb[24].mxu1 }
 0x4e6   :  { %v1604_v26 = vpop.f32.mrb[25].mxu0  ;;  %v1645_v13 = vpop.f32.mrb[25].mxu1  ;;  %v1603_v14 = vadd.f32 %v1602_v19, %v1560_v6  ;;  %v1644_v9 = vadd.f32 %v1643_v62, %v1562_v10 }
 0x4e7   :  { %v1606_v4 = vpop.f32.mrb[26].mxu0  ;;  %v1647_v61 = vpop.f32.mrb[26].mxu1  ;;  %v1605_v56 = vadd.f32 %v1604_v26, %v1561_v1  ;;  %v1646_v0 = vadd.f32 %v1645_v13, %v1563_v32  ;;  %v1566_v1 = vunpack.c.l.bf16 %v1559_v25 }
 0x4e8   :  { %v1607_v2 = vpop.f32.mrb[27].mxu0  ;;  %v1648_v11 = vpop.f32.mrb[27].mxu1  ;;  %v2941_v60 = vmul.f32 -1.442695, %v1603_v14  ;;  %v2943_v50 = vmul.f32 -1.442695, %v1644_v9  ;;  %v1567_v9 = vunpack.c.h.bf16 %v1559_v25 }
 0x4e9   :  { %v2942_v34 = vmul.f32 -1.442695, %v1605_v56  ;;  %v2944_v53 = vmul.f32 -1.442695, %v1646_v0  ;;  %v1558_v11 = vld [vmem:[#allocation4 + $0x70] sm:$0xff] }
 0x4ea   :  { %3088 = vpow2.f32 %v2941_v60  ;;  %v1564_v19 = vunpack.c.l.bf16 %v1558_v11  ;;  %v1565_v14 = vunpack.c.h.bf16 %v1558_v11 }
 0x4eb   :  { %3090 = vpow2.f32 %v2943_v50 }
 0x4ec   :  { %3092 = vpow2.f32 %v2942_v34 }
 0x4ed   :  { %3094 = vpow2.f32 %v2944_v53 }
 0x4f4   :  { %v3089_v2 = vpop.eup %3088 }
 0x4f5   :  { %v3091_v4 = vpop.eup %3090  ;;  %v1738_v63 = vadd.f32 1.0, %v3089_v2 }
 0x4f6   :  { %v3093_v61 = vpop.eup %3092  ;;  %v1750_v44 = vadd.f32 1.0, %v3091_v4 }
 0x4f7   :  { %v3095_v48 = vpop.eup %3094  ;;  %v1739_v6 = vadd.f32 1.0, %v3093_v61  ;;  %3096 = vrcp.f32 %v1738_v63 }
 0x4f8   :  { %v1751_v26 = vadd.f32 1.0, %v3095_v48  ;;  %3098 = vrcp.f32 %v1750_v44 }
 0x4f9   :  { %3100 = vrcp.f32 %v1739_v6 }
 0x4fa   :  { %3102 = vrcp.f32 %v1751_v26 }
 0x501   :  { %v3097_v61 = vpop.eup %3096 }
 0x502   :  { %v3099_v11 = vpop.eup %3098 }
 0x503   :  { %v3101_v63 = vpop.eup %3100 }
 0x504   :  { %v3103_v44 = vpop.eup %3102 }
 0x525   :  { %v1684_v60 = vpop.f32.mrb[28].mxu0  ;;  %v1725_v56 = vpop.f32.mrb[28].mxu1 }
 0x526   :  { %v1685_v34 = vadd.f32 %v1684_v60, %v1564_v19  ;;  %v1726_v53 = vadd.f32 %v1725_v56, %v1566_v1  ;;  %v1686_v0 = vpop.f32.mrb[29].mxu0  ;;  %v1727_v50 = vpop.f32.mrb[29].mxu1  ;;  %v1770_v1 = vmul.f32 %v3099_v11, %v4109_v58  ;;  %v5459_v11 = vld [vmem:[#allocation119_spill] sm:$0xff] }
 0x527   :  { %v1687_v13 = vadd.f32 %v1686_v0, %v1565_v14  ;;  %v1728_v10 = vadd.f32 %v1727_v50, %v1567_v9  ;;  %v1688_v32 = vpop.f32.mrb[30].mxu0  ;;  %v1729_v62 = vpop.f32.mrb[30].mxu1  ;;  %v1771_v9 = vmul.f32 %v3103_v44, %v4111_v55  ;;  %v5461_v44 = vld [vmem:[#allocation121_spill] sm:$0xff] }
 0x528   :  { %3104 = vtanh.f32 %v1685_v34  ;;  %v2945_v2 = vmul.f32 -1.442695, %v1726_v53  ;;  %v1689_v4 = vpop.f32.mrb[31].mxu0  ;;  %v1730_v48 = vpop.f32.mrb[31].mxu1 }
 0x529   :  { %3106 = vtanh.f32 %v1687_v13  ;;  %v2946_v25 = vmul.f32 -1.442695, %v1728_v10 }
 0x52a   :  { %3108 = vpow2.f32 %v2945_v2 }
 0x52b   :  { %3110 = vpow2.f32 %v2946_v25  ;;  %v5457_v25 = vld [vmem:[#allocation117_spill] sm:$0xff] }
 0x532   :  { %v3105_v6 = vpop.eup %3104 }
 0x533   :  { %v3107_v19 = vpop.eup %3106  ;;  %v1772_v26 = vmul.f32 %v3105_v6, %v3097_v61  ;;  %v5458_v61 = vld [vmem:[#allocation118_spill] sm:$0xff] }
 0x534   :  { %v3109_v14 = vpop.eup %3108  ;;  %v1773_v60 = vmul.f32 %v3107_v19, %v3101_v63  ;;  %v5460_v63 = vld [vmem:[#allocation120_spill] sm:$0xff]  ;;  %v5462_v6 = vld [vmem:[#allocation122_spill] sm:$0xff]  ;;  %v5463_v19 = vld [vmem:[#allocation123_spill] sm:$0xff] }
 0x535   :  { %v3111_v56 = vpop.eup %3110  ;;  %v4251_v34 = vadd.f32 %v1772_v26, %v1770_v1  ;;  %v1764_v53 = vadd.f32 1.0, %v3109_v14  ;;  %v5464_v1 = vld [vmem:[#allocation124_spill] sm:$0xff]  ;;  %v5465_v26 = vld [vmem:[#allocation125_spill] sm:$0xff]  ;;  %v5466_v14 = vld [vmem:[#allocation126_spill] sm:$0xff] }
 0x536   :  { %v4253_v0 = vadd.f32 %v1773_v60, %v1771_v9  ;;  %v1765_v50 = vadd.f32 1.0, %v3111_v56  ;;  %v5467_v9 = vld [vmem:[#allocation127_spill] sm:$0xff]  ;;  %v5468_v60 = vld [vmem:[#allocation128_spill] sm:$0xff]  ;;  %v5469_v56 = vld [vmem:[#allocation129_spill] sm:$0xff] }
 0x537   :  { %3112 = vtanh.f32 %v4251_v34 }
 0x538   :  { %3114 = vrcp.f32 %v1764_v53  ;;  %v5470_v53 = vld [vmem:[#allocation130_spill] sm:$0xff] }
 0x539   :  { %3116 = vtanh.f32 %v4253_v0 }
 0x53a   :  { %3118 = vrcp.f32 %v1765_v50  ;;  %v5471_v50 = vld [vmem:[#allocation131_spill] sm:$0xff] }
 0x541   :  { %v3113_v13 = vpop.eup %3112 }
 0x542   :  { %v3115_v58 = vpop.eup %3114 }
 0x543   :  { %v3117_v10 = vpop.eup %3116  ;;  %v1778_v32 = vmul.f32 %v3115_v58, %v3113_v13  ;;  %v5472_v13 = vld [vmem:[#allocation132_spill] sm:$0xff]  ;;  %v5473_v58 = vld [vmem:[#allocation133_spill] sm:$0xff] }
 0x544   :  { %v3119_v62 = vpop.eup %3118 }
 0x545   :  { %v1779_v55 = vmul.f32 %v3119_v62, %v3117_v10  ;;  %v4257_v48 = vpack.c.bf16 %v1778_v32, %v1778_v32  ;;  %v5474_v10 = vld [vmem:[#allocation134_spill] sm:$0xff]  ;;  %v5476_v62 = vld [vmem:[#allocation136_spill] sm:$0xff] }
 0x547   :  { %v1799_v2 = vpack.c.bf16 %v1779_v55, %v1779_v55  ;;  %v2979_v4 = vpack.c.bf16 %v1779_v55, %v1778_v32  ;;  %v5475_v32 = vld [vmem:[#allocation135_spill] sm:$0xff]  ;;  %v5477_v55 = vld [vmem:[#allocation137_spill] sm:$0xff] }
 0x549   :  { %1845 = vmatprep.mubr.bf16.mxu0 %v1799_v2  ;;  %1886 = vmatprep.mubr.bf16.mxu1 %v1799_v2  ;;  %1789 = vst [vmem:[#allocation9 + $0x18] sm:$0xff] %v2979_v4  ;;  %v5479_v4 = vld [vmem:[#allocation139_spill] sm:$0xff] }
 0x54a   :  { %1846 = vmatmul.mubr.bf16.vlgmr.msra.gmra.mrb[32].mxu0 %v4257_v48  ;;  %1887 = vmatmul.mubr.bf16.vlgmr.msra.gmra.mrb[32].mxu1 %v4257_v48 }
 0x54b   :  { %1896 = vmatpush1.bf16.msra.mxu0 %v5189_v42  ;;  %1937 = vmatpush1.bf16.msra.mxu1 %v5190_v24 }
 0x54c   :  { %1927 = vmatprep.mubr.bf16.mxu0 %v1799_v2  ;;  %1968 = vmatprep.mubr.bf16.mxu1 %v1799_v2  ;;  %v5478_v2 = vld [vmem:[#allocation138_spill] sm:$0xff] }
 0x54d   :  { %1897 = vmatprep.subr.bf16.mxu0 %v5191_v47  ;;  %1938 = vmatprep.subr.bf16.mxu1 %v5192_v23 }
 0x54f   :  { %1898 = vmatpush1.bf16.msra.mxu0 %v5193_v3  ;;  %1939 = vmatpush1.bf16.msra.mxu1 %v5194_v18 }
 0x550   :  { %1899 = vmatprep.subr.bf16.mxu0 %v5195_v39  ;;  %1940 = vmatprep.subr.bf16.mxu1 %v5196_v12 }
 0x553   :  { %1900 = vmatpush1.bf16.msra.mxu0 %v5197_v7  ;;  %1941 = vmatpush1.bf16.msra.mxu1 %v5198_v5 }
 0x554   :  { %1901 = vmatprep.subr.bf16.mxu0 %v5277_v15  ;;  %1942 = vmatprep.subr.bf16.mxu1 %v5278_v54 }
 0x557   :  { %1902 = vmatpush1.bf16.msra.mxu0 %v5279_v59  ;;  %1943 = vmatpush1.bf16.msra.mxu1 %v5280_v30 }
 0x558   :  { %1903 = vmatprep.subr.bf16.mxu0 %v5281_v33  ;;  %1944 = vmatprep.subr.bf16.mxu1 %v5282_v29 }
 0x55b   :  { %1904 = vmatpush1.bf16.msra.mxu0 %v5283_v38  ;;  %1945 = vmatpush1.bf16.msra.mxu1 %v5284_v28 }
 0x55c   :  { %1905 = vmatprep.subr.bf16.mxu0 %v5285_v37  ;;  %1946 = vmatprep.subr.bf16.mxu1 %v5286_v27 }
 0x55f   :  { %1906 = vmatpush1.bf16.msra.mxu0 %v5287_v43  ;;  %1947 = vmatpush1.bf16.msra.mxu1 %v5288_v21 }
 0x560   :  { %1907 = vmatprep.subr.bf16.mxu0 %v5367_v40  ;;  %1948 = vmatprep.subr.bf16.mxu1 %v5368_v31 }
 0x563   :  { %1908 = vmatpush1.bf16.msra.mxu0 %v5369_v49  ;;  %1949 = vmatpush1.bf16.msra.mxu1 %v5370_v17 }
 0x564   :  { %1909 = vmatprep.subr.bf16.mxu0 %v5293_v8  ;;  %1950 = vmatprep.subr.bf16.mxu1 %v5294_v51 }
 0x567   :  { %1910 = vmatpush1.bf16.msra.mxu0 %v5295_v52  ;;  %1951 = vmatpush1.bf16.msra.mxu1 %v5371_v57 }
 0x568   :  { %1911 = vmatprep.subr.bf16.mxu0 %v5297_v41  ;;  %1952 = vmatprep.subr.bf16.mxu1 %v5298_v35 }
 0x56b   :  { %1912 = vmatpush1.bf16.msra.mxu0 %v5299_v36  ;;  %1953 = vmatpush1.bf16.msra.mxu1 %v5300_v22 }
 0x56c   :  { %1913 = vmatprep.subr.bf16.mxu0 %v5301_v20  ;;  %1954 = vmatprep.subr.bf16.mxu1 %v5302_v45 }
 0x56f   :  { %1914 = vmatpush1.bf16.msra.mxu0 %v5303_v46  ;;  %1955 = vmatpush1.bf16.msra.mxu1 %v5226_v16 }
 0x570   :  { %1915 = vmatprep.subr.bf16.mxu0 %v5457_v25  ;;  %1956 = vmatprep.subr.bf16.mxu1 %v5458_v61  ;;  %v1804_v61 = vld [vmem:[#allocation4 + $0x98] sm:$0xff] }
 0x573   :  { %1916 = vmatpush1.bf16.msra.mxu0 %v5459_v11  ;;  %1957 = vmatpush1.bf16.msra.mxu1 %v5460_v63 }
 0x574   :  { %1917 = vmatprep.subr.bf16.mxu0 %v5461_v44  ;;  %1958 = vmatprep.subr.bf16.mxu1 %v5462_v6 }
 0x577   :  { %1918 = vmatpush1.bf16.msra.mxu0 %v5463_v19  ;;  %1959 = vmatpush1.bf16.msra.mxu1 %v5464_v1 }
 0x578   :  { %1919 = vmatprep.subr.bf16.mxu0 %v5465_v26  ;;  %1960 = vmatprep.subr.bf16.mxu1 %v5466_v14  ;;  %v1801_v14 = vld [vmem:[#allocation4 + $0x80] sm:$0xff] }
 0x579   :  { %v1805_v26 = vunpack.c.l.bf16 %v1801_v14  ;;  %v1806_v1 = vunpack.c.h.bf16 %v1801_v14 }
 0x57b   :  { %1920 = vmatpush1.bf16.msra.mxu0 %v5467_v9  ;;  %1961 = vmatpush1.bf16.msra.mxu1 %v5468_v60 }
 0x57c   :  { %1921 = vmatprep.subr.bf16.mxu0 %v5469_v56  ;;  %1962 = vmatprep.subr.bf16.mxu1 %v5470_v53  ;;  %v5480_v56 = vld [vmem:[#allocation140_spill] sm:$0xff]  ;;  %v5481_v53 = vld [vmem:[#allocation13_spill] sm:$0xff] }
 0x57f   :  { %1922 = vmatpush1.bf16.msra.mxu0 %v5471_v50  ;;  %1963 = vmatpush1.bf16.msra.mxu1 %v5472_v13  ;;  %v5482_v50 = vld [vmem:[#allocation15_spill] sm:$0xff] }
 0x580   :  { %1923 = vmatprep.subr.bf16.mxu0 %v5473_v58  ;;  %1964 = vmatprep.subr.bf16.mxu1 %v5474_v10  ;;  %v5483_v10 = vld [vmem:[#allocation14_spill] sm:$0xff]  ;;  %v5492_v58 = vld [vmem:[#allocation24_spill] sm:$0xff] }
 0x583   :  { %1924 = vmatpush1.bf16.msra.mxu0 %v5475_v32  ;;  %1965 = vmatpush1.bf16.msra.mxu1 %v5476_v62  ;;  %v5484_v32 = vld [vmem:[#allocation16_spill] sm:$0xff]  ;;  %v5485_v62 = vld [vmem:[#allocation17_spill] sm:$0xff] }
 0x584   :  { %1925 = vmatprep.subr.bf16.mxu0 %v5477_v55  ;;  %1966 = vmatprep.subr.bf16.mxu1 %v5478_v2  ;;  %v5486_v55 = vld [vmem:[#allocation18_spill] sm:$0xff]  ;;  %v5487_v2 = vld [vmem:[#allocation19_spill] sm:$0xff] }
 0x587   :  { %1926 = vmatpush1.bf16.msra.mxu0 %v5479_v4  ;;  %1967 = vmatpush1.bf16.msra.mxu1 %v5480_v56  ;;  %v5488_v4 = vld [vmem:[#allocation20_spill] sm:$0xff]  ;;  %v5489_v56 = vld [vmem:[#allocation21_spill] sm:$0xff] }
 0x588   :  { %2058 = vmatprep.subr.bf16.mxu0 %v5481_v53  ;;  %2099 = vmatprep.subr.bf16.mxu1 %v5482_v50  ;;  %v5490_v53 = vld [vmem:[#allocation22_spill] sm:$0xff]  ;;  %v5491_v50 = vld [vmem:[#allocation23_spill] sm:$0xff] }
 0x58a   :  { %1928 = vmatmul.mubr.bf16.vlgmr.msra.gmra.mrb[36].mxu0 %v4257_v48  ;;  %1969 = vmatmul.mubr.bf16.vlgmr.msra.gmra.mrb[36].mxu1 %v4257_v48  ;;  %v5493_v48 = vld [vmem:[#allocation25_spill] sm:$0xff] }
 0x58b   :  { %2059 = vmatpush1.bf16.msra.mxu0 %v5483_v10  ;;  %2100 = vmatpush1.bf16.msra.mxu1 %v5484_v32  ;;  %v5494_v10 = vld [vmem:[#allocation26_spill] sm:$0xff]  ;;  %v5495_v32 = vld [vmem:[#allocation27_spill] sm:$0xff] }
 0x58c   :  { %2060 = vmatprep.subr.bf16.mxu0 %v5485_v62  ;;  %2101 = vmatprep.subr.bf16.mxu1 %v5486_v55  ;;  %v5496_v62 = vld [vmem:[#allocation28_spill] sm:$0xff]  ;;  %v5497_v55 = vld [vmem:[#allocation29_spill] sm:$0xff] }
 0x58f   :  { %2061 = vmatpush1.bf16.msra.mxu0 %v5487_v2  ;;  %2102 = vmatpush1.bf16.msra.mxu1 %v5488_v4  ;;  %v5498_v2 = vld [vmem:[#allocation30_spill] sm:$0xff]  ;;  %v5499_v4 = vld [vmem:[#allocation31_spill] sm:$0xff] }
 0x590   :  { %2062 = vmatprep.subr.bf16.mxu0 %v5489_v56  ;;  %2103 = vmatprep.subr.bf16.mxu1 %v5490_v53  ;;  %v5500_v56 = vld [vmem:[#allocation32_spill] sm:$0xff]  ;;  %v5501_v53 = vld [vmem:[#allocation33_spill] sm:$0xff] }
 0x593   :  { %2063 = vmatpush1.bf16.msra.mxu0 %v5491_v50  ;;  %2104 = vmatpush1.bf16.msra.mxu1 %v5492_v58  ;;  %v5502_v50 = vld [vmem:[#allocation34_spill] sm:$0xff]  ;;  %v5503_v58 = vld [vmem:[#allocation35_spill] sm:$0xff] }
 0x594   :  { %2064 = vmatprep.subr.bf16.mxu0 %v5493_v48  ;;  %2105 = vmatprep.subr.bf16.mxu1 %v5494_v10  ;;  %v5504_v48 = vld [vmem:[#allocation36_spill] sm:$0xff]  ;;  %v5505_v10 = vld [vmem:[#allocation37_spill] sm:$0xff] }
 0x597   :  { %2065 = vmatpush1.bf16.msra.mxu0 %v5495_v32  ;;  %2106 = vmatpush1.bf16.msra.mxu1 %v5496_v62  ;;  %v5506_v32 = vld [vmem:[#allocation38_spill] sm:$0xff]  ;;  %v5507_v62 = vld [vmem:[#allocation39_spill] sm:$0xff] }
 0x598   :  { %2066 = vmatprep.subr.bf16.mxu0 %v5497_v55  ;;  %2107 = vmatprep.subr.bf16.mxu1 %v5498_v2  ;;  %v5508_v55 = vld [vmem:[#allocation40_spill] sm:$0xff]  ;;  %v5509_v2 = vld [vmem:[#allocation41_spill] sm:$0xff] }
 0x59b   :  { %2067 = vmatpush1.bf16.msra.mxu0 %v5499_v4  ;;  %2108 = vmatpush1.bf16.msra.mxu1 %v5500_v56  ;;  %v5510_v4 = vld [vmem:[#allocation42_spill] sm:$0xff]  ;;  %v5511_v56 = vld [vmem:[#allocation43_spill] sm:$0xff] }
 0x59c   :  { %2068 = vmatprep.subr.bf16.mxu0 %v5501_v53  ;;  %2109 = vmatprep.subr.bf16.mxu1 %v5502_v50  ;;  %v5512_v53 = vld [vmem:[#allocation44_spill] sm:$0xff]  ;;  %v5513_v50 = vld [vmem:[#allocation45_spill] sm:$0xff] }
 0x59f   :  { %2069 = vmatpush1.bf16.msra.mxu0 %v5503_v58  ;;  %2110 = vmatpush1.bf16.msra.mxu1 %v5504_v48  ;;  %v5514_v58 = vld [vmem:[#allocation46_spill] sm:$0xff]  ;;  %v5515_v48 = vld [vmem:[#allocation47_spill] sm:$0xff] }
 0x5a0   :  { %2070 = vmatprep.subr.bf16.mxu0 %v5505_v10  ;;  %2111 = vmatprep.subr.bf16.mxu1 %v5506_v32  ;;  %v5516_v10 = vld [vmem:[#allocation48_spill] sm:$0xff]  ;;  %v5517_v32 = vld [vmem:[#allocation49_spill] sm:$0xff] }
 0x5a3   :  { %2071 = vmatpush1.bf16.msra.mxu0 %v5507_v62  ;;  %2112 = vmatpush1.bf16.msra.mxu1 %v5508_v55  ;;  %v5518_v62 = vld [vmem:[#allocation50_spill] sm:$0xff]  ;;  %v5519_v55 = vld [vmem:[#allocation51_spill] sm:$0xff] }
 0x5a4   :  { %2072 = vmatprep.subr.bf16.mxu0 %v5509_v2  ;;  %2113 = vmatprep.subr.bf16.mxu1 %v5510_v4  ;;  %v5520_v2 = vld [vmem:[#allocation52_spill] sm:$0xff]  ;;  %v5521_v4 = vld [vmem:[#allocation53_spill] sm:$0xff] }
 0x5a7   :  { %2073 = vmatpush1.bf16.msra.mxu0 %v5511_v56  ;;  %2114 = vmatpush1.bf16.msra.mxu1 %v5512_v53  ;;  %v5522_v56 = vld [vmem:[#allocation54_spill] sm:$0xff]  ;;  %v5523_v53 = vld [vmem:[#allocation55_spill] sm:$0xff] }
 0x5a8   :  { %2074 = vmatprep.subr.bf16.mxu0 %v5513_v50  ;;  %2115 = vmatprep.subr.bf16.mxu1 %v5514_v58  ;;  %v5524_v50 = vld [vmem:[#allocation56_spill] sm:$0xff]  ;;  %v5525_v58 = vld [vmem:[#allocation57_spill] sm:$0xff] }
 0x5ab   :  { %2075 = vmatpush1.bf16.msra.mxu0 %v5515_v48  ;;  %2116 = vmatpush1.bf16.msra.mxu1 %v5516_v10  ;;  %v5526_v48 = vld [vmem:[#allocation58_spill] sm:$0xff]  ;;  %v5527_v10 = vld [vmem:[#allocation59_spill] sm:$0xff] }
 0x5ac   :  { %2076 = vmatprep.subr.bf16.mxu0 %v5517_v32  ;;  %2117 = vmatprep.subr.bf16.mxu1 %v5518_v62  ;;  %v5528_v32 = vld [vmem:[#allocation60_spill] sm:$0xff]  ;;  %v5529_v62 = vld [vmem:[#allocation61_spill] sm:$0xff] }
 0x5af   :  { %2077 = vmatpush1.bf16.msra.mxu0 %v5519_v55  ;;  %2118 = vmatpush1.bf16.msra.mxu1 %v5520_v2  ;;  %v5530_v55 = vld [vmem:[#allocation62_spill] sm:$0xff]  ;;  %v5531_v2 = vld [vmem:[#allocation63_spill] sm:$0xff] }
 0x5b0   :  { %2078 = vmatprep.subr.bf16.mxu0 %v5521_v4  ;;  %2119 = vmatprep.subr.bf16.mxu1 %v5522_v56  ;;  %v5532_v4 = vld [vmem:[#allocation64_spill] sm:$0xff]  ;;  %v5533_v56 = vld [vmem:[#allocation65_spill] sm:$0xff] }
 0x5b3   :  { %2079 = vmatpush1.bf16.msra.mxu0 %v5523_v53  ;;  %2120 = vmatpush1.bf16.msra.mxu1 %v5524_v50  ;;  %v5534_v53 = vld [vmem:[#allocation66_spill] sm:$0xff]  ;;  %v5535_v50 = vld [vmem:[#allocation67_spill] sm:$0xff] }
 0x5b4   :  { %2080 = vmatprep.subr.bf16.mxu0 %v5525_v58  ;;  %2121 = vmatprep.subr.bf16.mxu1 %v5526_v48  ;;  %v5536_v58 = vld [vmem:[#allocation68_spill] sm:$0xff]  ;;  %v5537_v48 = vld [vmem:[#allocation69_spill] sm:$0xff] }
 0x5b7   :  { %2081 = vmatpush1.bf16.msra.mxu0 %v5527_v10  ;;  %2122 = vmatpush1.bf16.msra.mxu1 %v5528_v32  ;;  %v5538_v10 = vld [vmem:[#allocation70_spill] sm:$0xff]  ;;  %v5539_v32 = vld [vmem:[#allocation71_spill] sm:$0xff] }
 0x5b8   :  { %2082 = vmatprep.subr.bf16.mxu0 %v5529_v62  ;;  %2123 = vmatprep.subr.bf16.mxu1 %v5530_v55  ;;  %v5540_v62 = vld [vmem:[#allocation72_spill] sm:$0xff]  ;;  %v5541_v55 = vld [vmem:[#allocation73_spill] sm:$0xff] }
 0x5bb   :  { %2083 = vmatpush1.bf16.msra.mxu0 %v5531_v2  ;;  %2124 = vmatpush1.bf16.msra.mxu1 %v5532_v4  ;;  %v5542_v2 = vld [vmem:[#allocation74_spill] sm:$0xff]  ;;  %v5543_v4 = vld [vmem:[#allocation75_spill] sm:$0xff] }
 0x5bc   :  { %2084 = vmatprep.subr.bf16.mxu0 %v5533_v56  ;;  %2125 = vmatprep.subr.bf16.mxu1 %v5534_v53  ;;  %v5544_v56 = vld [vmem:[#allocation76_spill] sm:$0xff]  ;;  %v5545_v53 = vld [vmem:[#allocation77_spill] sm:$0xff] }
 0x5bf   :  { %2085 = vmatpush1.bf16.msra.mxu0 %v5535_v50  ;;  %2126 = vmatpush1.bf16.msra.mxu1 %v5536_v58  ;;  %v5546_v50 = vld [vmem:[#allocation78_spill] sm:$0xff] }
 0x5c0   :  { %2086 = vmatprep.subr.bf16.mxu0 %v5537_v48  ;;  %2127 = vmatprep.subr.bf16.mxu1 %v5538_v10 }
 0x5c3   :  { %2087 = vmatpush1.bf16.msra.mxu0 %v5539_v32  ;;  %2128 = vmatpush1.bf16.msra.mxu1 %v5540_v62 }
 0x5c4   :  { %2088 = vmatprep.subr.bf16.mxu0 %v5541_v55  ;;  %2129 = vmatprep.subr.bf16.mxu1 %v5542_v2  ;;  %v1802_v55 = vld [vmem:[#allocation4 + $0x88] sm:$0xff] }
 0x5c5   :  { %v1807_v2 = vunpack.c.l.bf16 %v1802_v55 }
 0x5c7   :  { %2089 = vmatpush1.bf16.msra.mxu0 %v5543_v4  ;;  %2130 = vmatpush1.bf16.msra.mxu1 %v5544_v56  ;;  %v1808_v4 = vunpack.c.h.bf16 %v1802_v55 }
 0x5c8   :  { %2140 = vmatprep.subr.bf16.mxu0 %v5545_v53  ;;  %2181 = vmatprep.subr.bf16.mxu1 %v5546_v50 }
 0x61d   :  { %v1847_v58 = vpop.f32.mrb[32].mxu0  ;;  %v1888_v48 = vpop.f32.mrb[32].mxu1 }
 0x61e   :  { %v1849_v13 = vpop.f32.mrb[33].mxu0  ;;  %v1890_v10 = vpop.f32.mrb[33].mxu1  ;;  %v1848_v19 = vadd.f32 %v1847_v58, %v1805_v26  ;;  %v1889_v56 = vadd.f32 %v1888_v48, %v1807_v2 }
 0x61f   :  { %v1851_v60 = vpop.f32.mrb[34].mxu0  ;;  %v1892_v32 = vpop.f32.mrb[34].mxu1  ;;  %v1850_v6 = vadd.f32 %v1849_v13, %v1806_v1  ;;  %v1891_v53 = vadd.f32 %v1890_v10, %v1808_v4  ;;  %v1811_v1 = vunpack.c.l.bf16 %v1804_v61 }
 0x620   :  { %v1852_v9 = vpop.f32.mrb[35].mxu0  ;;  %v1893_v62 = vpop.f32.mrb[35].mxu1  ;;  %v2948_v44 = vmul.f32 -1.442695, %v1848_v19  ;;  %v2950_v50 = vmul.f32 -1.442695, %v1889_v56  ;;  %v1812_v56 = vunpack.c.h.bf16 %v1804_v61 }
 0x621   :  { %v2949_v63 = vmul.f32 -1.442695, %v1850_v6  ;;  %v2951_v11 = vmul.f32 -1.442695, %v1891_v53  ;;  %v1803_v62 = vld [vmem:[#allocation4 + $0x90] sm:$0xff] }
 0x622   :  { %3120 = vpow2.f32 %v2948_v44  ;;  %v1809_v58 = vunpack.c.l.bf16 %v1803_v62  ;;  %v1810_v19 = vunpack.c.h.bf16 %v1803_v62 }
 0x623   :  { %3122 = vpow2.f32 %v2950_v50 }
 0x624   :  { %3124 = vpow2.f32 %v2949_v63 }
 0x625   :  { %3126 = vpow2.f32 %v2951_v11 }
 0x62c   :  { %v3121_v9 = vpop.eup %3120 }
 0x62d   :  { %v3123_v60 = vpop.eup %3122  ;;  %v1983_v14 = vadd.f32 1.0, %v3121_v9 }
 0x62e   :  { %v3125_v32 = vpop.eup %3124  ;;  %v1995_v55 = vadd.f32 1.0, %v3123_v60 }
 0x62f   :  { %v3127_v25 = vpop.eup %3126  ;;  %v1984_v26 = vadd.f32 1.0, %v3125_v32  ;;  %3128 = vrcp.f32 %v1983_v14 }
 0x630   :  { %v1996_v13 = vadd.f32 1.0, %v3127_v25  ;;  %3130 = vrcp.f32 %v1995_v55 }
 0x631   :  { %3132 = vrcp.f32 %v1984_v26 }
 0x632   :  { %3134 = vrcp.f32 %v1996_v13 }
 0x639   :  { %v3129_v32 = vpop.eup %3128 }
 0x63a   :  { %v3131_v62 = vpop.eup %3130 }
 0x63b   :  { %v3133_v14 = vpop.eup %3132 }
 0x63c   :  { %v3135_v55 = vpop.eup %3134 }
 0x65d   :  { %v1929_v44 = vpop.f32.mrb[36].mxu0  ;;  %v1970_v6 = vpop.f32.mrb[36].mxu1 }
 0x65e   :  { %v1930_v11 = vadd.f32 %v1929_v44, %v1809_v58  ;;  %v1971_v63 = vadd.f32 %v1970_v6, %v1811_v1  ;;  %v1931_v53 = vpop.f32.mrb[37].mxu0  ;;  %v1972_v50 = vpop.f32.mrb[37].mxu1  ;;  %v2015_v1 = vmul.f32 %v3131_v62, %v4251_v34  ;;  %v5549_v62 = vld [vmem:[#allocation119_spill] sm:$0xff] }
 0x65f   :  { %v1932_v10 = vadd.f32 %v1931_v53, %v1810_v19  ;;  %v1973_v2 = vadd.f32 %v1972_v50, %v1812_v56  ;;  %v1933_v4 = vpop.f32.mrb[38].mxu0  ;;  %v1974_v48 = vpop.f32.mrb[38].mxu1  ;;  %v2016_v56 = vmul.f32 %v3135_v55, %v4253_v0  ;;  %v5551_v55 = vld [vmem:[#allocation121_spill] sm:$0xff] }
 0x660   :  { %3136 = vtanh.f32 %v1930_v11  ;;  %v2952_v9 = vmul.f32 -1.442695, %v1971_v63  ;;  %v1934_v60 = vpop.f32.mrb[39].mxu0  ;;  %v1975_v25 = vpop.f32.mrb[39].mxu1 }
 0x661   :  { %3138 = vtanh.f32 %v1932_v10  ;;  %v2953_v61 = vmul.f32 -1.442695, %v1973_v2 }
 0x662   :  { %3140 = vpow2.f32 %v2952_v9 }
 0x663   :  { %3142 = vpow2.f32 %v2953_v61  ;;  %v5547_v61 = vld [vmem:[#allocation117_spill] sm:$0xff] }
 0x66a   :  { %v3137_v26 = vpop.eup %3136 }
 0x66b   :  { %v3139_v58 = vpop.eup %3138  ;;  %v2017_v13 = vmul.f32 %v3137_v26, %v3129_v32  ;;  %v5548_v32 = vld [vmem:[#allocation118_spill] sm:$0xff] }
 0x66c   :  { %v3141_v19 = vpop.eup %3140  ;;  %v2018_v44 = vmul.f32 %v3139_v58, %v3133_v14  ;;  %v5550_v14 = vld [vmem:[#allocation120_spill] sm:$0xff]  ;;  %v5552_v26 = vld [vmem:[#allocation122_spill] sm:$0xff]  ;;  %v5553_v58 = vld [vmem:[#allocation123_spill] sm:$0xff] }
 0x66d   :  { %v3143_v6 = vpop.eup %3142  ;;  %v4393_v11 = vadd.f32 %v2017_v13, %v2015_v1  ;;  %v2009_v63 = vadd.f32 1.0, %v3141_v19  ;;  %v5554_v1 = vld [vmem:[#allocation124_spill] sm:$0xff]  ;;  %v5555_v13 = vld [vmem:[#allocation125_spill] sm:$0xff]  ;;  %v5556_v19 = vld [vmem:[#allocation126_spill] sm:$0xff] }
 0x66e   :  { %v4395_v53 = vadd.f32 %v2018_v44, %v2016_v56  ;;  %v2010_v50 = vadd.f32 1.0, %v3143_v6  ;;  %v5557_v56 = vld [vmem:[#allocation127_spill] sm:$0xff]  ;;  %v5558_v44 = vld [vmem:[#allocation128_spill] sm:$0xff]  ;;  %v5559_v6 = vld [vmem:[#allocation129_spill] sm:$0xff] }
 0x66f   :  { %3144 = vtanh.f32 %v4393_v11 }
 0x670   :  { %3146 = vrcp.f32 %v2009_v63  ;;  %v5560_v63 = vld [vmem:[#allocation130_spill] sm:$0xff] }
 0x671   :  { %3148 = vtanh.f32 %v4395_v53 }
 0x672   :  { %3150 = vrcp.f32 %v2010_v50  ;;  %v5561_v50 = vld [vmem:[#allocation131_spill] sm:$0xff] }
 0x679   :  { %v3145_v10 = vpop.eup %3144 }
 0x67a   :  { %v3147_v34 = vpop.eup %3146 }
 0x67b   :  { %v3149_v2 = vpop.eup %3148  ;;  %v2023_v4 = vmul.f32 %v3147_v34, %v3145_v10  ;;  %v5562_v10 = vld [vmem:[#allocation132_spill] sm:$0xff]  ;;  %v5563_v34 = vld [vmem:[#allocation133_spill] sm:$0xff] }
 0x67c   :  { %v3151_v48 = vpop.eup %3150 }
 0x67d   :  { %v2024_v0 = vmul.f32 %v3151_v48, %v3149_v2  ;;  %v4399_v25 = vpack.c.bf16 %v2023_v4, %v2023_v4  ;;  %v5564_v2 = vld [vmem:[#allocation134_spill] sm:$0xff]  ;;  %v5566_v48 = vld [vmem:[#allocation136_spill] sm:$0xff] }
 0x67f   :  { %v2044_v9 = vpack.c.bf16 %v2024_v0, %v2024_v0  ;;  %v2980_v60 = vpack.c.bf16 %v2024_v0, %v2023_v4  ;;  %v5565_v4 = vld [vmem:[#allocation135_spill] sm:$0xff]  ;;  %v5567_v0 = vld [vmem:[#allocation137_spill] sm:$0xff] }
 0x681   :  { %2090 = vmatprep.mubr.bf16.mxu0 %v2044_v9  ;;  %2131 = vmatprep.mubr.bf16.mxu1 %v2044_v9  ;;  %2034 = vst [vmem:[#allocation9 + $0x20] sm:$0xff] %v2980_v60  ;;  %v5569_v60 = vld [vmem:[#allocation139_spill] sm:$0xff] }
 0x682   :  { %2091 = vmatmul.mubr.bf16.vlgmr.msra.gmra.mrb[40].mxu0 %v4399_v25  ;;  %2132 = vmatmul.mubr.bf16.vlgmr.msra.gmra.mrb[40].mxu1 %v4399_v25 }
 0x683   :  { %2141 = vmatpush1.bf16.msra.mxu0 %v5189_v42  ;;  %2182 = vmatpush1.bf16.msra.mxu1 %v5190_v24 }
 0x684   :  { %2172 = vmatprep.mubr.bf16.mxu0 %v2044_v9  ;;  %2213 = vmatprep.mubr.bf16.mxu1 %v2044_v9  ;;  %v5568_v9 = vld [vmem:[#allocation138_spill] sm:$0xff] }
 0x685   :  { %2142 = vmatprep.subr.bf16.mxu0 %v5191_v47  ;;  %2183 = vmatprep.subr.bf16.mxu1 %v5192_v23 }
 0x687   :  { %2143 = vmatpush1.bf16.msra.mxu0 %v5193_v3  ;;  %2184 = vmatpush1.bf16.msra.mxu1 %v5194_v18 }
 0x688   :  { %2144 = vmatprep.subr.bf16.mxu0 %v5195_v39  ;;  %2185 = vmatprep.subr.bf16.mxu1 %v5196_v12 }
 0x68b   :  { %2145 = vmatpush1.bf16.msra.mxu0 %v5197_v7  ;;  %2186 = vmatpush1.bf16.msra.mxu1 %v5198_v5 }
 0x68c   :  { %2146 = vmatprep.subr.bf16.mxu0 %v5277_v15  ;;  %2187 = vmatprep.subr.bf16.mxu1 %v5278_v54 }
 0x68f   :  { %2147 = vmatpush1.bf16.msra.mxu0 %v5279_v59  ;;  %2188 = vmatpush1.bf16.msra.mxu1 %v5280_v30 }
 0x690   :  { %2148 = vmatprep.subr.bf16.mxu0 %v5281_v33  ;;  %2189 = vmatprep.subr.bf16.mxu1 %v5282_v29 }
 0x693   :  { %2149 = vmatpush1.bf16.msra.mxu0 %v5283_v38  ;;  %2190 = vmatpush1.bf16.msra.mxu1 %v5284_v28 }
 0x694   :  { %2150 = vmatprep.subr.bf16.mxu0 %v5285_v37  ;;  %2191 = vmatprep.subr.bf16.mxu1 %v5286_v27 }
 0x697   :  { %2151 = vmatpush1.bf16.msra.mxu0 %v5287_v43  ;;  %2192 = vmatpush1.bf16.msra.mxu1 %v5288_v21 }
 0x698   :  { %2152 = vmatprep.subr.bf16.mxu0 %v5367_v40  ;;  %2193 = vmatprep.subr.bf16.mxu1 %v5368_v31 }
 0x69b   :  { %2153 = vmatpush1.bf16.msra.mxu0 %v5369_v49  ;;  %2194 = vmatpush1.bf16.msra.mxu1 %v5370_v17 }
 0x69c   :  { %2154 = vmatprep.subr.bf16.mxu0 %v5293_v8  ;;  %2195 = vmatprep.subr.bf16.mxu1 %v5294_v51 }
 0x69f   :  { %2155 = vmatpush1.bf16.msra.mxu0 %v5295_v52  ;;  %2196 = vmatpush1.bf16.msra.mxu1 %v5371_v57 }
 0x6a0   :  { %2156 = vmatprep.subr.bf16.mxu0 %v5297_v41  ;;  %2197 = vmatprep.subr.bf16.mxu1 %v5298_v35 }
 0x6a3   :  { %2157 = vmatpush1.bf16.msra.mxu0 %v5299_v36  ;;  %2198 = vmatpush1.bf16.msra.mxu1 %v5300_v22 }
 0x6a4   :  { %2158 = vmatprep.subr.bf16.mxu0 %v5301_v20  ;;  %2199 = vmatprep.subr.bf16.mxu1 %v5302_v45 }
 0x6a7   :  { %2159 = vmatpush1.bf16.msra.mxu0 %v5303_v46  ;;  %2200 = vmatpush1.bf16.msra.mxu1 %v5226_v16 }
 0x6a8   :  { %2160 = vmatprep.subr.bf16.mxu0 %v5547_v61  ;;  %2201 = vmatprep.subr.bf16.mxu1 %v5548_v32  ;;  %v2049_v32 = vld [vmem:[#allocation4 + $0xb8] sm:$0xff] }
 0x6ab   :  { %2161 = vmatpush1.bf16.msra.mxu0 %v5549_v62  ;;  %2202 = vmatpush1.bf16.msra.mxu1 %v5550_v14 }
 0x6ac   :  { %2162 = vmatprep.subr.bf16.mxu0 %v5551_v55  ;;  %2203 = vmatprep.subr.bf16.mxu1 %v5552_v26 }
 0x6af   :  { %2163 = vmatpush1.bf16.msra.mxu0 %v5553_v58  ;;  %2204 = vmatpush1.bf16.msra.mxu1 %v5554_v1 }
 0x6b0   :  { %2164 = vmatprep.subr.bf16.mxu0 %v5555_v13  ;;  %2205 = vmatprep.subr.bf16.mxu1 %v5556_v19  ;;  %v2046_v19 = vld [vmem:[#allocation4 + $0xa0] sm:$0xff] }
 0x6b1   :  { %v2050_v13 = vunpack.c.l.bf16 %v2046_v19  ;;  %v2051_v1 = vunpack.c.h.bf16 %v2046_v19 }
 0x6b3   :  { %2165 = vmatpush1.bf16.msra.mxu0 %v5557_v56  ;;  %2206 = vmatpush1.bf16.msra.mxu1 %v5558_v44 }
 0x6b4   :  { %2166 = vmatprep.subr.bf16.mxu0 %v5559_v6  ;;  %2207 = vmatprep.subr.bf16.mxu1 %v5560_v63  ;;  %v5570_v6 = vld [vmem:[#allocation140_spill] sm:$0xff]  ;;  %v5571_v63 = vld [vmem:[#allocation13_spill] sm:$0xff] }
 0x6b7   :  { %2167 = vmatpush1.bf16.msra.mxu0 %v5561_v50  ;;  %2208 = vmatpush1.bf16.msra.mxu1 %v5562_v10  ;;  %v5572_v50 = vld [vmem:[#allocation15_spill] sm:$0xff] }
 0x6b8   :  { %2168 = vmatprep.subr.bf16.mxu0 %v5563_v34  ;;  %2209 = vmatprep.subr.bf16.mxu1 %v5564_v2  ;;  %v5573_v2 = vld [vmem:[#allocation14_spill] sm:$0xff]  ;;  %v5582_v34 = vld [vmem:[#allocation24_spill] sm:$0xff] }
 0x6bb   :  { %2169 = vmatpush1.bf16.msra.mxu0 %v5565_v4  ;;  %2210 = vmatpush1.bf16.msra.mxu1 %v5566_v48  ;;  %v5574_v4 = vld [vmem:[#allocation16_spill] sm:$0xff]  ;;  %v5575_v48 = vld [vmem:[#allocation17_spill] sm:$0xff] }
 0x6bc   :  { %2170 = vmatprep.subr.bf16.mxu0 %v5567_v0  ;;  %2211 = vmatprep.subr.bf16.mxu1 %v5568_v9  ;;  %v5576_v0 = vld [vmem:[#allocation18_spill] sm:$0xff]  ;;  %v5577_v9 = vld [vmem:[#allocation19_spill] sm:$0xff] }
 0x6bf   :  { %2171 = vmatpush1.bf16.msra.mxu0 %v5569_v60  ;;  %2212 = vmatpush1.bf16.msra.mxu1 %v5570_v6  ;;  %v5578_v60 = vld [vmem:[#allocation20_spill] sm:$0xff]  ;;  %v5579_v6 = vld [vmem:[#allocation21_spill] sm:$0xff] }
 0x6c0   :  { %2303 = vmatprep.subr.bf16.mxu0 %v5571_v63  ;;  %2344 = vmatprep.subr.bf16.mxu1 %v5572_v50  ;;  %v5580_v63 = vld [vmem:[#allocation22_spill] sm:$0xff]  ;;  %v5581_v50 = vld [vmem:[#allocation23_spill] sm:$0xff] }
 0x6c2   :  { %2173 = vmatmul.mubr.bf16.vlgmr.msra.gmra.mrb[44].mxu0 %v4399_v25  ;;  %2214 = vmatmul.mubr.bf16.vlgmr.msra.gmra.mrb[44].mxu1 %v4399_v25  ;;  %v5583_v25 = vld [vmem:[#allocation25_spill] sm:$0xff] }
 0x6c3   :  { %2304 = vmatpush1.bf16.msra.mxu0 %v5573_v2  ;;  %2345 = vmatpush1.bf16.msra.mxu1 %v5574_v4  ;;  %v5584_v2 = vld [vmem:[#allocation26_spill] sm:$0xff]  ;;  %v5585_v4 = vld [vmem:[#allocation27_spill] sm:$0xff] }
 0x6c4   :  { %2305 = vmatprep.subr.bf16.mxu0 %v5575_v48  ;;  %2346 = vmatprep.subr.bf16.mxu1 %v5576_v0  ;;  %v5586_v48 = vld [vmem:[#allocation28_spill] sm:$0xff]  ;;  %v5587_v0 = vld [vmem:[#allocation29_spill] sm:$0xff] }
 0x6c7   :  { %2306 = vmatpush1.bf16.msra.mxu0 %v5577_v9  ;;  %2347 = vmatpush1.bf16.msra.mxu1 %v5578_v60  ;;  %v5588_v9 = vld [vmem:[#allocation30_spill] sm:$0xff]  ;;  %v5589_v60 = vld [vmem:[#allocation31_spill] sm:$0xff] }
 0x6c8   :  { %2307 = vmatprep.subr.bf16.mxu0 %v5579_v6  ;;  %2348 = vmatprep.subr.bf16.mxu1 %v5580_v63  ;;  %v5590_v6 = vld [vmem:[#allocation32_spill] sm:$0xff]  ;;  %v5591_v63 = vld [vmem:[#allocation33_spill] sm:$0xff] }
 0x6cb   :  { %2308 = vmatpush1.bf16.msra.mxu0 %v5581_v50  ;;  %2349 = vmatpush1.bf16.msra.mxu1 %v5582_v34  ;;  %v5592_v50 = vld [vmem:[#allocation34_spill] sm:$0xff]  ;;  %v5593_v34 = vld [vmem:[#allocation35_spill] sm:$0xff] }
 0x6cc   :  { %2309 = vmatprep.subr.bf16.mxu0 %v5583_v25  ;;  %2350 = vmatprep.subr.bf16.mxu1 %v5584_v2  ;;  %v5594_v25 = vld [vmem:[#allocation36_spill] sm:$0xff]  ;;  %v5595_v2 = vld [vmem:[#allocation37_spill] sm:$0xff] }
 0x6cf   :  { %2310 = vmatpush1.bf16.msra.mxu0 %v5585_v4  ;;  %2351 = vmatpush1.bf16.msra.mxu1 %v5586_v48  ;;  %v5596_v4 = vld [vmem:[#allocation38_spill] sm:$0xff]  ;;  %v5597_v48 = vld [vmem:[#allocation39_spill] sm:$0xff] }
 0x6d0   :  { %2311 = vmatprep.subr.bf16.mxu0 %v5587_v0  ;;  %2352 = vmatprep.subr.bf16.mxu1 %v5588_v9  ;;  %v5598_v0 = vld [vmem:[#allocation40_spill] sm:$0xff]  ;;  %v5599_v9 = vld [vmem:[#allocation41_spill] sm:$0xff] }
 0x6d3   :  { %2312 = vmatpush1.bf16.msra.mxu0 %v5589_v60  ;;  %2353 = vmatpush1.bf16.msra.mxu1 %v5590_v6  ;;  %v5600_v60 = vld [vmem:[#allocation42_spill] sm:$0xff]  ;;  %v5601_v6 = vld [vmem:[#allocation43_spill] sm:$0xff] }
 0x6d4   :  { %2313 = vmatprep.subr.bf16.mxu0 %v5591_v63  ;;  %2354 = vmatprep.subr.bf16.mxu1 %v5592_v50  ;;  %v5602_v63 = vld [vmem:[#allocation44_spill] sm:$0xff]  ;;  %v5603_v50 = vld [vmem:[#allocation45_spill] sm:$0xff] }
 0x6d7   :  { %2314 = vmatpush1.bf16.msra.mxu0 %v5593_v34  ;;  %2355 = vmatpush1.bf16.msra.mxu1 %v5594_v25  ;;  %v5604_v34 = vld [vmem:[#allocation46_spill] sm:$0xff]  ;;  %v5605_v25 = vld [vmem:[#allocation47_spill] sm:$0xff] }
 0x6d8   :  { %2315 = vmatprep.subr.bf16.mxu0 %v5595_v2  ;;  %2356 = vmatprep.subr.bf16.mxu1 %v5596_v4  ;;  %v5606_v2 = vld [vmem:[#allocation48_spill] sm:$0xff]  ;;  %v5607_v4 = vld [vmem:[#allocation49_spill] sm:$0xff] }
 0x6db   :  { %2316 = vmatpush1.bf16.msra.mxu0 %v5597_v48  ;;  %2357 = vmatpush1.bf16.msra.mxu1 %v5598_v0  ;;  %v5608_v48 = vld [vmem:[#allocation50_spill] sm:$0xff]  ;;  %v5609_v0 = vld [vmem:[#allocation51_spill] sm:$0xff] }
 0x6dc   :  { %2317 = vmatprep.subr.bf16.mxu0 %v5599_v9  ;;  %2358 = vmatprep.subr.bf16.mxu1 %v5600_v60  ;;  %v5610_v9 = vld [vmem:[#allocation52_spill] sm:$0xff]  ;;  %v5611_v60 = vld [vmem:[#allocation53_spill] sm:$0xff] }
 0x6df   :  { %2318 = vmatpush1.bf16.msra.mxu0 %v5601_v6  ;;  %2359 = vmatpush1.bf16.msra.mxu1 %v5602_v63  ;;  %v5612_v6 = vld [vmem:[#allocation54_spill] sm:$0xff]  ;;  %v5613_v63 = vld [vmem:[#allocation55_spill] sm:$0xff] }
 0x6e0   :  { %2319 = vmatprep.subr.bf16.mxu0 %v5603_v50  ;;  %2360 = vmatprep.subr.bf16.mxu1 %v5604_v34  ;;  %v5614_v50 = vld [vmem:[#allocation56_spill] sm:$0xff]  ;;  %v5615_v34 = vld [vmem:[#allocation57_spill] sm:$0xff] }
 0x6e3   :  { %2320 = vmatpush1.bf16.msra.mxu0 %v5605_v25  ;;  %2361 = vmatpush1.bf16.msra.mxu1 %v5606_v2  ;;  %v5616_v25 = vld [vmem:[#allocation58_spill] sm:$0xff]  ;;  %v5617_v2 = vld [vmem:[#allocation59_spill] sm:$0xff] }
 0x6e4   :  { %2321 = vmatprep.subr.bf16.mxu0 %v5607_v4  ;;  %2362 = vmatprep.subr.bf16.mxu1 %v5608_v48  ;;  %v5618_v4 = vld [vmem:[#allocation60_spill] sm:$0xff]  ;;  %v5619_v48 = vld [vmem:[#allocation61_spill] sm:$0xff] }
 0x6e7   :  { %2322 = vmatpush1.bf16.msra.mxu0 %v5609_v0  ;;  %2363 = vmatpush1.bf16.msra.mxu1 %v5610_v9  ;;  %v5620_v0 = vld [vmem:[#allocation62_spill] sm:$0xff]  ;;  %v5621_v9 = vld [vmem:[#allocation63_spill] sm:$0xff] }
 0x6e8   :  { %2323 = vmatprep.subr.bf16.mxu0 %v5611_v60  ;;  %2364 = vmatprep.subr.bf16.mxu1 %v5612_v6  ;;  %v5622_v60 = vld [vmem:[#allocation64_spill] sm:$0xff]  ;;  %v5623_v6 = vld [vmem:[#allocation65_spill] sm:$0xff] }
 0x6eb   :  { %2324 = vmatpush1.bf16.msra.mxu0 %v5613_v63  ;;  %2365 = vmatpush1.bf16.msra.mxu1 %v5614_v50  ;;  %v5624_v63 = vld [vmem:[#allocation66_spill] sm:$0xff]  ;;  %v5625_v50 = vld [vmem:[#allocation67_spill] sm:$0xff] }
 0x6ec   :  { %2325 = vmatprep.subr.bf16.mxu0 %v5615_v34  ;;  %2366 = vmatprep.subr.bf16.mxu1 %v5616_v25  ;;  %v5626_v34 = vld [vmem:[#allocation68_spill] sm:$0xff]  ;;  %v5627_v25 = vld [vmem:[#allocation69_spill] sm:$0xff] }
 0x6ef   :  { %2326 = vmatpush1.bf16.msra.mxu0 %v5617_v2  ;;  %2367 = vmatpush1.bf16.msra.mxu1 %v5618_v4  ;;  %v5628_v2 = vld [vmem:[#allocation70_spill] sm:$0xff]  ;;  %v5629_v4 = vld [vmem:[#allocation71_spill] sm:$0xff] }
 0x6f0   :  { %2327 = vmatprep.subr.bf16.mxu0 %v5619_v48  ;;  %2368 = vmatprep.subr.bf16.mxu1 %v5620_v0  ;;  %v5630_v48 = vld [vmem:[#allocation72_spill] sm:$0xff]  ;;  %v5631_v0 = vld [vmem:[#allocation73_spill] sm:$0xff] }
 0x6f3   :  { %2328 = vmatpush1.bf16.msra.mxu0 %v5621_v9  ;;  %2369 = vmatpush1.bf16.msra.mxu1 %v5622_v60  ;;  %v5632_v9 = vld [vmem:[#allocation74_spill] sm:$0xff]  ;;  %v5633_v60 = vld [vmem:[#allocation75_spill] sm:$0xff] }
 0x6f4   :  { %2329 = vmatprep.subr.bf16.mxu0 %v5623_v6  ;;  %2370 = vmatprep.subr.bf16.mxu1 %v5624_v63  ;;  %v5634_v6 = vld [vmem:[#allocation76_spill] sm:$0xff]  ;;  %v5635_v63 = vld [vmem:[#allocation77_spill] sm:$0xff] }
 0x6f7   :  { %2330 = vmatpush1.bf16.msra.mxu0 %v5625_v50  ;;  %2371 = vmatpush1.bf16.msra.mxu1 %v5626_v34  ;;  %v5636_v50 = vld [vmem:[#allocation78_spill] sm:$0xff] }
 0x6f8   :  { %2331 = vmatprep.subr.bf16.mxu0 %v5627_v25  ;;  %2372 = vmatprep.subr.bf16.mxu1 %v5628_v2 }
 0x6fb   :  { %2332 = vmatpush1.bf16.msra.mxu0 %v5629_v4  ;;  %2373 = vmatpush1.bf16.msra.mxu1 %v5630_v48 }
 0x6fc   :  { %2333 = vmatprep.subr.bf16.mxu0 %v5631_v0  ;;  %2374 = vmatprep.subr.bf16.mxu1 %v5632_v9  ;;  %v2047_v0 = vld [vmem:[#allocation4 + $0xa8] sm:$0xff] }
 0x6fd   :  { %v2052_v9 = vunpack.c.l.bf16 %v2047_v0 }
 0x6ff   :  { %2334 = vmatpush1.bf16.msra.mxu0 %v5633_v60  ;;  %2375 = vmatpush1.bf16.msra.mxu1 %v5634_v6  ;;  %v2053_v60 = vunpack.c.h.bf16 %v2047_v0 }
 0x700   :  { %2385 = vmatprep.subr.bf16.mxu0 %v5635_v63  ;;  %2426 = vmatprep.subr.bf16.mxu1 %v5636_v50 }
 0x755   :  { %v2092_v34 = vpop.f32.mrb[40].mxu0  ;;  %v2133_v25 = vpop.f32.mrb[40].mxu1 }
 0x756   :  { %v2094_v10 = vpop.f32.mrb[41].mxu0  ;;  %v2135_v2 = vpop.f32.mrb[41].mxu1  ;;  %v2093_v58 = vadd.f32 %v2092_v34, %v2050_v13  ;;  %v2134_v6 = vadd.f32 %v2133_v25, %v2052_v9 }
 0x757   :  { %v2096_v44 = vpop.f32.mrb[42].mxu0  ;;  %v2137_v4 = vpop.f32.mrb[42].mxu1  ;;  %v2095_v26 = vadd.f32 %v2094_v10, %v2051_v1  ;;  %v2136_v63 = vadd.f32 %v2135_v2, %v2053_v60  ;;  %v2056_v1 = vunpack.c.l.bf16 %v2049_v32 }
 0x758   :  { %v2097_v56 = vpop.f32.mrb[43].mxu0  ;;  %v2138_v48 = vpop.f32.mrb[43].mxu1  ;;  %v2955_v55 = vmul.f32 -1.442695, %v2093_v58  ;;  %v2957_v50 = vmul.f32 -1.442695, %v2134_v6  ;;  %v2057_v6 = vunpack.c.h.bf16 %v2049_v32 }
 0x759   :  { %v2956_v14 = vmul.f32 -1.442695, %v2095_v26  ;;  %v2958_v62 = vmul.f32 -1.442695, %v2136_v63  ;;  %v2048_v48 = vld [vmem:[#allocation4 + $0xb0] sm:$0xff] }
 0x75a   :  { %3152 = vpow2.f32 %v2955_v55  ;;  %v2054_v34 = vunpack.c.l.bf16 %v2048_v48  ;;  %v2055_v58 = vunpack.c.h.bf16 %v2048_v48 }
 0x75b   :  { %3154 = vpow2.f32 %v2957_v50 }
 0x75c   :  { %3156 = vpow2.f32 %v2956_v14 }
 0x75d   :  { %3158 = vpow2.f32 %v2958_v62 }
 0x764   :  { %v3153_v56 = vpop.eup %3152 }
 0x765   :  { %v3155_v44 = vpop.eup %3154  ;;  %v2228_v19 = vadd.f32 1.0, %v3153_v56 }
 0x766   :  { %v3157_v4 = vpop.eup %3156  ;;  %v2240_v0 = vadd.f32 1.0, %v3155_v44 }
 0x767   :  { %v3159_v61 = vpop.eup %3158  ;;  %v2229_v13 = vadd.f32 1.0, %v3157_v4  ;;  %3160 = vrcp.f32 %v2228_v19 }
 0x768   :  { %v2241_v10 = vadd.f32 1.0, %v3159_v61  ;;  %3162 = vrcp.f32 %v2240_v0 }
 0x769   :  { %3164 = vrcp.f32 %v2229_v13 }
 0x76a   :  { %3166 = vrcp.f32 %v2241_v10 }
 0x771   :  { %v3161_v4 = vpop.eup %3160 }
 0x772   :  { %v3163_v48 = vpop.eup %3162 }
 0x773   :  { %v3165_v19 = vpop.eup %3164 }
 0x774   :  { %v3167_v0 = vpop.eup %3166 }
 0x795   :  { %v2174_v55 = vpop.f32.mrb[44].mxu0  ;;  %v2215_v26 = vpop.f32.mrb[44].mxu1 }
 0x796   :  { %v2175_v62 = vadd.f32 %v2174_v55, %v2054_v34  ;;  %v2216_v14 = vadd.f32 %v2215_v26, %v2056_v1  ;;  %v2176_v63 = vpop.f32.mrb[45].mxu0  ;;  %v2217_v50 = vpop.f32.mrb[45].mxu1  ;;  %v2260_v1 = vmul.f32 %v3163_v48, %v4393_v11  ;;  %v5639_v48 = vld [vmem:[#allocation119_spill] sm:$0xff] }
 0x797   :  { %v2177_v2 = vadd.f32 %v2176_v63, %v2055_v58  ;;  %v2218_v9 = vadd.f32 %v2217_v50, %v2057_v6  ;;  %v2178_v60 = vpop.f32.mrb[46].mxu0  ;;  %v2219_v25 = vpop.f32.mrb[46].mxu1  ;;  %v2261_v6 = vmul.f32 %v3167_v0, %v4395_v53  ;;  %v5641_v0 = vld [vmem:[#allocation121_spill] sm:$0xff] }
 0x798   :  { %3168 = vtanh.f32 %v2175_v62  ;;  %v2959_v56 = vmul.f32 -1.442695, %v2216_v14  ;;  %v2179_v44 = vpop.f32.mrb[47].mxu0  ;;  %v2220_v61 = vpop.f32.mrb[47].mxu1 }
 0x799   :  { %3170 = vtanh.f32 %v2177_v2  ;;  %v2960_v32 = vmul.f32 -1.442695, %v2218_v9 }
 0x79a   :  { %3172 = vpow2.f32 %v2959_v56 }
 0x79b   :  { %3174 = vpow2.f32 %v2960_v32  ;;  %v5637_v32 = vld [vmem:[#allocation117_spill] sm:$0xff] }
 0x7a2   :  { %v3169_v13 = vpop.eup %3168 }
 0x7a3   :  { %v3171_v34 = vpop.eup %3170  ;;  %v2262_v10 = vmul.f32 %v3169_v13, %v3161_v4  ;;  %v5638_v4 = vld [vmem:[#allocation118_spill] sm:$0xff] }
 0x7a4   :  { %v3173_v58 = vpop.eup %3172  ;;  %v2263_v55 = vmul.f32 %v3171_v34, %v3165_v19  ;;  %v5640_v19 = vld [vmem:[#allocation120_spill] sm:$0xff]  ;;  %v5642_v13 = vld [vmem:[#allocation122_spill] sm:$0xff]  ;;  %v5643_v34 = vld [vmem:[#allocation123_spill] sm:$0xff] }
 0x7a5   :  { %v3175_v26 = vpop.eup %3174  ;;  %v4535_v62 = vadd.f32 %v2262_v10, %v2260_v1  ;;  %v2254_v14 = vadd.f32 1.0, %v3173_v58  ;;  %v5644_v1 = vld [vmem:[#allocation124_spill] sm:$0xff]  ;;  %v5645_v10 = vld [vmem:[#allocation125_spill] sm:$0xff]  ;;  %v5646_v58 = vld [vmem:[#allocation126_spill] sm:$0xff] }
 0x7a6   :  { %v4537_v63 = vadd.f32 %v2263_v55, %v2261_v6  ;;  %v2255_v50 = vadd.f32 1.0, %v3175_v26  ;;  %v5647_v6 = vld [vmem:[#allocation127_spill] sm:$0xff]  ;;  %v5648_v55 = vld [vmem:[#allocation128_spill] sm:$0xff]  ;;  %v5649_v26 = vld [vmem:[#allocation129_spill] sm:$0xff] }
 0x7a7   :  { %3176 = vtanh.f32 %v4535_v62 }
 0x7a8   :  { %3178 = vrcp.f32 %v2254_v14  ;;  %v5650_v14 = vld [vmem:[#allocation130_spill] sm:$0xff] }
 0x7a9   :  { %3180 = vtanh.f32 %v4537_v63 }
 0x7aa   :  { %3182 = vrcp.f32 %v2255_v50  ;;  %v5651_v50 = vld [vmem:[#allocation131_spill] sm:$0xff] }
 0x7b1   :  { %v3177_v2 = vpop.eup %3176 }
 0x7b2   :  { %v3179_v11 = vpop.eup %3178 }
 0x7b3   :  { %v3181_v9 = vpop.eup %3180  ;;  %v2268_v60 = vmul.f32 %v3179_v11, %v3177_v2  ;;  %v5652_v2 = vld [vmem:[#allocation132_spill] sm:$0xff]  ;;  %v5653_v11 = vld [vmem:[#allocation133_spill] sm:$0xff] }
 0x7b4   :  { %v3183_v25 = vpop.eup %3182 }
 0x7b5   :  { %v2269_v53 = vmul.f32 %v3183_v25, %v3181_v9  ;;  %v4541_v61 = vpack.c.bf16 %v2268_v60, %v2268_v60  ;;  %v5654_v9 = vld [vmem:[#allocation134_spill] sm:$0xff]  ;;  %v5656_v25 = vld [vmem:[#allocation136_spill] sm:$0xff] }
 0x7b7   :  { %v2289_v56 = vpack.c.bf16 %v2269_v53, %v2269_v53  ;;  %v2981_v44 = vpack.c.bf16 %v2269_v53, %v2268_v60  ;;  %v5655_v60 = vld [vmem:[#allocation135_spill] sm:$0xff]  ;;  %v5657_v53 = vld [vmem:[#allocation137_spill] sm:$0xff] }
 0x7b9   :  { %2335 = vmatprep.mubr.bf16.mxu0 %v2289_v56  ;;  %2376 = vmatprep.mubr.bf16.mxu1 %v2289_v56  ;;  %2279 = vst [vmem:[#allocation9 + $0x28] sm:$0xff] %v2981_v44  ;;  %v5659_v44 = vld [vmem:[#allocation139_spill] sm:$0xff] }
 0x7ba   :  { %2336 = vmatmul.mubr.bf16.vlgmr.msra.gmra.mrb[48].mxu0 %v4541_v61  ;;  %2377 = vmatmul.mubr.bf16.vlgmr.msra.gmra.mrb[48].mxu1 %v4541_v61 }
 0x7bb   :  { %2386 = vmatpush1.bf16.msra.mxu0 %v5189_v42  ;;  %2427 = vmatpush1.bf16.msra.mxu1 %v5190_v24 }
 0x7bc   :  { %2417 = vmatprep.mubr.bf16.mxu0 %v2289_v56  ;;  %2458 = vmatprep.mubr.bf16.mxu1 %v2289_v56  ;;  %v5658_v56 = vld [vmem:[#allocation138_spill] sm:$0xff] }
 0x7bd   :  { %2387 = vmatprep.subr.bf16.mxu0 %v5191_v47  ;;  %2428 = vmatprep.subr.bf16.mxu1 %v5192_v23 }
 0x7bf   :  { %2388 = vmatpush1.bf16.msra.mxu0 %v5193_v3  ;;  %2429 = vmatpush1.bf16.msra.mxu1 %v5194_v18 }
 0x7c0   :  { %2389 = vmatprep.subr.bf16.mxu0 %v5195_v39  ;;  %2430 = vmatprep.subr.bf16.mxu1 %v5196_v12 }
 0x7c3   :  { %2390 = vmatpush1.bf16.msra.mxu0 %v5197_v7  ;;  %2431 = vmatpush1.bf16.msra.mxu1 %v5198_v5 }
 0x7c4   :  { %2391 = vmatprep.subr.bf16.mxu0 %v5277_v15  ;;  %2432 = vmatprep.subr.bf16.mxu1 %v5278_v54 }
 0x7c7   :  { %2392 = vmatpush1.bf16.msra.mxu0 %v5279_v59  ;;  %2433 = vmatpush1.bf16.msra.mxu1 %v5280_v30 }
 0x7c8   :  { %2393 = vmatprep.subr.bf16.mxu0 %v5281_v33  ;;  %2434 = vmatprep.subr.bf16.mxu1 %v5282_v29 }
 0x7cb   :  { %2394 = vmatpush1.bf16.msra.mxu0 %v5283_v38  ;;  %2435 = vmatpush1.bf16.msra.mxu1 %v5284_v28 }
 0x7cc   :  { %2395 = vmatprep.subr.bf16.mxu0 %v5285_v37  ;;  %2436 = vmatprep.subr.bf16.mxu1 %v5286_v27 }
 0x7cf   :  { %2396 = vmatpush1.bf16.msra.mxu0 %v5287_v43  ;;  %2437 = vmatpush1.bf16.msra.mxu1 %v5288_v21 }
 0x7d0   :  { %2397 = vmatprep.subr.bf16.mxu0 %v5367_v40  ;;  %2438 = vmatprep.subr.bf16.mxu1 %v5368_v31 }
 0x7d3   :  { %2398 = vmatpush1.bf16.msra.mxu0 %v5369_v49  ;;  %2439 = vmatpush1.bf16.msra.mxu1 %v5370_v17 }
 0x7d4   :  { %2399 = vmatprep.subr.bf16.mxu0 %v5293_v8  ;;  %2440 = vmatprep.subr.bf16.mxu1 %v5294_v51 }
 0x7d7   :  { %2400 = vmatpush1.bf16.msra.mxu0 %v5295_v52  ;;  %2441 = vmatpush1.bf16.msra.mxu1 %v5371_v57 }
 0x7d8   :  { %2401 = vmatprep.subr.bf16.mxu0 %v5297_v41  ;;  %2442 = vmatprep.subr.bf16.mxu1 %v5298_v35 }
 0x7db   :  { %2402 = vmatpush1.bf16.msra.mxu0 %v5299_v36  ;;  %2443 = vmatpush1.bf16.msra.mxu1 %v5300_v22 }
 0x7dc   :  { %2403 = vmatprep.subr.bf16.mxu0 %v5301_v20  ;;  %2444 = vmatprep.subr.bf16.mxu1 %v5302_v45 }
 0x7df   :  { %2404 = vmatpush1.bf16.msra.mxu0 %v5303_v46  ;;  %2445 = vmatpush1.bf16.msra.mxu1 %v5226_v16 }
 0x7e0   :  { %2405 = vmatprep.subr.bf16.mxu0 %v5637_v32  ;;  %2446 = vmatprep.subr.bf16.mxu1 %v5638_v4  ;;  %v2294_v4 = vld [vmem:[#allocation4 + $0xd8] sm:$0xff] }
 0x7e3   :  { %2406 = vmatpush1.bf16.msra.mxu0 %v5639_v48  ;;  %2447 = vmatpush1.bf16.msra.mxu1 %v5640_v19 }
 0x7e4   :  { %2407 = vmatprep.subr.bf16.mxu0 %v5641_v0  ;;  %2448 = vmatprep.subr.bf16.mxu1 %v5642_v13 }
 0x7e7   :  { %2408 = vmatpush1.bf16.msra.mxu0 %v5643_v34  ;;  %2449 = vmatpush1.bf16.msra.mxu1 %v5644_v1 }
 0x7e8   :  { %2409 = vmatprep.subr.bf16.mxu0 %v5645_v10  ;;  %2450 = vmatprep.subr.bf16.mxu1 %v5646_v58  ;;  %v2291_v58 = vld [vmem:[#allocation4 + $0xc0] sm:$0xff] }
 0x7e9   :  { %v2295_v10 = vunpack.c.l.bf16 %v2291_v58  ;;  %v2296_v1 = vunpack.c.h.bf16 %v2291_v58 }
 0x7eb   :  { %2410 = vmatpush1.bf16.msra.mxu0 %v5647_v6  ;;  %2451 = vmatpush1.bf16.msra.mxu1 %v5648_v55 }
 0x7ec   :  { %2411 = vmatprep.subr.bf16.mxu0 %v5649_v26  ;;  %2452 = vmatprep.subr.bf16.mxu1 %v5650_v14  ;;  %v5660_v26 = vld [vmem:[#allocation140_spill] sm:$0xff]  ;;  %v5661_v14 = vld [vmem:[#allocation13_spill] sm:$0xff] }
 0x7ef   :  { %2412 = vmatpush1.bf16.msra.mxu0 %v5651_v50  ;;  %2453 = vmatpush1.bf16.msra.mxu1 %v5652_v2  ;;  %v5662_v50 = vld [vmem:[#allocation15_spill] sm:$0xff] }
 0x7f0   :  { %2413 = vmatprep.subr.bf16.mxu0 %v5653_v11  ;;  %2454 = vmatprep.subr.bf16.mxu1 %v5654_v9  ;;  %v5663_v9 = vld [vmem:[#allocation14_spill] sm:$0xff]  ;;  %v5672_v11 = vld [vmem:[#allocation24_spill] sm:$0xff] }
 0x7f3   :  { %2414 = vmatpush1.bf16.msra.mxu0 %v5655_v60  ;;  %2455 = vmatpush1.bf16.msra.mxu1 %v5656_v25  ;;  %v5664_v60 = vld [vmem:[#allocation16_spill] sm:$0xff]  ;;  %v5665_v25 = vld [vmem:[#allocation17_spill] sm:$0xff] }
 0x7f4   :  { %2415 = vmatprep.subr.bf16.mxu0 %v5657_v53  ;;  %2456 = vmatprep.subr.bf16.mxu1 %v5658_v56  ;;  %v5666_v53 = vld [vmem:[#allocation18_spill] sm:$0xff]  ;;  %v5667_v56 = vld [vmem:[#allocation19_spill] sm:$0xff] }
 0x7f7   :  { %2416 = vmatpush1.bf16.msra.mxu0 %v5659_v44  ;;  %2457 = vmatpush1.bf16.msra.mxu1 %v5660_v26  ;;  %v5668_v44 = vld [vmem:[#allocation20_spill] sm:$0xff]  ;;  %v5669_v26 = vld [vmem:[#allocation21_spill] sm:$0xff] }
 0x7f8   :  { %2548 = vmatprep.subr.bf16.mxu0 %v5661_v14  ;;  %2589 = vmatprep.subr.bf16.mxu1 %v5662_v50  ;;  %v5670_v14 = vld [vmem:[#allocation22_spill] sm:$0xff]  ;;  %v5671_v50 = vld [vmem:[#allocation23_spill] sm:$0xff] }
 0x7fa   :  { %2418 = vmatmul.mubr.bf16.vlgmr.msra.gmra.mrb[52].mxu0 %v4541_v61  ;;  %2459 = vmatmul.mubr.bf16.vlgmr.msra.gmra.mrb[52].mxu1 %v4541_v61  ;;  %v5673_v61 = vld [vmem:[#allocation25_spill] sm:$0xff] }
 0x7fb   :  { %2549 = vmatpush1.bf16.msra.mxu0 %v5663_v9  ;;  %2590 = vmatpush1.bf16.msra.mxu1 %v5664_v60  ;;  %v5674_v9 = vld [vmem:[#allocation26_spill] sm:$0xff]  ;;  %v5675_v60 = vld [vmem:[#allocation27_spill] sm:$0xff] }
 0x7fc   :  { %2550 = vmatprep.subr.bf16.mxu0 %v5665_v25  ;;  %2591 = vmatprep.subr.bf16.mxu1 %v5666_v53  ;;  %v5676_v25 = vld [vmem:[#allocation28_spill] sm:$0xff]  ;;  %v5677_v53 = vld [vmem:[#allocation29_spill] sm:$0xff] }
 0x7ff   :  { %2551 = vmatpush1.bf16.msra.mxu0 %v5667_v56  ;;  %2592 = vmatpush1.bf16.msra.mxu1 %v5668_v44  ;;  %v5678_v56 = vld [vmem:[#allocation30_spill] sm:$0xff]  ;;  %v5679_v44 = vld [vmem:[#allocation31_spill] sm:$0xff] }
 0x800   :  { %2552 = vmatprep.subr.bf16.mxu0 %v5669_v26  ;;  %2593 = vmatprep.subr.bf16.mxu1 %v5670_v14  ;;  %v5680_v26 = vld [vmem:[#allocation32_spill] sm:$0xff]  ;;  %v5681_v14 = vld [vmem:[#allocation33_spill] sm:$0xff] }
 0x803   :  { %2553 = vmatpush1.bf16.msra.mxu0 %v5671_v50  ;;  %2594 = vmatpush1.bf16.msra.mxu1 %v5672_v11  ;;  %v5682_v50 = vld [vmem:[#allocation34_spill] sm:$0xff]  ;;  %v5683_v11 = vld [vmem:[#allocation35_spill] sm:$0xff] }
 0x804   :  { %2554 = vmatprep.subr.bf16.mxu0 %v5673_v61  ;;  %2595 = vmatprep.subr.bf16.mxu1 %v5674_v9  ;;  %v5684_v61 = vld [vmem:[#allocation36_spill] sm:$0xff]  ;;  %v5685_v9 = vld [vmem:[#allocation37_spill] sm:$0xff] }
 0x807   :  { %2555 = vmatpush1.bf16.msra.mxu0 %v5675_v60  ;;  %2596 = vmatpush1.bf16.msra.mxu1 %v5676_v25  ;;  %v5686_v60 = vld [vmem:[#allocation38_spill] sm:$0xff]  ;;  %v5687_v25 = vld [vmem:[#allocation39_spill] sm:$0xff] }
 0x808   :  { %2556 = vmatprep.subr.bf16.mxu0 %v5677_v53  ;;  %2597 = vmatprep.subr.bf16.mxu1 %v5678_v56  ;;  %v5688_v53 = vld [vmem:[#allocation40_spill] sm:$0xff]  ;;  %v5689_v56 = vld [vmem:[#allocation41_spill] sm:$0xff] }
 0x80b   :  { %2557 = vmatpush1.bf16.msra.mxu0 %v5679_v44  ;;  %2598 = vmatpush1.bf16.msra.mxu1 %v5680_v26  ;;  %v5690_v44 = vld [vmem:[#allocation42_spill] sm:$0xff]  ;;  %v5691_v26 = vld [vmem:[#allocation43_spill] sm:$0xff] }
 0x80c   :  { %2558 = vmatprep.subr.bf16.mxu0 %v5681_v14  ;;  %2599 = vmatprep.subr.bf16.mxu1 %v5682_v50  ;;  %v5692_v14 = vld [vmem:[#allocation44_spill] sm:$0xff]  ;;  %v5693_v50 = vld [vmem:[#allocation45_spill] sm:$0xff] }
 0x80f   :  { %2559 = vmatpush1.bf16.msra.mxu0 %v5683_v11  ;;  %2600 = vmatpush1.bf16.msra.mxu1 %v5684_v61  ;;  %v5694_v11 = vld [vmem:[#allocation46_spill] sm:$0xff]  ;;  %v5695_v61 = vld [vmem:[#allocation47_spill] sm:$0xff] }
 0x810   :  { %2560 = vmatprep.subr.bf16.mxu0 %v5685_v9  ;;  %2601 = vmatprep.subr.bf16.mxu1 %v5686_v60  ;;  %v5696_v9 = vld [vmem:[#allocation48_spill] sm:$0xff]  ;;  %v5697_v60 = vld [vmem:[#allocation49_spill] sm:$0xff] }
 0x813   :  { %2561 = vmatpush1.bf16.msra.mxu0 %v5687_v25  ;;  %2602 = vmatpush1.bf16.msra.mxu1 %v5688_v53  ;;  %v5698_v25 = vld [vmem:[#allocation50_spill] sm:$0xff]  ;;  %v5699_v53 = vld [vmem:[#allocation51_spill] sm:$0xff] }
 0x814   :  { %2562 = vmatprep.subr.bf16.mxu0 %v5689_v56  ;;  %2603 = vmatprep.subr.bf16.mxu1 %v5690_v44  ;;  %v5700_v56 = vld [vmem:[#allocation52_spill] sm:$0xff]  ;;  %v5701_v44 = vld [vmem:[#allocation53_spill] sm:$0xff] }
 0x817   :  { %2563 = vmatpush1.bf16.msra.mxu0 %v5691_v26  ;;  %2604 = vmatpush1.bf16.msra.mxu1 %v5692_v14  ;;  %v5702_v26 = vld [vmem:[#allocation54_spill] sm:$0xff]  ;;  %v5703_v14 = vld [vmem:[#allocation55_spill] sm:$0xff] }
 0x818   :  { %2564 = vmatprep.subr.bf16.mxu0 %v5693_v50  ;;  %2605 = vmatprep.subr.bf16.mxu1 %v5694_v11  ;;  %v5704_v50 = vld [vmem:[#allocation56_spill] sm:$0xff]  ;;  %v5705_v11 = vld [vmem:[#allocation57_spill] sm:$0xff] }
 0x81b   :  { %2565 = vmatpush1.bf16.msra.mxu0 %v5695_v61  ;;  %2606 = vmatpush1.bf16.msra.mxu1 %v5696_v9  ;;  %v5706_v61 = vld [vmem:[#allocation58_spill] sm:$0xff]  ;;  %v5707_v9 = vld [vmem:[#allocation59_spill] sm:$0xff] }
 0x81c   :  { %2566 = vmatprep.subr.bf16.mxu0 %v5697_v60  ;;  %2607 = vmatprep.subr.bf16.mxu1 %v5698_v25  ;;  %v5708_v60 = vld [vmem:[#allocation60_spill] sm:$0xff]  ;;  %v5709_v25 = vld [vmem:[#allocation61_spill] sm:$0xff] }
 0x81f   :  { %2567 = vmatpush1.bf16.msra.mxu0 %v5699_v53  ;;  %2608 = vmatpush1.bf16.msra.mxu1 %v5700_v56  ;;  %v5710_v53 = vld [vmem:[#allocation62_spill] sm:$0xff]  ;;  %v5711_v56 = vld [vmem:[#allocation63_spill] sm:$0xff] }
 0x820   :  { %2568 = vmatprep.subr.bf16.mxu0 %v5701_v44  ;;  %2609 = vmatprep.subr.bf16.mxu1 %v5702_v26  ;;  %v5712_v44 = vld [vmem:[#allocation64_spill] sm:$0xff]  ;;  %v5713_v26 = vld [vmem:[#allocation65_spill] sm:$0xff] }
 0x823   :  { %2569 = vmatpush1.bf16.msra.mxu0 %v5703_v14  ;;  %2610 = vmatpush1.bf16.msra.mxu1 %v5704_v50  ;;  %v5714_v14 = vld [vmem:[#allocation66_spill] sm:$0xff]  ;;  %v5715_v50 = vld [vmem:[#allocation67_spill] sm:$0xff] }
 0x824   :  { %2570 = vmatprep.subr.bf16.mxu0 %v5705_v11  ;;  %2611 = vmatprep.subr.bf16.mxu1 %v5706_v61  ;;  %v5716_v11 = vld [vmem:[#allocation68_spill] sm:$0xff]  ;;  %v5717_v61 = vld [vmem:[#allocation69_spill] sm:$0xff] }
 0x827   :  { %2571 = vmatpush1.bf16.msra.mxu0 %v5707_v9  ;;  %2612 = vmatpush1.bf16.msra.mxu1 %v5708_v60  ;;  %v5718_v9 = vld [vmem:[#allocation70_spill] sm:$0xff]  ;;  %v5719_v60 = vld [vmem:[#allocation71_spill] sm:$0xff] }
 0x828   :  { %2572 = vmatprep.subr.bf16.mxu0 %v5709_v25  ;;  %2613 = vmatprep.subr.bf16.mxu1 %v5710_v53  ;;  %v5720_v25 = vld [vmem:[#allocation72_spill] sm:$0xff]  ;;  %v5721_v53 = vld [vmem:[#allocation73_spill] sm:$0xff] }
 0x82b   :  { %2573 = vmatpush1.bf16.msra.mxu0 %v5711_v56  ;;  %2614 = vmatpush1.bf16.msra.mxu1 %v5712_v44  ;;  %v5722_v56 = vld [vmem:[#allocation74_spill] sm:$0xff]  ;;  %v5723_v44 = vld [vmem:[#allocation75_spill] sm:$0xff] }
 0x82c   :  { %2574 = vmatprep.subr.bf16.mxu0 %v5713_v26  ;;  %2615 = vmatprep.subr.bf16.mxu1 %v5714_v14  ;;  %v5724_v26 = vld [vmem:[#allocation76_spill] sm:$0xff]  ;;  %v5725_v14 = vld [vmem:[#allocation77_spill] sm:$0xff] }
 0x82f   :  { %2575 = vmatpush1.bf16.msra.mxu0 %v5715_v50  ;;  %2616 = vmatpush1.bf16.msra.mxu1 %v5716_v11  ;;  %v5726_v50 = vld [vmem:[#allocation78_spill] sm:$0xff] }
 0x830   :  { %2576 = vmatprep.subr.bf16.mxu0 %v5717_v61  ;;  %2617 = vmatprep.subr.bf16.mxu1 %v5718_v9 }
 0x833   :  { %2577 = vmatpush1.bf16.msra.mxu0 %v5719_v60  ;;  %2618 = vmatpush1.bf16.msra.mxu1 %v5720_v25 }
 0x834   :  { %2578 = vmatprep.subr.bf16.mxu0 %v5721_v53  ;;  %2619 = vmatprep.subr.bf16.mxu1 %v5722_v56  ;;  %v2292_v53 = vld [vmem:[#allocation4 + $0xc8] sm:$0xff] }
 0x835   :  { %v2297_v56 = vunpack.c.l.bf16 %v2292_v53 }
 0x837   :  { %2579 = vmatpush1.bf16.msra.mxu0 %v5723_v44  ;;  %2620 = vmatpush1.bf16.msra.mxu1 %v5724_v26  ;;  %v2298_v44 = vunpack.c.h.bf16 %v2292_v53 }
 0x838   :  { %2630 = vmatprep.subr.bf16.mxu0 %v5725_v14  ;;  %2671 = vmatprep.subr.bf16.mxu1 %v5726_v50 }
 0x88d   :  { %v2337_v11 = vpop.f32.mrb[48].mxu0  ;;  %v2378_v61 = vpop.f32.mrb[48].mxu1 }
 0x88e   :  { %v2339_v2 = vpop.f32.mrb[49].mxu0  ;;  %v2380_v9 = vpop.f32.mrb[49].mxu1  ;;  %v2338_v34 = vadd.f32 %v2337_v11, %v2295_v10  ;;  %v2379_v26 = vadd.f32 %v2378_v61, %v2297_v56  ;;  %v2302_v61 = vunpack.c.h.bf16 %v2294_v4 }
 0x88f   :  { %v2341_v55 = vpop.f32.mrb[50].mxu0  ;;  %v2382_v60 = vpop.f32.mrb[50].mxu1  ;;  %v2340_v13 = vadd.f32 %v2339_v2, %v2296_v1  ;;  %v2381_v14 = vadd.f32 %v2380_v9, %v2298_v44  ;;  %v2301_v1 = vunpack.c.l.bf16 %v2294_v4 }
 0x890   :  { %v2342_v6 = vpop.f32.mrb[51].mxu0  ;;  %v2383_v25 = vpop.f32.mrb[51].mxu1  ;;  %v2962_v0 = vmul.f32 -1.442695, %v2338_v34  ;;  %v2964_v50 = vmul.f32 -1.442695, %v2379_v26 }
 0x891   :  { %v2963_v19 = vmul.f32 -1.442695, %v2340_v13  ;;  %v2965_v48 = vmul.f32 -1.442695, %v2381_v14  ;;  %v2293_v25 = vld [vmem:[#allocation4 + $0xd0] sm:$0xff] }
 0x892   :  { %3184 = vpow2.f32 %v2962_v0  ;;  %v2299_v11 = vunpack.c.l.bf16 %v2293_v25  ;;  %v2300_v34 = vunpack.c.h.bf16 %v2293_v25 }
 0x893   :  { %3186 = vpow2.f32 %v2964_v50 }
 0x894   :  { %3188 = vpow2.f32 %v2963_v19 }
 0x895   :  { %3190 = vpow2.f32 %v2965_v48 }
 0x89c   :  { %v3185_v6 = vpop.eup %3184 }
 0x89d   :  { %v3187_v55 = vpop.eup %3186  ;;  %v2473_v58 = vadd.f32 1.0, %v3185_v6 }
 0x89e   :  { %v3189_v60 = vpop.eup %3188  ;;  %v2485_v53 = vadd.f32 1.0, %v3187_v55 }
 0x89f   :  { %v3191_v32 = vpop.eup %3190  ;;  %v2474_v10 = vadd.f32 1.0, %v3189_v60  ;;  %3192 = vrcp.f32 %v2473_v58 }
 0x8a0   :  { %v2486_v2 = vadd.f32 1.0, %v3191_v32  ;;  %3194 = vrcp.f32 %v2485_v53 }
 0x8a1   :  { %3196 = vrcp.f32 %v2474_v10 }
 0x8a2   :  { %3198 = vrcp.f32 %v2486_v2 }
 0x8a9   :  { %v3193_v60 = vpop.eup %3192 }
 0x8aa   :  { %v3195_v25 = vpop.eup %3194 }
 0x8ab   :  { %v3197_v58 = vpop.eup %3196 }
 0x8ac   :  { %v3199_v53 = vpop.eup %3198 }
 0x8cd   :  { %v2419_v0 = vpop.f32.mrb[52].mxu0  ;;  %v2460_v13 = vpop.f32.mrb[52].mxu1 }
 0x8ce   :  { %v2420_v48 = vadd.f32 %v2419_v0, %v2299_v11  ;;  %v2461_v19 = vadd.f32 %v2460_v13, %v2301_v1  ;;  %v2421_v9 = vpop.f32.mrb[53].mxu0  ;;  %v2462_v56 = vpop.f32.mrb[53].mxu1  ;;  %v2505_v1 = vmul.f32 %v3195_v25, %v4535_v62 }
 0x8cf   :  { %v2422_v44 = vadd.f32 %v2421_v9, %v2300_v34  ;;  %v2463_v26 = vadd.f32 %v2462_v56, %v2302_v61  ;;  %v2423_v14 = vpop.f32.mrb[54].mxu0  ;;  %v2464_v50 = vpop.f32.mrb[54].mxu1  ;;  %v2506_v61 = vmul.f32 %v3199_v53, %v4537_v63 }
 0x8d0   :  { %3200 = vtanh.f32 %v2420_v48  ;;  %v2966_v6 = vmul.f32 -1.442695, %v2461_v19  ;;  %v2424_v55 = vpop.f32.mrb[55].mxu0  ;;  %v2465_v32 = vpop.f32.mrb[55].mxu1 }
 0x8d1   :  { %3202 = vtanh.f32 %v2422_v44  ;;  %v2967_v4 = vmul.f32 -1.442695, %v2463_v26 }
 0x8d2   :  { %3204 = vpow2.f32 %v2966_v6 }
 0x8d3   :  { %3206 = vpow2.f32 %v2967_v4 }
 0x8da   :  { %v3201_v10 = vpop.eup %3200 }
 0x8db   :  { %v3203_v11 = vpop.eup %3202  ;;  %v2507_v2 = vmul.f32 %v3201_v10, %v3193_v60 }
 0x8dc   :  { %v3205_v34 = vpop.eup %3204  ;;  %v2508_v0 = vmul.f32 %v3203_v11, %v3197_v58 }
 0x8dd   :  { %v3207_v13 = vpop.eup %3206  ;;  %v4677_v48 = vadd.f32 %v2507_v2, %v2505_v1  ;;  %v2499_v19 = vadd.f32 1.0, %v3205_v34 }
 0x8de   :  { %v4679_v9 = vadd.f32 %v2508_v0, %v2506_v61  ;;  %v2500_v56 = vadd.f32 1.0, %v3207_v13  ;;  %v2538_v0 = vld [vmem:[#allocation4 + $0xf0] sm:$0xff]  ;;  %v2539_v13 = vld [vmem:[#allocation4 + $0xf8] sm:$0xff] }
 0x8df   :  { %3208 = vtanh.f32 %v4677_v48 }
 0x8e0   :  { %3210 = vrcp.f32 %v2499_v19 }
 0x8e1   :  { %3212 = vtanh.f32 %v4679_v9 }
 0x8e2   :  { %3214 = vrcp.f32 %v2500_v56 }
 0x8e9   :  { %v3209_v44 = vpop.eup %3208 }
 0x8ea   :  { %v3211_v62 = vpop.eup %3210 }
 0x8eb   :  { %v3213_v26 = vpop.eup %3212  ;;  %v2513_v14 = vmul.f32 %v3211_v62, %v3209_v44 }
 0x8ec   :  { %v3215_v50 = vpop.eup %3214 }
 0x8ed   :  { %v2514_v63 = vmul.f32 %v3215_v50, %v3213_v26  ;;  %v4683_v32 = vpack.c.bf16 %v2513_v14, %v2513_v14  ;;  %v2544_v26 = vunpack.c.l.bf16 %v2538_v0 }
 0x8ef   :  { %v2534_v6 = vpack.c.bf16 %v2514_v63, %v2514_v63  ;;  %v2982_v55 = vpack.c.bf16 %v2514_v63, %v2513_v14  ;;  %v2546_v14 = vunpack.c.l.bf16 %v2539_v13  ;;  %v2545_v63 = vunpack.c.h.bf16 %v2538_v0 }
 0x8f1   :  { %2580 = vmatprep.mubr.bf16.mxu0 %v2534_v6  ;;  %2621 = vmatprep.mubr.bf16.mxu1 %v2534_v6  ;;  %2524 = vst [vmem:[#allocation9 + $0x30] sm:$0xff] %v2982_v55 }
 0x8f2   :  { %2581 = vmatmul.mubr.bf16.vlgmr.msra.gmra.mrb[56].mxu0 %v4683_v32  ;;  %2622 = vmatmul.mubr.bf16.vlgmr.msra.gmra.mrb[56].mxu1 %v4683_v32 }
 0x8f3   :  { %2631 = vmatpush1.bf16.msra.mxu0 %v5189_v42  ;;  %2672 = vmatpush1.bf16.msra.mxu1 %v5190_v24  ;;  %v5727_v42 = vld [vmem:[#allocation117_spill] sm:$0xff]  ;;  %v5728_v24 = vld [vmem:[#allocation118_spill] sm:$0xff] }
 0x8f4   :  { %2662 = vmatprep.mubr.bf16.mxu0 %v2534_v6  ;;  %2703 = vmatprep.mubr.bf16.mxu1 %v2534_v6  ;;  %v2547_v6 = vunpack.c.h.bf16 %v2539_v13 }
 0x8f5   :  { %2632 = vmatprep.subr.bf16.mxu0 %v5191_v47  ;;  %2673 = vmatprep.subr.bf16.mxu1 %v5192_v23  ;;  %v5729_v47 = vld [vmem:[#allocation119_spill] sm:$0xff]  ;;  %v5730_v23 = vld [vmem:[#allocation120_spill] sm:$0xff] }
 0x8f7   :  { %2633 = vmatpush1.bf16.msra.mxu0 %v5193_v3  ;;  %2674 = vmatpush1.bf16.msra.mxu1 %v5194_v18  ;;  %v5731_v3 = vld [vmem:[#allocation121_spill] sm:$0xff]  ;;  %v5732_v18 = vld [vmem:[#allocation122_spill] sm:$0xff] }
 0x8f8   :  { %2634 = vmatprep.subr.bf16.mxu0 %v5195_v39  ;;  %2675 = vmatprep.subr.bf16.mxu1 %v5196_v12  ;;  %v5733_v39 = vld [vmem:[#allocation123_spill] sm:$0xff]  ;;  %v5734_v12 = vld [vmem:[#allocation124_spill] sm:$0xff] }
 0x8fb   :  { %2635 = vmatpush1.bf16.msra.mxu0 %v5197_v7  ;;  %2676 = vmatpush1.bf16.msra.mxu1 %v5198_v5  ;;  %v5735_v7 = vld [vmem:[#allocation125_spill] sm:$0xff]  ;;  %v5736_v5 = vld [vmem:[#allocation126_spill] sm:$0xff] }
 0x8fc   :  { %2636 = vmatprep.subr.bf16.mxu0 %v5277_v15  ;;  %2677 = vmatprep.subr.bf16.mxu1 %v5278_v54  ;;  %v5738_v15 = vld [vmem:[#allocation128_spill] sm:$0xff]  ;;  %v5739_v54 = vld [vmem:[#allocation129_spill] sm:$0xff] }
 0x8ff   :  { %2637 = vmatpush1.bf16.msra.mxu0 %v5279_v59  ;;  %2678 = vmatpush1.bf16.msra.mxu1 %v5280_v30  ;;  %v5740_v59 = vld [vmem:[#allocation130_spill] sm:$0xff]  ;;  %v5741_v30 = vld [vmem:[#allocation131_spill] sm:$0xff] }
 0x900   :  { %2638 = vmatprep.subr.bf16.mxu0 %v5281_v33  ;;  %2679 = vmatprep.subr.bf16.mxu1 %v5282_v29  ;;  %v5742_v33 = vld [vmem:[#allocation132_spill] sm:$0xff]  ;;  %v5743_v29 = vld [vmem:[#allocation133_spill] sm:$0xff] }
 0x903   :  { %2639 = vmatpush1.bf16.msra.mxu0 %v5283_v38  ;;  %2680 = vmatpush1.bf16.msra.mxu1 %v5284_v28  ;;  %v5744_v38 = vld [vmem:[#allocation134_spill] sm:$0xff]  ;;  %v5745_v28 = vld [vmem:[#allocation135_spill] sm:$0xff] }
 0x904   :  { %2640 = vmatprep.subr.bf16.mxu0 %v5285_v37  ;;  %2681 = vmatprep.subr.bf16.mxu1 %v5286_v27  ;;  %v5746_v37 = vld [vmem:[#allocation136_spill] sm:$0xff]  ;;  %v5747_v27 = vld [vmem:[#allocation137_spill] sm:$0xff] }
 0x907   :  { %2641 = vmatpush1.bf16.msra.mxu0 %v5287_v43  ;;  %2682 = vmatpush1.bf16.msra.mxu1 %v5288_v21  ;;  %v5748_v43 = vld [vmem:[#allocation138_spill] sm:$0xff]  ;;  %v5749_v21 = vld [vmem:[#allocation139_spill] sm:$0xff] }
 0x908   :  { %2642 = vmatprep.subr.bf16.mxu0 %v5367_v40  ;;  %2683 = vmatprep.subr.bf16.mxu1 %v5368_v31  ;;  %v2537_v40 = vld [vmem:[#allocation4 + $0xe8] sm:$0xff] }
 0x90b   :  { %2643 = vmatpush1.bf16.msra.mxu0 %v5369_v49  ;;  %2684 = vmatpush1.bf16.msra.mxu1 %v5370_v17  ;;  %v2542_v49 = vunpack.c.l.bf16 %v2537_v40 }
 0x90c   :  { %2644 = vmatprep.subr.bf16.mxu0 %v5293_v8  ;;  %2685 = vmatprep.subr.bf16.mxu1 %v5294_v51 }
 0x90f   :  { %2645 = vmatpush1.bf16.msra.mxu0 %v5295_v52  ;;  %2686 = vmatpush1.bf16.msra.mxu1 %v5371_v57  ;;  %v2543_v57 = vunpack.c.h.bf16 %v2537_v40 }
 0x910   :  { %2646 = vmatprep.subr.bf16.mxu0 %v5297_v41  ;;  %2687 = vmatprep.subr.bf16.mxu1 %v5298_v35 }
 0x913   :  { %2647 = vmatpush1.bf16.msra.mxu0 %v5299_v36  ;;  %2688 = vmatpush1.bf16.msra.mxu1 %v5300_v22  ;;  %v5750_v22 = vld [vmem:[#allocation140_spill] sm:$0xff]  ;;  %v2536_v36 = vld [vmem:[#allocation4 + $0xe0] sm:$0xff] }
 0x914   :  { %2648 = vmatprep.subr.bf16.mxu0 %v5301_v20  ;;  %2689 = vmatprep.subr.bf16.mxu1 %v5302_v45  ;;  %v2540_v31 = vunpack.c.l.bf16 %v2536_v36  ;;  %v2541_v17 = vunpack.c.h.bf16 %v2536_v36 }
 0x917   :  { %2649 = vmatpush1.bf16.msra.mxu0 %v5303_v46  ;;  %2690 = vmatpush1.bf16.msra.mxu1 %v5226_v16  ;;  %v5737_v16 = vld [vmem:[#allocation127_spill] sm:$0xff] }
 0x918   :  { %2650 = vmatprep.subr.bf16.mxu0 %v5727_v42  ;;  %2691 = vmatprep.subr.bf16.mxu1 %v5728_v24 }
 0x91b   :  { %2651 = vmatpush1.bf16.msra.mxu0 %v5729_v47  ;;  %2692 = vmatpush1.bf16.msra.mxu1 %v5730_v23 }
 0x91c   :  { %2652 = vmatprep.subr.bf16.mxu0 %v5731_v3  ;;  %2693 = vmatprep.subr.bf16.mxu1 %v5732_v18 }
 0x91f   :  { %2653 = vmatpush1.bf16.msra.mxu0 %v5733_v39  ;;  %2694 = vmatpush1.bf16.msra.mxu1 %v5734_v12 }
 0x920   :  { %2654 = vmatprep.subr.bf16.mxu0 %v5735_v7  ;;  %2695 = vmatprep.subr.bf16.mxu1 %v5736_v5 }
 0x923   :  { %2655 = vmatpush1.bf16.msra.mxu0 %v5737_v16  ;;  %2696 = vmatpush1.bf16.msra.mxu1 %v5738_v15 }
 0x924   :  { %2656 = vmatprep.subr.bf16.mxu0 %v5739_v54  ;;  %2697 = vmatprep.subr.bf16.mxu1 %v5740_v59 }
 0x927   :  { %2657 = vmatpush1.bf16.msra.mxu0 %v5741_v30  ;;  %2698 = vmatpush1.bf16.msra.mxu1 %v5742_v33 }
 0x928   :  { %2658 = vmatprep.subr.bf16.mxu0 %v5743_v29  ;;  %2699 = vmatprep.subr.bf16.mxu1 %v5744_v38 }
 0x92b   :  { %2659 = vmatpush1.bf16.msra.mxu0 %v5745_v28  ;;  %2700 = vmatpush1.bf16.msra.mxu1 %v5746_v37 }
 0x92c   :  { %2660 = vmatprep.subr.bf16.mxu0 %v5747_v27  ;;  %2701 = vmatprep.subr.bf16.mxu1 %v5748_v43 }
 0x92f   :  { %2661 = vmatpush1.bf16.msra.mxu0 %v5749_v21  ;;  %2702 = vmatpush1.bf16.msra.mxu1 %v5750_v22 }
 0x932   :  { %2663 = vmatmul.mubr.bf16.vlgmr.msra.gmra.mrb[60].mxu0 %v4683_v32  ;;  %2704 = vmatmul.mubr.bf16.vlgmr.msra.gmra.mrb[60].mxu1 %v4683_v32 }
 0x9c5   :  { %v2582_v20 = vpop.f32.mrb[56].mxu0  ;;  %v2623_v45 = vpop.f32.mrb[56].mxu1 }
 0x9c6   :  { %v2584_v46 = vpop.f32.mrb[57].mxu0  ;;  %v2625_v8 = vpop.f32.mrb[57].mxu1  ;;  %v2583_v4 = vadd.f32 %v2582_v20, %v2540_v31  ;;  %v2624_v60 = vadd.f32 %v2623_v45, %v2542_v49 }
 0x9c7   :  { %v2586_v51 = vpop.f32.mrb[58].mxu0  ;;  %v2627_v52 = vpop.f32.mrb[58].mxu1  ;;  %v2585_v25 = vadd.f32 %v2584_v46, %v2541_v17  ;;  %v2626_v58 = vadd.f32 %v2625_v8, %v2543_v57 }
 0x9c8   :  { %v2587_v41 = vpop.f32.mrb[59].mxu0  ;;  %v2628_v35 = vpop.f32.mrb[59].mxu1  ;;  %v2969_v53 = vmul.f32 -1.442695, %v2583_v4  ;;  %v2971_v10 = vmul.f32 -1.442695, %v2624_v60 }
 0x9c9   :  { %v2970_v11 = vmul.f32 -1.442695, %v2585_v25  ;;  %v2972_v1 = vmul.f32 -1.442695, %v2626_v58 }
 0x9ca   :  { %3216 = vpow2.f32 %v2969_v53 }
 0x9cb   :  { %3218 = vpow2.f32 %v2971_v10 }
 0x9cc   :  { %3220 = vpow2.f32 %v2970_v11 }
 0x9cd   :  { %3222 = vpow2.f32 %v2972_v1 }
 0x9d4   :  { %v3217_v2 = vpop.eup %3216 }
 0x9d5   :  { %v3219_v34 = vpop.eup %3218  ;;  %v2718_v56 = vadd.f32 1.0, %v3217_v2 }
 0x9d6   :  { %v3221_v61 = vpop.eup %3220  ;;  %v2730_v44 = vadd.f32 1.0, %v3219_v34 }
 0x9d7   :  { %v3223_v19 = vpop.eup %3222  ;;  %v2719_v62 = vadd.f32 1.0, %v3221_v61  ;;  %3224 = vrcp.f32 %v2718_v56 }
 0x9d8   :  { %v2731_v50 = vadd.f32 1.0, %v3223_v19  ;;  %3226 = vrcp.f32 %v2730_v44 }
 0x9d9   :  { %3228 = vrcp.f32 %v2719_v62 }
 0x9da   :  { %3230 = vrcp.f32 %v2731_v50 }
 0x9e1   :  { %v3225_v54 = vpop.eup %3224 }
 0x9e2   :  { %v3227_v59 = vpop.eup %3226 }
 0x9e3   :  { %v3229_v30 = vpop.eup %3228  ;;  %v2750_v28 = vmul.f32 %v3227_v59, %v4677_v48 }
 0x9e4   :  { %v3231_v33 = vpop.eup %3230 }
 0x9e5   :  { %v2751_v43 = vmul.f32 %v3231_v33, %v4679_v9 }
 0xa05   :  { %v2664_v55 = vpop.f32.mrb[60].mxu0  ;;  %v2705_v32 = vpop.f32.mrb[60].mxu1 }
 0xa06   :  { %v2665_v42 = vadd.f32 %v2664_v55, %v2544_v26  ;;  %v2706_v24 = vadd.f32 %v2705_v32, %v2546_v14  ;;  %v2666_v47 = vpop.f32.mrb[61].mxu0  ;;  %v2707_v23 = vpop.f32.mrb[61].mxu1 }
 0xa07   :  { %v2667_v3 = vadd.f32 %v2666_v47, %v2545_v63  ;;  %v2708_v18 = vadd.f32 %v2707_v23, %v2547_v6  ;;  %v2668_v39 = vpop.f32.mrb[62].mxu0  ;;  %v2709_v12 = vpop.f32.mrb[62].mxu1 }
 0xa08   :  { %3232 = vtanh.f32 %v2665_v42  ;;  %v2973_v7 = vmul.f32 -1.442695, %v2706_v24  ;;  %v2669_v5 = vpop.f32.mrb[63].mxu0  ;;  %v2710_v16 = vpop.f32.mrb[63].mxu1 }
 0xa09   :  { %3234 = vtanh.f32 %v2667_v3  ;;  %v2974_v15 = vmul.f32 -1.442695, %v2708_v18 }
 0xa0a   :  { %3236 = vpow2.f32 %v2973_v7 }
 0xa0b   :  { %3238 = vpow2.f32 %v2974_v15 }
 0xa12   :  { %v3233_v29 = vpop.eup %3232 }
 0xa13   :  { %v3235_v38 = vpop.eup %3234  ;;  %v2752_v37 = vmul.f32 %v3233_v29, %v3225_v54 }
 0xa14   :  { %v3237_v27 = vpop.eup %3236  ;;  %v2753_v21 = vmul.f32 %v3235_v38, %v3229_v30 }
 0xa15   :  { %v3239_v22 = vpop.eup %3238  ;;  %v2754_v20 = vadd.f32 %v2752_v37, %v2750_v28  ;;  %v2744_v45 = vadd.f32 1.0, %v3237_v27 }
 0xa16   :  { %v2755_v46 = vadd.f32 %v2753_v21, %v2751_v43  ;;  %v2745_v8 = vadd.f32 1.0, %v3239_v22 }
 0xa17   :  { %3240 = vtanh.f32 %v2754_v20 }
 0xa18   :  { %3242 = vrcp.f32 %v2744_v45 }
 0xa19   :  { %3244 = vtanh.f32 %v2755_v46 }
 0xa1a   :  { %3246 = vrcp.f32 %v2745_v8 }
 0xa21   :  { %v3241_v51 = vpop.eup %3240 }
 0xa22   :  { %v3243_v52 = vpop.eup %3242 }
 0xa23   :  { %v3245_v41 = vpop.eup %3244  ;;  %v2758_v35 = vmul.f32 %v3243_v52, %v3241_v51 }
 0xa24   :  { %v3247_v48 = vpop.eup %3246 }
 0xa25   :  { %v2759_v36 = vmul.f32 %v3247_v48, %v3245_v41 }
 0xa27   :  { %v2983_v9 = vpack.c.bf16 %v2759_v36, %v2758_v35 }
 0xa29   :  { %2769 = vst [vmem:[#allocation9 + $0x38] sm:$0xff] %v2983_v9 }
 0xa2a   :  { %3303 = shalt.err (!%p3300_p6)
}
 0xa2b   :  { %s3304_s10 = scalar_lea.hbm %s4767_s2, 1024 }
 0xa2c   :  { %p3305_p7 = scmp.ne.s32.totalorder %s4767_s2, %s3304_s10  ;;  %p3308_p8 = scmp.lt.u32.totalorder %s3304_s10, %s4767_s2 }
 0xa2e   :  { %p3310_p9 = pnand %p3308_p8, %p3305_p7 }
 0xa30   :  { %3313 = shalt.err (!%p3310_p9)
}
 0xa31   :  { %s3326_s15 = smov 128   ;;  %s3327_s16 = smov 8  }
 0xa32   :  { %2785 = dma.vmem_to_hbm [thread:$0]  %s2780_s6, 1024, %s4767_s2, [#allocation6], %s3326_s15, %s3326_s15, %s3327_s16  }
 0xa33   :  { %3318 = dma.done.wait [#allocation6], 1024  }
 0xa34   :  { %3319 = vsyncadd [#allocation6], 4294966272 }
 0xa35   :  { %2789 = vsyncpa [#allocation5], 1 }
 0xa36   :  { %2790 = vsyncpa [#allocation8], 1 }
 0xa37   :  { %2791 = vsyncpa [#allocation6], 1 }

</bundles_post_ra>
